<compile_context>
chip_gen: v7x
topology: tpu7x:2x2x1
jax: 0.10.0
libtpu: 0.0.40
codegen_flags: <defaults>
</compile_context>

<pallas_src>
import functools

import jax
import jax.numpy as jnp
from jax.experimental import pallas as pl
from jax.experimental.pallas import tpu as pltpu

_VMEM_BLOCK_BUDGET = 24 << 20   # target bytes for the double-buffered blocks
_VMEM_LIMIT_BYTES = 48 << 20    # scoped VMEM limit (under v7x's 64 MiB physical)


# ----------------------------------------------------------------------------
# GRU step (input gates gx precomputed outside; only the hh projection here).
# ----------------------------------------------------------------------------
def _gru_step(gx, h, w, b_n, D):
    """gx: (3, n, D) bf16/f32 = W_ih x + b_ih (+ b_hh for r,z gates).
    h: (n, D) f32.  w: (D, 3D) bf16 (fused) or tuple of 3 (D, D) bf16.
    b_n: (1, D) f32 hidden bias of the candidate gate.  Returns new h f32."""
    gx = gx.astype(jnp.float32)
    hb = h.astype(jnp.bfloat16)
    if isinstance(w, tuple):
        gh_r = jnp.dot(hb, w[0], preferred_element_type=jnp.float32)
        gh_z = jnp.dot(hb, w[1], preferred_element_type=jnp.float32)
        gh_n = jnp.dot(hb, w[2], preferred_element_type=jnp.float32)
    else:
        # Single MXU push/drain per step; D % 128 == 0 so the gate-column
        # slices below are lane-aligned.
        gh = jnp.dot(hb, w, preferred_element_type=jnp.float32)
        gh_r, gh_z, gh_n = gh[:, :D], gh[:, D:2 * D], gh[:, 2 * D:]
    r = jax.nn.sigmoid(gx[0] + gh_r)
    z = jax.nn.sigmoid(gx[1] + gh_z)
    n = jnp.tanh(gx[2] + r * (gh_n + b_n))
    return (1.0 - z) * n + z * h


def _load_w(w_ref, fused):
    if fused:
        return w_ref[...]                       # (D, 3D) bf16
    return (w_ref[0], w_ref[1], w_ref[2])       # 3 x (D, D) bf16


# ----------------------------------------------------------------------------
# Pallas kernels: one grid step == one chunk of recurrence steps.
# Grid = (N_tiles ["parallel"], L_chunks ["arbitrary"]); the hidden state is
# carried in VMEM scratch across the chunk axis, re-initialized at chunk 0.
# ----------------------------------------------------------------------------
def _gru_uni_kernel(gx_ref, w_ref, bn_ref, h0_ref, y_ref, h_scr,
                    *, chunk, D, fused, half):
    @pl.when(pl.program_id(1) == 0)
    def _():
        h_scr[...] = jnp.broadcast_to(h0_ref[...], h_scr.shape)

    w = _load_w(w_ref, fused)
    b_n = bn_ref[...]                           # (1, D) f32
    if half:
        # Two independent hidden chains (row halves of the tile) advance each
        # iteration, so chain A's matmul overlaps chain B's EUP/VPU gate math
        # (the serial recurrence is otherwise latency-bound).
        h_a = h_scr[pl.ds(0, half), :]
        h_b = h_scr[pl.ds(half, half), :]
        for i in range(chunk):                  # unrolled (chunk is static)
            gx = gx_ref[i].astype(jnp.float32)  # (3, n_tile, D)
            h_a = _gru_step(gx[:, 0:half, :], h_a, w, b_n, D)
            h_b = _gru_step(gx[:, half:2 * half, :], h_b, w, b_n, D)
            y_ref[i, pl.ds(0, half), :] = h_a
            y_ref[i, pl.ds(half, half), :] = h_b
        h_scr[pl.ds(0, half), :] = h_a
        h_scr[pl.ds(half, half), :] = h_b
    else:
        h = h_scr[...]
        for i in range(chunk):
            h = _gru_step(gx_ref[i], h, w, b_n, D)
            y_ref[i] = h
        h_scr[...] = h


def _gru_bi_kernel(gxf_ref, gxb_ref, wf_ref, wb_ref, bnf_ref, bnb_ref, h0_ref,
                   yf_ref, yb_ref, hf_scr, hb_scr, *, chunk, D, fused):
    @pl.when(pl.program_id(1) == 0)
    def _():
        hf_scr[...] = jnp.broadcast_to(h0_ref[0], hf_scr.shape)
        hb_scr[...] = jnp.broadcast_to(h0_ref[1], hb_scr.shape)

    wf = _load_w(wf_ref, fused)
    wb = _load_w(wb_ref, fused)
    bnf = bnf_ref[...]
    bnb = bnb_ref[...]
    hf = hf_scr[...]
    hb = hb_scr[...]
    # Backward-direction blocks are indexed reversed by the BlockSpec; inside
    # the chunk we walk them back-to-front, so both independent chains advance
    # one real step per iteration (interleaved matmul / gate math).
    for i in range(chunk):
        j = chunk - 1 - i
        hf = _gru_step(gxf_ref[i], hf, wf, bnf, D)
        hb = _gru_step(gxb_ref[j], hb, wb, bnb, D)
        yf_ref[i] = hf
        yb_ref[j] = hb
    hf_scr[...] = hf
    hb_scr[...] = hb


# ----------------------------------------------------------------------------
# VMEM-budget-aware tile picking
# ----------------------------------------------------------------------------
def _valid_n_tiles(N, cap):
    # Multiples of 16 keep bf16 gx blocks on the native (16,128) sublane tile;
    # the full dimension is always a legal block.
    c16 = [d for d in range(min(N, cap), 0, -1) if N % d == 0 and d % 16 == 0]
    if c16:
        return c16
    if N % 16 == 0 or N <= cap:
        return [N]
    c8 = [d for d in range(min(N, cap), 0, -1) if N % d == 0 and d % 8 == 0]
    return c8 or [N]


def _pick_tiles(L, N, D, *, n_dirs, budget_bytes=_VMEM_BLOCK_BUDGET,
                max_chunk=16, max_n_tile=512):
    """Pick (chunk, n_tile) with chunk | L, n_tile | N, fitting the VMEM budget.
    Prefer n_tile <= N // 2 so the 'parallel' axis has >= 2 tiles (megacore)."""
    n_cap = min(max_n_tile, N // 2) if N >= 32 else min(max_n_tile, N)
    cand_n = _valid_n_tiles(N, n_cap)
    n_tile = cand_n[0]

    chunk_cands = [c for c in range(min(L, max_chunk), 0, -1) if L % c == 0]
    chunk = chunk_cands[0]

    def footprint(c, nt):
        gx = n_dirs * c * 3 * nt * D * 2 * 2     # bf16 gates, double-buffered
        y = n_dirs * c * nt * D * 4 * 2          # f32 outputs, double-buffered
        w = n_dirs * 3 * D * D * 2 * 2           # bf16 weights, double-buffered
        scr = n_dirs * nt * D * 4                # f32 hidden scratch
        return gx + y + w + scr

    while footprint(chunk, n_tile) > budget_bytes:
        smaller_c = [c for c in chunk_cands if c < chunk]
        if smaller_c:                            # shrink chunk first (keeps
            chunk = smaller_c[0]                 # the matmul M-dim large)
            continue
        smaller_n = [d for d in cand_n if d < n_tile]
        if smaller_n:
            n_tile = smaller_n[0]
            continue
        break
    return chunk, n_tile


# ----------------------------------------------------------------------------
# pallas_call wrappers
# ----------------------------------------------------------------------------
def _w_spec(D, fused):
    if fused:
        return pl.BlockSpec((D, 3 * D), lambda n, c: (0, 0))
    return pl.BlockSpec((3, D, D), lambda n, c: (0, 0, 0))


def _gru_uni(gx, w, b_n, h0, *, chunk, n_tile, fused):
    """gx: (L, 3, N, D) bf16, w: (D,3D)|(3,D,D) bf16, b_n: (1,D) f32,
    h0: (1, D) f32 -> y: (L, N, D) f32."""
    L, _, N, D = gx.shape
    nn, nc = N // n_tile, L // chunk
    half = n_tile // 2 if n_tile % 16 == 0 else 0
    kernel = functools.partial(_gru_uni_kernel, chunk=chunk, D=D,
                               fused=fused, half=half)
    return pl.pallas_call(
        kernel,
        out_shape=jax.ShapeDtypeStruct((L, N, D), jnp.float32),
        grid_spec=pltpu.PrefetchScalarGridSpec(
            num_scalar_prefetch=0,
            grid=(nn, nc),
            in_specs=[
                pl.BlockSpec((chunk, 3, n_tile, D), lambda n, c: (c, 0, n, 0)),
                _w_spec(D, fused),
                pl.BlockSpec((1, D), lambda n, c: (0, 0)),
                pl.BlockSpec((1, D), lambda n, c: (0, 0)),
            ],
            out_specs=pl.BlockSpec((chunk, n_tile, D), lambda n, c: (c, n, 0)),
            scratch_shapes=[pltpu.VMEM((n_tile, D), jnp.float32)],
        ),
        compiler_params=pltpu.CompilerParams(
            dimension_semantics=("parallel", "arbitrary"),
            vmem_limit_bytes=_VMEM_LIMIT_BYTES),
    )(gx, w, b_n, h0)


def _gru_bi(gxf, gxb, wf, wb, bnf, bnb, h0, *, chunk, n_tile, fused):
    """Fused forward+reverse GRU.  gxf/gxb: (L, 3, N, D) bf16 per direction,
    h0: (2, 1, D) f32 -> (y_fwd, y_bwd) each (L, N, D) f32 (original order)."""
    L, _, N, D = gxf.shape
    nn, nc = N // n_tile, L // chunk
    kernel = functools.partial(_gru_bi_kernel, chunk=chunk, D=D, fused=fused)

    fwd_in = lambda n, c: (c, 0, n, 0)
    bwd_in = lambda n, c: (nc - 1 - c, 0, n, 0)
    fwd_out = lambda n, c: (c, n, 0)
    bwd_out = lambda n, c: (nc - 1 - c, n, 0)

    return pl.pallas_call(
        kernel,
        out_shape=(jax.ShapeDtypeStruct((L, N, D), jnp.float32),
                   jax.ShapeDtypeStruct((L, N, D), jnp.float32)),
        grid_spec=pltpu.PrefetchScalarGridSpec(
            num_scalar_prefetch=0,
            grid=(nn, nc),
            in_specs=[
                pl.BlockSpec((chunk, 3, n_tile, D), fwd_in),
                pl.BlockSpec((chunk, 3, n_tile, D), bwd_in),
                _w_spec(D, fused),
                _w_spec(D, fused),
                pl.BlockSpec((1, D), lambda n, c: (0, 0)),
                pl.BlockSpec((1, D), lambda n, c: (0, 0)),
                pl.BlockSpec((2, 1, D), lambda n, c: (0, 0, 0)),
            ],
            out_specs=[pl.BlockSpec((chunk, n_tile, D), fwd_out),
                       pl.BlockSpec((chunk, n_tile, D), bwd_out)],
            scratch_shapes=[pltpu.VMEM((n_tile, D), jnp.float32),
                            pltpu.VMEM((n_tile, D), jnp.float32)],
        ),
        compiler_params=pltpu.CompilerParams(
            dimension_semantics=("parallel", "arbitrary"),
            vmem_limit_bytes=_VMEM_LIMIT_BYTES),
    )(gxf, gxb, wf, wb, bnf, bnb, h0)


# ----------------------------------------------------------------------------
# Parameter construction (matches nn.GRU / TimeDelayedStack.__init__ shapes)
# ----------------------------------------------------------------------------
def init_params(key, dims):
    k = 1.0 / jnp.sqrt(jnp.float32(dims))

    def u(key, shape):
        return jax.random.uniform(key, shape, jnp.float32, -k, k)

    keys = jax.random.split(key, 14)
    return {
        # time_rnn (unidirectional GRU), PyTorch gate order [r, z, n]
        "time_w_ih": u(keys[0], (3 * dims, dims)),
        "time_w_hh": u(keys[1], (3 * dims, dims)),
        "time_b_ih": u(keys[2], (3 * dims,)),
        "time_b_hh": u(keys[3], (3 * dims,)),
        # bi_freq_rnn forward direction
        "freq_w_ih_f": u(keys[4], (3 * dims, dims)),
        "freq_w_hh_f": u(keys[5], (3 * dims, dims)),
        "freq_b_ih_f": u(keys[6], (3 * dims,)),
        "freq_b_hh_f": u(keys[7], (3 * dims,)),
        # bi_freq_rnn reverse direction
        "freq_w_ih_r": u(keys[8], (3 * dims, dims)),
        "freq_w_hh_r": u(keys[9], (3 * dims, dims)),
        "freq_b_ih_r": u(keys[10], (3 * dims,)),
        "freq_b_hh_r": u(keys[11], (3 * dims,)),
        # learned initial hidden states (zeros in torch __init__; randomized
        # here so the h0 code path is actually exercised by the check)
        "time_hidden": 0.1 * jax.random.normal(keys[12], (1, 1, dims), jnp.float32),
        "bi_freq_hidden": 0.1 * jax.random.normal(keys[13], (2, 1, dims), jnp.float32),
    }


# ----------------------------------------------------------------------------
# TimeDelayedStack forward
# ----------------------------------------------------------------------------
def time_delayed_stack_forward(x_time, params):
    """x_time: (B, T, M, D) -> (B, T, M, 3D)"""
    B, T, M, D = x_time.shape
    xb = x_time.astype(jnp.bfloat16)
    fused = (D % 128 == 0)

    def prep_hh_w(w_hh):
        w3 = w_hh.reshape(3, D, D)                               # (gate,out,in)
        if fused:
            # (in, gate*out): one (n,D)x(D,3D) matmul, lane-aligned gate cols.
            return jnp.transpose(w3, (2, 0, 1)).reshape(D, 3 * D).astype(jnp.bfloat16)
        return jnp.transpose(w3, (0, 2, 1)).astype(jnp.bfloat16)  # (gate,in,out)

    def fold_bias(b_ih, b_hh):
        # Fold b_hh[r], b_hh[z] into the precomputed gates; keep only b_hh[n]
        # in-kernel (it is scaled by the reset gate).
        gate_bias = (b_ih.reshape(3, D)
                     .at[0].add(b_hh[:D])
                     .at[1].add(b_hh[D:2 * D])).astype(jnp.float32)
        b_n = b_hh[2 * D:].reshape(1, D).astype(jnp.float32)
        return gate_bias, b_n

    def input_gates(eq, w_ih, gate_bias, L, N):
        # One large bf16 matmul over all timesteps (hoisted out of recurrence),
        # f32 accumulation; gate-major (L, 3, N, D) and stored as bf16.
        w3 = w_ih.reshape(3, D, D).astype(jnp.bfloat16)          # (gate,out,in)
        g = jnp.einsum(eq, xb, w3, preferred_element_type=jnp.float32)
        g = g.reshape(L, 3, N, D) + gate_bias.reshape(1, 3, 1, D)
        return g.astype(jnp.bfloat16)

    # ---- time RNN over T, for every (B, M) sequence -------------------------
    Nt = B * M
    gbias_t, bn_t = fold_bias(params["time_b_ih"], params["time_b_hh"])
    gx_t = input_gates('btmi,goi->tgbmo', params["time_w_ih"], gbias_t, T, Nt)
    wt = prep_hh_w(params["time_w_hh"])
    h0_t = params["time_hidden"].reshape(1, D).astype(jnp.float32)
    chunk_t, ntile_t = _pick_tiles(T, Nt, D, n_dirs=1)
    y1 = _gru_uni(gx_t, wt, bn_t, h0_t,
                  chunk=chunk_t, n_tile=ntile_t, fused=fused)     # (T, B*M, D)
    x_1 = jnp.transpose(y1.reshape(T, B, M, D), (1, 0, 2, 3))     # (B, T, M, D)

    # ---- fused bidirectional freq RNN over M, for every (B, T) sequence -----
    Nf = B * T
    gbias_f, bn_f = fold_bias(params["freq_b_ih_f"], params["freq_b_hh_f"])
    gbias_r, bn_r = fold_bias(params["freq_b_ih_r"], params["freq_b_hh_r"])
    gx_ff = input_gates('btmi,goi->mgbto', params["freq_w_ih_f"], gbias_f, M, Nf)
    gx_fb = input_gates('btmi,goi->mgbto', params["freq_w_ih_r"], gbias_r, M, Nf)
    wff = prep_hh_w(params["freq_w_hh_f"])
    wfb = prep_hh_w(params["freq_w_hh_r"])
    h0_f = params["bi_freq_hidden"].reshape(2, 1, D).astype(jnp.float32)
    chunk_f, ntile_f = _pick_tiles(M, Nf, D, n_dirs=2)
    yf, ybk = _gru_bi(gx_ff, gx_fb, wff, wfb, bn_f, bn_r, h0_f,
                      chunk=chunk_f, n_tile=ntile_f, fused=fused)
    x_2_and_3 = jnp.transpose(jnp.concatenate([yf, ybk], axis=-1),
                              (1, 0, 2)).reshape(B, T, M, 2 * D)

    return jnp.concatenate([x_1, x_2_and_3], axis=3)              # (B, T, M, 3D)


# ----------------------------------------------------------------------------
# Pure-JAX f32 reference (lax.scan) for verification
# ----------------------------------------------------------------------------
def _gru_ref(x, w_ih, w_hh, b_ih, b_hh, h0, reverse=False):
    D = w_hh.shape[1]
    xs = jnp.swapaxes(x, 0, 1)
    if reverse:
        xs = xs[::-1]

    def step(h, xt):
        gx = xt @ w_ih.T + b_ih
        gh = h @ w_hh.T + b_hh
        r = jax.nn.sigmoid(gx[:, :D] + gh[:, :D])
        z = jax.nn.sigmoid(gx[:, D:2 * D] + gh[:, D:2 * D])
        n = jnp.tanh(gx[:, 2 * D:] + r * gh[:, 2 * D:])
        h_new = (1.0 - z) * n + z * h
        return h_new, h_new

    _, ys = jax.lax.scan(step, h0, xs)
    if reverse:
        ys = ys[::-1]
    return jnp.swapaxes(ys, 0, 1)


def time_delayed_stack_ref(x_time, params):
    B, T, M, D = x_time.shape
    time_input = jnp.transpose(x_time, (0, 2, 1, 3)).reshape(B * M, T, D)
    freq_input = x_time.reshape(B * T, M, D)
    h0_time = jnp.broadcast_to(params["time_hidden"][0], (B * M, D))
    h0_f = jnp.broadcast_to(params["bi_freq_hidden"][0], (B * T, D))
    h0_r = jnp.broadcast_to(params["bi_freq_hidden"][1], (B * T, D))
    x_1 = _gru_ref(time_input, params["time_w_ih"], params["time_w_hh"],
                   params["time_b_ih"], params["time_b_hh"], h0_time)
    y_f = _gru_ref(freq_input, params["freq_w_ih_f"], params["freq_w_hh_f"],
                   params["freq_b_ih_f"], params["freq_b_hh_f"], h0_f)
    y_b = _gru_ref(freq_input, params["freq_w_ih_r"], params["freq_w_hh_r"],
                   params["freq_b_ih_r"], params["freq_b_hh_r"], h0_r,
                   reverse=True)
    x_1 = jnp.transpose(x_1.reshape(B, M, T, D), (0, 2, 1, 3))
    x_2_and_3 = jnp.concatenate([y_f, y_b], axis=-1).reshape(B, T, M, 2 * D)
    return jnp.concatenate([x_1, x_2_and_3], axis=3)


# ----------------------------------------------------------------------------
if __name__ == "__main__":
    B, T, M, D = 2, 8, 16, 32
    key = jax.random.PRNGKey(0)
    k_x, k_p = jax.random.split(key)
    x_time = jax.random.normal(k_x, (B, T, M, D), jnp.float32)
    params = init_params(k_p, D)

    out = jax.block_until_ready(time_delayed_stack_forward(x_time, params))
    assert out.shape == (B, T, M, 3 * D), out.shape

    ref = jax.block_until_ready(time_delayed_stack_ref(x_time, params))
    max_err = float(jnp.max(jnp.abs(out - ref)))
    # bf16 MXU operands + bf16-stored precomputed gates (f32 accumulation,
    # f32 hidden state / gate math) vs the pure-f32 reference.
    assert max_err < 1e-1, f"max abs error too large: {max_err}"

    print("KERNEL_OK")
</pallas_src>

<mosaic_0001>
module attributes {stable_mosaic.version = 11 : i64} {
  func.func @_gru_uni_kernel(%arg0: i32, %arg1: i32, %arg2: memref<8x3x16x32xbf16, #tpu.memory_space<vmem>>, %arg3: memref<3x32x32xbf16, #tpu.memory_space<vmem>>, %arg4: memref<1x32xf32, #tpu.memory_space<vmem>>, %arg5: memref<1x32xf32, #tpu.memory_space<vmem>>, %arg6: memref<8x16x32xf32, #tpu.memory_space<vmem>>, %arg7: memref<16x32xf32, #tpu.memory_space<vmem>>) attributes {dimension_semantics = [#tpu.dimension_semantics<parallel>, #tpu.dimension_semantics<arbitrary>], iteration_bounds = array<i64: 2, 1>, scalar_prefetch = 0 : i64, scratch_operands = 1 : i64, tpu.core_type = #tpu.core_type<tc>, window_params = [{transform_indices = @transform_0, window_bounds = array<i64: 8, 3, 16, 32>}, {pipeline_mode = #tpu.pipeline_mode<synchronous>, transform_indices = @transform_1, window_bounds = array<i64: 3, 32, 32>}, {pipeline_mode = #tpu.pipeline_mode<synchronous>, transform_indices = @transform_2, window_bounds = array<i64: 1, 32>}, {pipeline_mode = #tpu.pipeline_mode<synchronous>, transform_indices = @transform_3, window_bounds = array<i64: 1, 32>}, {transform_indices = @transform_4, window_bounds = array<i64: 8, 16, 32>}]} {
    %c0_i32 = arith.constant 0 : i32
    %0 = arith.cmpi eq, %arg1, %c0_i32 : i32
    %1 = arith.extui %0 : i1 to i32
    %c0_i32_0 = arith.constant 0 : i32
    %2 = arith.cmpi ne, %1, %c0_i32_0 : i32
    scf.if %2 {
      %c0_186 = arith.constant 0 : index
      %c0_187 = arith.constant 0 : index
      %614 = vector.load %arg5[%c0_186, %c0_187] : memref<1x32xf32, #tpu.memory_space<vmem>>, vector<1x32xf32>
      %615 = vector.shape_cast %614 : vector<1x32xf32> to vector<1x32xf32>
      %616 = vector.broadcast %615 : vector<1x32xf32> to vector<16x32xf32>
      %c0_188 = arith.constant 0 : index
      %c0_189 = arith.constant 0 : index
      %617 = vector.load %arg7[%c0_188, %c0_189] : memref<16x32xf32, #tpu.memory_space<vmem>>, vector<16x32xf32>
      tpu.vector_store %arg7[%c0_188, %c0_189], %616 {strides = array<i32>} : memref<16x32xf32, #tpu.memory_space<vmem>>, vector<16x32xf32>,
    } else {
    }
    %c0 = arith.constant 0 : index
    %c0_1 = arith.constant 0 : index
    %c0_2 = arith.constant 0 : index
    %3 = vector.load %arg3[%c0, %c0_1, %c0_2] : memref<3x32x32xbf16, #tpu.memory_space<vmem>>, vector<1x32x32xbf16>
    %4 = vector.shape_cast %3 : vector<1x32x32xbf16> to vector<32x32xbf16>
    %c1 = arith.constant 1 : index
    %c0_3 = arith.constant 0 : index
    %c0_4 = arith.constant 0 : index
    %5 = vector.load %arg3[%c1, %c0_3, %c0_4] : memref<3x32x32xbf16, #tpu.memory_space<vmem>>, vector<1x32x32xbf16>
    %6 = vector.shape_cast %5 : vector<1x32x32xbf16> to vector<32x32xbf16>
    %c2 = arith.constant 2 : index
    %c0_5 = arith.constant 0 : index
    %c0_6 = arith.constant 0 : index
    %7 = vector.load %arg3[%c2, %c0_5, %c0_6] : memref<3x32x32xbf16, #tpu.memory_space<vmem>>, vector<1x32x32xbf16>
    %8 = vector.shape_cast %7 : vector<1x32x32xbf16> to vector<32x32xbf16>
    %c0_7 = arith.constant 0 : index
    %c0_8 = arith.constant 0 : index
    %9 = vector.load %arg4[%c0_7, %c0_8] : memref<1x32xf32, #tpu.memory_space<vmem>>, vector<1x32xf32>
    %c0_9 = arith.constant 0 : index
    %c0_10 = arith.constant 0 : index
    %10 = vector.load %arg7[%c0_9, %c0_10] : memref<16x32xf32, #tpu.memory_space<vmem>>, vector<8x32xf32>
    %c8 = arith.constant 8 : index
    %c0_11 = arith.constant 0 : index
    %11 = vector.load %arg7[%c8, %c0_11] : memref<16x32xf32, #tpu.memory_space<vmem>>, vector<8x32xf32>
    %c0_12 = arith.constant 0 : index
    %c0_13 = arith.constant 0 : index
    %c0_14 = arith.constant 0 : index
    %c0_15 = arith.constant 0 : index
    %12 = vector.load %arg2[%c0_12, %c0_13, %c0_14, %c0_15] : memref<8x3x16x32xbf16, #tpu.memory_space<vmem>>, vector<1x3x16x32xbf16>
    %13 = vector.shape_cast %12 : vector<1x3x16x32xbf16> to vector<3x16x32xbf16>
    %14 = arith.extf %13 : vector<3x16x32xbf16> to vector<3x16x32xf32>
    %15 = vector.extract_strided_slice %14 {offsets = [0, 0, 0], sizes = [3, 8, 32], strides = [1, 1, 1]} : vector<3x16x32xf32> to vector<3x8x32xf32>
    %16 = arith.truncf %10 : vector<8x32xf32> to vector<8x32xbf16>
    %cst = arith.constant dense<0.000000e+00> : vector<8x32xf32>
    %17 = tpu.matmul %16, %4, %cst {dimension_numbers = #tpu.dot_dimension_numbers<[1], [0], [0], [1], [0, 0, 1, 1], [], []>} : vector<8x32xbf16>, vector<32x32xbf16>, vector<8x32xf32> -> vector<8x32xf32>
    %cst_16 = arith.constant dense<0.000000e+00> : vector<8x32xf32>
    %18 = tpu.matmul %16, %6, %cst_16 {dimension_numbers = #tpu.dot_dimension_numbers<[1], [0], [0], [1], [0, 0, 1, 1], [], []>} : vector<8x32xbf16>, vector<32x32xbf16>, vector<8x32xf32> -> vector<8x32xf32>
    %cst_17 = arith.constant dense<0.000000e+00> : vector<8x32xf32>
    %19 = tpu.matmul %16, %8, %cst_17 {dimension_numbers = #tpu.dot_dimension_numbers<[1], [0], [0], [1], [0, 0, 1, 1], [], []>} : vector<8x32xbf16>, vector<32x32xbf16>, vector<8x32xf32> -> vector<8x32xf32>
    %20 = vector.extract_strided_slice %15 {offsets = [0, 0, 0], sizes = [1, 8, 32], strides = [1, 1, 1]} : vector<3x8x32xf32> to vector<1x8x32xf32>
    %21 = vector.shape_cast %20 : vector<1x8x32xf32> to vector<8x32xf32>
    %22 = arith.addf %21, %17 : vector<8x32xf32>
    %23 = arith.negf %22 : vector<8x32xf32>
    %24 = math.exp %23 : vector<8x32xf32>
    %cst_18 = arith.constant 1.000000e+00 : f32
    %25 = vector.broadcast %cst_18 : f32 to vector<8x32xf32>
    %26 = arith.addf %25, %24 : vector<8x32xf32>
    %27 = arith.divf %25, %26 : vector<8x32xf32>
    %28 = vector.extract_strided_slice %15 {offsets = [1, 0, 0], sizes = [1, 8, 32], strides = [1, 1, 1]} : vector<3x8x32xf32> to vector<1x8x32xf32>
    %29 = vector.shape_cast %28 : vector<1x8x32xf32> to vector<8x32xf32>
    %30 = arith.addf %29, %18 : vector<8x32xf32>
    %31 = arith.negf %30 : vector<8x32xf32>
    %32 = math.exp %31 : vector<8x32xf32>
    %cst_19 = arith.constant 1.000000e+00 : f32
    %33 = vector.broadcast %cst_19 : f32 to vector<8x32xf32>
    %34 = arith.addf %33, %32 : vector<8x32xf32>
    %35 = arith.divf %33, %34 : vector<8x32xf32>
    %36 = vector.extract_strided_slice %15 {offsets = [2, 0, 0], sizes = [1, 8, 32], strides = [1, 1, 1]} : vector<3x8x32xf32> to vector<1x8x32xf32>
    %37 = vector.shape_cast %36 : vector<1x8x32xf32> to vector<8x32xf32>
    %38 = vector.broadcast %9 : vector<1x32xf32> to vector<8x32xf32>
    %39 = arith.addf %19, %38 : vector<8x32xf32>
    %40 = arith.mulf %27, %39 : vector<8x32xf32>
    %41 = arith.addf %37, %40 : vector<8x32xf32>
    %42 = math.tanh %41 : vector<8x32xf32>
    %cst_20 = arith.constant 1.000000e+00 : f32
    %43 = vector.broadcast %cst_20 : f32 to vector<8x32xf32>
    %44 = arith.subf %43, %35 : vector<8x32xf32>
    %45 = arith.mulf %44, %42 : vector<8x32xf32>
    %46 = arith.mulf %35, %10 : vector<8x32xf32>
    %47 = arith.addf %45, %46 : vector<8x32xf32>
    %48 = vector.extract_strided_slice %14 {offsets = [0, 8, 0], sizes = [3, 8, 32], strides = [1, 1, 1]} : vector<3x16x32xf32> to vector<3x8x32xf32>
    %49 = arith.truncf %11 : vector<8x32xf32> to vector<8x32xbf16>
    %cst_21 = arith.constant dense<0.000000e+00> : vector<8x32xf32>
    %50 = tpu.matmul %49, %4, %cst_21 {dimension_numbers = #tpu.dot_dimension_numbers<[1], [0], [0], [1], [0, 0, 1, 1], [], []>} : vector<8x32xbf16>, vector<32x32xbf16>, vector<8x32xf32> -> vector<8x32xf32>
    %cst_22 = arith.constant dense<0.000000e+00> : vector<8x32xf32>
    %51 = tpu.matmul %49, %6, %cst_22 {dimension_numbers = #tpu.dot_dimension_numbers<[1], [0], [0], [1], [0, 0, 1, 1], [], []>} : vector<8x32xbf16>, vector<32x32xbf16>, vector<8x32xf32> -> vector<8x32xf32>
    %cst_23 = arith.constant dense<0.000000e+00> : vector<8x32xf32>
    %52 = tpu.matmul %49, %8, %cst_23 {dimension_numbers = #tpu.dot_dimension_numbers<[1], [0], [0], [1], [0, 0, 1, 1], [], []>} : vector<8x32xbf16>, vector<32x32xbf16>, vector<8x32xf32> -> vector<8x32xf32>
    %53 = vector.extract_strided_slice %48 {offsets = [0, 0, 0], sizes = [1, 8, 32], strides = [1, 1, 1]} : vector<3x8x32xf32> to vector<1x8x32xf32>
    %54 = vector.shape_cast %53 : vector<1x8x32xf32> to vector<8x32xf32>
    %55 = arith.addf %54, %50 : vector<8x32xf32>
    %56 = arith.negf %55 : vector<8x32xf32>
    %57 = math.exp %56 : vector<8x32xf32>
    %cst_24 = arith.constant 1.000000e+00 : f32
    %58 = vector.broadcast %cst_24 : f32 to vector<8x32xf32>
    %59 = arith.addf %58, %57 : vector<8x32xf32>
    %60 = arith.divf %58, %59 : vector<8x32xf32>
    %61 = vector.extract_strided_slice %48 {offsets = [1, 0, 0], sizes = [1, 8, 32], strides = [1, 1, 1]} : vector<3x8x32xf32> to vector<1x8x32xf32>
    %62 = vector.shape_cast %61 : vector<1x8x32xf32> to vector<8x32xf32>
    %63 = arith.addf %62, %51 : vector<8x32xf32>
    %64 = arith.negf %63 : vector<8x32xf32>
    %65 = math.exp %64 : vector<8x32xf32>
    %cst_25 = arith.constant 1.000000e+00 : f32
    %66 = vector.broadcast %cst_25 : f32 to vector<8x32xf32>
    %67 = arith.addf %66, %65 : vector<8x32xf32>
    %68 = arith.divf %66, %67 : vector<8x32xf32>
    %69 = vector.extract_strided_slice %48 {offsets = [2, 0, 0], sizes = [1, 8, 32], strides = [1, 1, 1]} : vector<3x8x32xf32> to vector<1x8x32xf32>
    %70 = vector.shape_cast %69 : vector<1x8x32xf32> to vector<8x32xf32>
    %71 = vector.broadcast %9 : vector<1x32xf32> to vector<8x32xf32>
    %72 = arith.addf %52, %71 : vector<8x32xf32>
    %73 = arith.mulf %60, %72 : vector<8x32xf32>
    %74 = arith.addf %70, %73 : vector<8x32xf32>
    %75 = math.tanh %74 : vector<8x32xf32>
    %cst_26 = arith.constant 1.000000e+00 : f32
    %76 = vector.broadcast %cst_26 : f32 to vector<8x32xf32>
    %77 = arith.subf %76, %68 : vector<8x32xf32>
    %78 = arith.mulf %77, %75 : vector<8x32xf32>
    %79 = arith.mulf %68, %11 : vector<8x32xf32>
    %80 = arith.addf %78, %79 : vector<8x32xf32>
    %c0_27 = arith.constant 0 : index
    %c0_28 = arith.constant 0 : index
    %c0_29 = arith.constant 0 : index
    %81 = vector.load %arg6[%c0_27, %c0_28, %c0_29] : memref<8x16x32xf32, #tpu.memory_space<vmem>>, vector<1x8x32xf32>
    %82 = vector.shape_cast %81 : vector<1x8x32xf32> to vector<8x32xf32>
    %83 = vector.shape_cast %47 : vector<8x32xf32> to vector<1x8x32xf32>
    tpu.vector_store %arg6[%c0_27, %c0_28, %c0_29], %83 {strides = array<i32>} : memref<8x16x32xf32, #tpu.memory_space<vmem>>, vector<1x8x32xf32>,
    %c0_30 = arith.constant 0 : index
    %c8_31 = arith.constant 8 : index
    %c0_32 = arith.constant 0 : index
    %84 = vector.load %arg6[%c0_30, %c8_31, %c0_32] : memref<8x16x32xf32, #tpu.memory_space<vmem>>, vector<1x8x32xf32>
    %85 = vector.shape_cast %84 : vector<1x8x32xf32> to vector<8x32xf32>
    %86 = vector.shape_cast %80 : vector<8x32xf32> to vector<1x8x32xf32>
    tpu.vector_store %arg6[%c0_30, %c8_31, %c0_32], %86 {strides = array<i32>} : memref<8x16x32xf32, #tpu.memory_space<vmem>>, vector<1x8x32xf32>,
    %c1_33 = arith.constant 1 : index
    %c0_34 = arith.constant 0 : index
    %c0_35 = arith.constant 0 : index
    %c0_36 = arith.constant 0 : index
    %87 = vector.load %arg2[%c1_33, %c0_34, %c0_35, %c0_36] : memref<8x3x16x32xbf16, #tpu.memory_space<vmem>>, vector<1x3x16x32xbf16>
    %88 = vector.shape_cast %87 : vector<1x3x16x32xbf16> to vector<3x16x32xbf16>
    %89 = arith.extf %88 : vector<3x16x32xbf16> to vector<3x16x32xf32>
    %90 = vector.extract_strided_slice %89 {offsets = [0, 0, 0], sizes = [3, 8, 32], strides = [1, 1, 1]} : vector<3x16x32xf32> to vector<3x8x32xf32>
    %91 = arith.truncf %47 : vector<8x32xf32> to vector<8x32xbf16>
    %cst_37 = arith.constant dense<0.000000e+00> : vector<8x32xf32>
    %92 = tpu.matmul %91, %4, %cst_37 {dimension_numbers = #tpu.dot_dimension_numbers<[1], [0], [0], [1], [0, 0, 1, 1], [], []>} : vector<8x32xbf16>, vector<32x32xbf16>, vector<8x32xf32> -> vector<8x32xf32>
    %cst_38 = arith.constant dense<0.000000e+00> : vector<8x32xf32>
    %93 = tpu.matmul %91, %6, %cst_38 {dimension_numbers = #tpu.dot_dimension_numbers<[1], [0], [0], [1], [0, 0, 1, 1], [], []>} : vector<8x32xbf16>, vector<32x32xbf16>, vector<8x32xf32> -> vector<8x32xf32>
    %cst_39 = arith.constant dense<0.000000e+00> : vector<8x32xf32>
    %94 = tpu.matmul %91, %8, %cst_39 {dimension_numbers = #tpu.dot_dimension_numbers<[1], [0], [0], [1], [0, 0, 1, 1], [], []>} : vector<8x32xbf16>, vector<32x32xbf16>, vector<8x32xf32> -> vector<8x32xf32>
    %95 = vector.extract_strided_slice %90 {offsets = [0, 0, 0], sizes = [1, 8, 32], strides = [1, 1, 1]} : vector<3x8x32xf32> to vector<1x8x32xf32>
    %96 = vector.shape_cast %95 : vector<1x8x32xf32> to vector<8x32xf32>
    %97 = arith.addf %96, %92 : vector<8x32xf32>
    %98 = arith.negf %97 : vector<8x32xf32>
    %99 = math.exp %98 : vector<8x32xf32>
    %cst_40 = arith.constant 1.000000e+00 : f32
    %100 = vector.broadcast %cst_40 : f32 to vector<8x32xf32>
    %101 = arith.addf %100, %99 : vector<8x32xf32>
    %102 = arith.divf %100, %101 : vector<8x32xf32>
    %103 = vector.extract_strided_slice %90 {offsets = [1, 0, 0], sizes = [1, 8, 32], strides = [1, 1, 1]} : vector<3x8x32xf32> to vector<1x8x32xf32>
    %104 = vector.shape_cast %103 : vector<1x8x32xf32> to vector<8x32xf32>
    %105 = arith.addf %104, %93 : vector<8x32xf32>
    %106 = arith.negf %105 : vector<8x32xf32>
    %107 = math.exp %106 : vector<8x32xf32>
    %cst_41 = arith.constant 1.000000e+00 : f32
    %108 = vector.broadcast %cst_41 : f32 to vector<8x32xf32>
    %109 = arith.addf %108, %107 : vector<8x32xf32>
    %110 = arith.divf %108, %109 : vector<8x32xf32>
    %111 = vector.extract_strided_slice %90 {offsets = [2, 0, 0], sizes = [1, 8, 32], strides = [1, 1, 1]} : vector<3x8x32xf32> to vector<1x8x32xf32>
    %112 = vector.shape_cast %111 : vector<1x8x32xf32> to vector<8x32xf32>
    %113 = vector.broadcast %9 : vector<1x32xf32> to vector<8x32xf32>
    %114 = arith.addf %94, %113 : vector<8x32xf32>
    %115 = arith.mulf %102, %114 : vector<8x32xf32>
    %116 = arith.addf %112, %115 : vector<8x32xf32>
    %117 = math.tanh %116 : vector<8x32xf32>
    %cst_42 = arith.constant 1.000000e+00 : f32
    %118 = vector.broadcast %cst_42 : f32 to vector<8x32xf32>
    %119 = arith.subf %118, %110 : vector<8x32xf32>
    %120 = arith.mulf %119, %117 : vector<8x32xf32>
    %121 = arith.mulf %110, %47 : vector<8x32xf32>
    %122 = arith.addf %120, %121 : vector<8x32xf32>
    %123 = vector.extract_strided_slice %89 {offsets = [0, 8, 0], sizes = [3, 8, 32], strides = [1, 1, 1]} : vector<3x16x32xf32> to vector<3x8x32xf32>
    %124 = arith.truncf %80 : vector<8x32xf32> to vector<8x32xbf16>
    %cst_43 = arith.constant dense<0.000000e+00> : vector<8x32xf32>
    %125 = tpu.matmul %124, %4, %cst_43 {dimension_numbers = #tpu.dot_dimension_numbers<[1], [0], [0], [1], [0, 0, 1, 1], [], []>} : vector<8x32xbf16>, vector<32x32xbf16>, vector<8x32xf32> -> vector<8x32xf32>
    %cst_44 = arith.constant dense<0.000000e+00> : vector<8x32xf32>
    %126 = tpu.matmul %124, %6, %cst_44 {dimension_numbers = #tpu.dot_dimension_numbers<[1], [0], [0], [1], [0, 0, 1, 1], [], []>} : vector<8x32xbf16>, vector<32x32xbf16>, vector<8x32xf32> -> vector<8x32xf32>
    %cst_45 = arith.constant dense<0.000000e+00> : vector<8x32xf32>
    %127 = tpu.matmul %124, %8, %cst_45 {dimension_numbers = #tpu.dot_dimension_numbers<[1], [0], [0], [1], [0, 0, 1, 1], [], []>} : vector<8x32xbf16>, vector<32x32xbf16>, vector<8x32xf32> -> vector<8x32xf32>
    %128 = vector.extract_strided_slice %123 {offsets = [0, 0, 0], sizes = [1, 8, 32], strides = [1, 1, 1]} : vector<3x8x32xf32> to vector<1x8x32xf32>
    %129 = vector.shape_cast %128 : vector<1x8x32xf32> to vector<8x32xf32>
    %130 = arith.addf %129, %125 : vector<8x32xf32>
    %131 = arith.negf %130 : vector<8x32xf32>
    %132 = math.exp %131 : vector<8x32xf32>
    %cst_46 = arith.constant 1.000000e+00 : f32
    %133 = vector.broadcast %cst_46 : f32 to vector<8x32xf32>
    %134 = arith.addf %133, %132 : vector<8x32xf32>
    %135 = arith.divf %133, %134 : vector<8x32xf32>
    %136 = vector.extract_strided_slice %123 {offsets = [1, 0, 0], sizes = [1, 8, 32], strides = [1, 1, 1]} : vector<3x8x32xf32> to vector<1x8x32xf32>
    %137 = vector.shape_cast %136 : vector<1x8x32xf32> to vector<8x32xf32>
    %138 = arith.addf %137, %126 : vector<8x32xf32>
    %139 = arith.negf %138 : vector<8x32xf32>
    %140 = math.exp %139 : vector<8x32xf32>
    %cst_47 = arith.constant 1.000000e+00 : f32
    %141 = vector.broadcast %cst_47 : f32 to vector<8x32xf32>
    %142 = arith.addf %141, %140 : vector<8x32xf32>
    %143 = arith.divf %141, %142 : vector<8x32xf32>
    %144 = vector.extract_strided_slice %123 {offsets = [2, 0, 0], sizes = [1, 8, 32], strides = [1, 1, 1]} : vector<3x8x32xf32> to vector<1x8x32xf32>
    %145 = vector.shape_cast %144 : vector<1x8x32xf32> to vector<8x32xf32>
    %146 = vector.broadcast %9 : vector<1x32xf32> to vector<8x32xf32>
    %147 = arith.addf %127, %146 : vector<8x32xf32>
    %148 = arith.mulf %135, %147 : vector<8x32xf32>
    %149 = arith.addf %145, %148 : vector<8x32xf32>
    %150 = math.tanh %149 : vector<8x32xf32>
    %cst_48 = arith.constant 1.000000e+00 : f32
    %151 = vector.broadcast %cst_48 : f32 to vector<8x32xf32>
    %152 = arith.subf %151, %143 : vector<8x32xf32>
    %153 = arith.mulf %152, %150 : vector<8x32xf32>
    %154 = arith.mulf %143, %80 : vector<8x32xf32>
    %155 = arith.addf %153, %154 : vector<8x32xf32>
    %c1_49 = arith.constant 1 : index
    %c0_50 = arith.constant 0 : index
    %c0_51 = arith.constant 0 : index
    %156 = vector.load %arg6[%c1_49, %c0_50, %c0_51] : memref<8x16x32xf32, #tpu.memory_space<vmem>>, vector<1x8x32xf32>
    %157 = vector.shape_cast %156 : vector<1x8x32xf32> to vector<8x32xf32>
    %158 = vector.shape_cast %122 : vector<8x32xf32> to vector<1x8x32xf32>
    tpu.vector_store %arg6[%c1_49, %c0_50, %c0_51], %158 {strides = array<i32>} : memref<8x16x32xf32, #tpu.memory_space<vmem>>, vector<1x8x32xf32>,
    %c1_52 = arith.constant 1 : index
    %c8_53 = arith.constant 8 : index
    %c0_54 = arith.constant 0 : index
    %159 = vector.load %arg6[%c1_52, %c8_53, %c0_54] : memref<8x16x32xf32, #tpu.memory_space<vmem>>, vector<1x8x32xf32>
    %160 = vector.shape_cast %159 : vector<1x8x32xf32> to vector<8x32xf32>
    %161 = vector.shape_cast %155 : vector<8x32xf32> to vector<1x8x32xf32>
    tpu.vector_store %arg6[%c1_52, %c8_53, %c0_54], %161 {strides = array<i32>} : memref<8x16x32xf32, #tpu.memory_space<vmem>>, vector<1x8x32xf32>,
    %c2_55 = arith.constant 2 : index
    %c0_56 = arith.constant 0 : index
    %c0_57 = arith.constant 0 : index
    %c0_58 = arith.constant 0 : index
    %162 = vector.load %arg2[%c2_55, %c0_56, %c0_57, %c0_58] : memref<8x3x16x32xbf16, #tpu.memory_space<vmem>>, vector<1x3x16x32xbf16>
    %163 = vector.shape_cast %162 : vector<1x3x16x32xbf16> to vector<3x16x32xbf16>
    %164 = arith.extf %163 : vector<3x16x32xbf16> to vector<3x16x32xf32>
    %165 = vector.extract_strided_slice %164 {offsets = [0, 0, 0], sizes = [3, 8, 32], strides = [1, 1, 1]} : vector<3x16x32xf32> to vector<3x8x32xf32>
    %166 = arith.truncf %122 : vector<8x32xf32> to vector<8x32xbf16>
    %cst_59 = arith.constant dense<0.000000e+00> : vector<8x32xf32>
    %167 = tpu.matmul %166, %4, %cst_59 {dimension_numbers = #tpu.dot_dimension_numbers<[1], [0], [0], [1], [0, 0, 1, 1], [], []>} : vector<8x32xbf16>, vector<32x32xbf16>, vector<8x32xf32> -> vector<8x32xf32>
    %cst_60 = arith.constant dense<0.000000e+00> : vector<8x32xf32>
    %168 = tpu.matmul %166, %6, %cst_60 {dimension_numbers = #tpu.dot_dimension_numbers<[1], [0], [0], [1], [0, 0, 1, 1], [], []>} : vector<8x32xbf16>, vector<32x32xbf16>, vector<8x32xf32> -> vector<8x32xf32>
    %cst_61 = arith.constant dense<0.000000e+00> : vector<8x32xf32>
    %169 = tpu.matmul %166, %8, %cst_61 {dimension_numbers = #tpu.dot_dimension_numbers<[1], [0], [0], [1], [0, 0, 1, 1], [], []>} : vector<8x32xbf16>, vector<32x32xbf16>, vector<8x32xf32> -> vector<8x32xf32>
    %170 = vector.extract_strided_slice %165 {offsets = [0, 0, 0], sizes = [1, 8, 32], strides = [1, 1, 1]} : vector<3x8x32xf32> to vector<1x8x32xf32>
    %171 = vector.shape_cast %170 : vector<1x8x32xf32> to vector<8x32xf32>
    %172 = arith.addf %171, %167 : vector<8x32xf32>
    %173 = arith.negf %172 : vector<8x32xf32>
    %174 = math.exp %173 : vector<8x32xf32>
    %cst_62 = arith.constant 1.000000e+00 : f32
    %175 = vector.broadcast %cst_62 : f32 to vector<8x32xf32>
    %176 = arith.addf %175, %174 : vector<8x32xf32>
    %177 = arith.divf %175, %176 : vector<8x32xf32>
    %178 = vector.extract_strided_slice %165 {offsets = [1, 0, 0], sizes = [1, 8, 32], strides = [1, 1, 1]} : vector<3x8x32xf32> to vector<1x8x32xf32>
    %179 = vector.shape_cast %178 : vector<1x8x32xf32> to vector<8x32xf32>
    %180 = arith.addf %179, %168 : vector<8x32xf32>
    %181 = arith.negf %180 : vector<8x32xf32>
    %182 = math.exp %181 : vector<8x32xf32>
    %cst_63 = arith.constant 1.000000e+00 : f32
    %183 = vector.broadcast %cst_63 : f32 to vector<8x32xf32>
    %184 = arith.addf %183, %182 : vector<8x32xf32>
    %185 = arith.divf %183, %184 : vector<8x32xf32>
    %186 = vector.extract_strided_slice %165 {offsets = [2, 0, 0], sizes = [1, 8, 32], strides = [1, 1, 1]} : vector<3x8x32xf32> to vector<1x8x32xf32>
    %187 = vector.shape_cast %186 : vector<1x8x32xf32> to vector<8x32xf32>
    %188 = vector.broadcast %9 : vector<1x32xf32> to vector<8x32xf32>
    %189 = arith.addf %169, %188 : vector<8x32xf32>
    %190 = arith.mulf %177, %189 : vector<8x32xf32>
    %191 = arith.addf %187, %190 : vector<8x32xf32>
    %192 = math.tanh %191 : vector<8x32xf32>
    %cst_64 = arith.constant 1.000000e+00 : f32
    %193 = vector.broadcast %cst_64 : f32 to vector<8x32xf32>
    %194 = arith.subf %193, %185 : vector<8x32xf32>
    %195 = arith.mulf %194, %192 : vector<8x32xf32>
    %196 = arith.mulf %185, %122 : vector<8x32xf32>
    %197 = arith.addf %195, %196 : vector<8x32xf32>
    %198 = vector.extract_strided_slice %164 {offsets = [0, 8, 0], sizes = [3, 8, 32], strides = [1, 1, 1]} : vector<3x16x32xf32> to vector<3x8x32xf32>
    %199 = arith.truncf %155 : vector<8x32xf32> to vector<8x32xbf16>
    %cst_65 = arith.constant dense<0.000000e+00> : vector<8x32xf32>
    %200 = tpu.matmul %199, %4, %cst_65 {dimension_numbers = #tpu.dot_dimension_numbers<[1], [0], [0], [1], [0, 0, 1, 1], [], []>} : vector<8x32xbf16>, vector<32x32xbf16>, vector<8x32xf32> -> vector<8x32xf32>
    %cst_66 = arith.constant dense<0.000000e+00> : vector<8x32xf32>
    %201 = tpu.matmul %199, %6, %cst_66 {dimension_numbers = #tpu.dot_dimension_numbers<[1], [0], [0], [1], [0, 0, 1, 1], [], []>} : vector<8x32xbf16>, vector<32x32xbf16>, vector<8x32xf32> -> vector<8x32xf32>
    %cst_67 = arith.constant dense<0.000000e+00> : vector<8x32xf32>
    %202 = tpu.matmul %199, %8, %cst_67 {dimension_numbers = #tpu.dot_dimension_numbers<[1], [0], [0], [1], [0, 0, 1, 1], [], []>} : vector<8x32xbf16>, vector<32x32xbf16>, vector<8x32xf32> -> vector<8x32xf32>
    %203 = vector.extract_strided_slice %198 {offsets = [0, 0, 0], sizes = [1, 8, 32], strides = [1, 1, 1]} : vector<3x8x32xf32> to vector<1x8x32xf32>
    %204 = vector.shape_cast %203 : vector<1x8x32xf32> to vector<8x32xf32>
    %205 = arith.addf %204, %200 : vector<8x32xf32>
    %206 = arith.negf %205 : vector<8x32xf32>
    %207 = math.exp %206 : vector<8x32xf32>
    %cst_68 = arith.constant 1.000000e+00 : f32
    %208 = vector.broadcast %cst_68 : f32 to vector<8x32xf32>
    %209 = arith.addf %208, %207 : vector<8x32xf32>
    %210 = arith.divf %208, %209 : vector<8x32xf32>
    %211 = vector.extract_strided_slice %198 {offsets = [1, 0, 0], sizes = [1, 8, 32], strides = [1, 1, 1]} : vector<3x8x32xf32> to vector<1x8x32xf32>
    %212 = vector.shape_cast %211 : vector<1x8x32xf32> to vector<8x32xf32>
    %213 = arith.addf %212, %201 : vector<8x32xf32>
    %214 = arith.negf %213 : vector<8x32xf32>
    %215 = math.exp %214 : vector<8x32xf32>
    %cst_69 = arith.constant 1.000000e+00 : f32
    %216 = vector.broadcast %cst_69 : f32 to vector<8x32xf32>
    %217 = arith.addf %216, %215 : vector<8x32xf32>
    %218 = arith.divf %216, %217 : vector<8x32xf32>
    %219 = vector.extract_strided_slice %198 {offsets = [2, 0, 0], sizes = [1, 8, 32], strides = [1, 1, 1]} : vector<3x8x32xf32> to vector<1x8x32xf32>
    %220 = vector.shape_cast %219 : vector<1x8x32xf32> to vector<8x32xf32>
    %221 = vector.broadcast %9 : vector<1x32xf32> to vector<8x32xf32>
    %222 = arith.addf %202, %221 : vector<8x32xf32>
    %223 = arith.mulf %210, %222 : vector<8x32xf32>
    %224 = arith.addf %220, %223 : vector<8x32xf32>
    %225 = math.tanh %224 : vector<8x32xf32>
    %cst_70 = arith.constant 1.000000e+00 : f32
    %226 = vector.broadcast %cst_70 : f32 to vector<8x32xf32>
    %227 = arith.subf %226, %218 : vector<8x32xf32>
    %228 = arith.mulf %227, %225 : vector<8x32xf32>
    %229 = arith.mulf %218, %155 : vector<8x32xf32>
    %230 = arith.addf %228, %229 : vector<8x32xf32>
    %c2_71 = arith.constant 2 : index
    %c0_72 = arith.constant 0 : index
    %c0_73 = arith.constant 0 : index
    %231 = vector.load %arg6[%c2_71, %c0_72, %c0_73] : memref<8x16x32xf32, #tpu.memory_space<vmem>>, vector<1x8x32xf32>
    %232 = vector.shape_cast %231 : vector<1x8x32xf32> to vector<8x32xf32>
    %233 = vector.shape_cast %197 : vector<8x32xf32> to vector<1x8x32xf32>
    tpu.vector_store %arg6[%c2_71, %c0_72, %c0_73], %233 {strides = array<i32>} : memref<8x16x32xf32, #tpu.memory_space<vmem>>, vector<1x8x32xf32>,
    %c2_74 = arith.constant 2 : index
    %c8_75 = arith.constant 8 : index
    %c0_76 = arith.constant 0 : index
    %234 = vector.load %arg6[%c2_74, %c8_75, %c0_76] : memref<8x16x32xf32, #tpu.memory_space<vmem>>, vector<1x8x32xf32>
    %235 = vector.shape_cast %234 : vector<1x8x32xf32> to vector<8x32xf32>
    %236 = vector.shape_cast %230 : vector<8x32xf32> to vector<1x8x32xf32>
    tpu.vector_store %arg6[%c2_74, %c8_75, %c0_76], %236 {strides = array<i32>} : memref<8x16x32xf32, #tpu.memory_space<vmem>>, vector<1x8x32xf32>,
    %c3 = arith.constant 3 : index
    %c0_77 = arith.constant 0 : index
    %c0_78 = arith.constant 0 : index
    %c0_79 = arith.constant 0 : index
    %237 = vector.load %arg2[%c3, %c0_77, %c0_78, %c0_79] : memref<8x3x16x32xbf16, #tpu.memory_space<vmem>>, vector<1x3x16x32xbf16>
    %238 = vector.shape_cast %237 : vector<1x3x16x32xbf16> to vector<3x16x32xbf16>
    %239 = arith.extf %238 : vector<3x16x32xbf16> to vector<3x16x32xf32>
    %240 = vector.extract_strided_slice %239 {offsets = [0, 0, 0], sizes = [3, 8, 32], strides = [1, 1, 1]} : vector<3x16x32xf32> to vector<3x8x32xf32>
    %241 = arith.truncf %197 : vector<8x32xf32> to vector<8x32xbf16>
    %cst_80 = arith.constant dense<0.000000e+00> : vector<8x32xf32>
    %242 = tpu.matmul %241, %4, %cst_80 {dimension_numbers = #tpu.dot_dimension_numbers<[1], [0], [0], [1], [0, 0, 1, 1], [], []>} : vector<8x32xbf16>, vector<32x32xbf16>, vector<8x32xf32> -> vector<8x32xf32>
    %cst_81 = arith.constant dense<0.000000e+00> : vector<8x32xf32>
    %243 = tpu.matmul %241, %6, %cst_81 {dimension_numbers = #tpu.dot_dimension_numbers<[1], [0], [0], [1], [0, 0, 1, 1], [], []>} : vector<8x32xbf16>, vector<32x32xbf16>, vector<8x32xf32> -> vector<8x32xf32>
    %cst_82 = arith.constant dense<0.000000e+00> : vector<8x32xf32>
    %244 = tpu.matmul %241, %8, %cst_82 {dimension_numbers = #tpu.dot_dimension_numbers<[1], [0], [0], [1], [0, 0, 1, 1], [], []>} : vector<8x32xbf16>, vector<32x32xbf16>, vector<8x32xf32> -> vector<8x32xf32>
    %245 = vector.extract_strided_slice %240 {offsets = [0, 0, 0], sizes = [1, 8, 32], strides = [1, 1, 1]} : vector<3x8x32xf32> to vector<1x8x32xf32>
    %246 = vector.shape_cast %245 : vector<1x8x32xf32> to vector<8x32xf32>
    %247 = arith.addf %246, %242 : vector<8x32xf32>
    %248 = arith.negf %247 : vector<8x32xf32>
    %249 = math.exp %248 : vector<8x32xf32>
    %cst_83 = arith.constant 1.000000e+00 : f32
    %250 = vector.broadcast %cst_83 : f32 to vector<8x32xf32>
    %251 = arith.addf %250, %249 : vector<8x32xf32>
    %252 = arith.divf %250, %251 : vector<8x32xf32>
    %253 = vector.extract_strided_slice %240 {offsets = [1, 0, 0], sizes = [1, 8, 32], strides = [1, 1, 1]} : vector<3x8x32xf32> to vector<1x8x32xf32>
    %254 = vector.shape_cast %253 : vector<1x8x32xf32> to vector<8x32xf32>
    %255 = arith.addf %254, %243 : vector<8x32xf32>
    %256 = arith.negf %255 : vector<8x32xf32>
    %257 = math.exp %256 : vector<8x32xf32>
    %cst_84 = arith.constant 1.000000e+00 : f32
    %258 = vector.broadcast %cst_84 : f32 to vector<8x32xf32>
    %259 = arith.addf %258, %257 : vector<8x32xf32>
    %260 = arith.divf %258, %259 : vector<8x32xf32>
    %261 = vector.extract_strided_slice %240 {offsets = [2, 0, 0], sizes = [1, 8, 32], strides = [1, 1, 1]} : vector<3x8x32xf32> to vector<1x8x32xf32>
    %262 = vector.shape_cast %261 : vector<1x8x32xf32> to vector<8x32xf32>
    %263 = vector.broadcast %9 : vector<1x32xf32> to vector<8x32xf32>
    %264 = arith.addf %244, %263 : vector<8x32xf32>
    %265 = arith.mulf %252, %264 : vector<8x32xf32>
    %266 = arith.addf %262, %265 : vector<8x32xf32>
    %267 = math.tanh %266 : vector<8x32xf32>
    %cst_85 = arith.constant 1.000000e+00 : f32
    %268 = vector.broadcast %cst_85 : f32 to vector<8x32xf32>
    %269 = arith.subf %268, %260 : vector<8x32xf32>
    %270 = arith.mulf %269, %267 : vector<8x32xf32>
    %271 = arith.mulf %260, %197 : vector<8x32xf32>
    %272 = arith.addf %270, %271 : vector<8x32xf32>
    %273 = vector.extract_strided_slice %239 {offsets = [0, 8, 0], sizes = [3, 8, 32], strides = [1, 1, 1]} : vector<3x16x32xf32> to vector<3x8x32xf32>
    %274 = arith.truncf %230 : vector<8x32xf32> to vector<8x32xbf16>
    %cst_86 = arith.constant dense<0.000000e+00> : vector<8x32xf32>
    %275 = tpu.matmul %274, %4, %cst_86 {dimension_numbers = #tpu.dot_dimension_numbers<[1], [0], [0], [1], [0, 0, 1, 1], [], []>} : vector<8x32xbf16>, vector<32x32xbf16>, vector<8x32xf32> -> vector<8x32xf32>
    %cst_87 = arith.constant dense<0.000000e+00> : vector<8x32xf32>
    %276 = tpu.matmul %274, %6, %cst_87 {dimension_numbers = #tpu.dot_dimension_numbers<[1], [0], [0], [1], [0, 0, 1, 1], [], []>} : vector<8x32xbf16>, vector<32x32xbf16>, vector<8x32xf32> -> vector<8x32xf32>
    %cst_88 = arith.constant dense<0.000000e+00> : vector<8x32xf32>
    %277 = tpu.matmul %274, %8, %cst_88 {dimension_numbers = #tpu.dot_dimension_numbers<[1], [0], [0], [1], [0, 0, 1, 1], [], []>} : vector<8x32xbf16>, vector<32x32xbf16>, vector<8x32xf32> -> vector<8x32xf32>
    %278 = vector.extract_strided_slice %273 {offsets = [0, 0, 0], sizes = [1, 8, 32], strides = [1, 1, 1]} : vector<3x8x32xf32> to vector<1x8x32xf32>
    %279 = vector.shape_cast %278 : vector<1x8x32xf32> to vector<8x32xf32>
    %280 = arith.addf %279, %275 : vector<8x32xf32>
    %281 = arith.negf %280 : vector<8x32xf32>
    %282 = math.exp %281 : vector<8x32xf32>
    %cst_89 = arith.constant 1.000000e+00 : f32
    %283 = vector.broadcast %cst_89 : f32 to vector<8x32xf32>
    %284 = arith.addf %283, %282 : vector<8x32xf32>
    %285 = arith.divf %283, %284 : vector<8x32xf32>
    %286 = vector.extract_strided_slice %273 {offsets = [1, 0, 0], sizes = [1, 8, 32], strides = [1, 1, 1]} : vector<3x8x32xf32> to vector<1x8x32xf32>
    %287 = vector.shape_cast %286 : vector<1x8x32xf32> to vector<8x32xf32>
    %288 = arith.addf %287, %276 : vector<8x32xf32>
    %289 = arith.negf %288 : vector<8x32xf32>
    %290 = math.exp %289 : vector<8x32xf32>
    %cst_90 = arith.constant 1.000000e+00 : f32
    %291 = vector.broadcast %cst_90 : f32 to vector<8x32xf32>
    %292 = arith.addf %291, %290 : vector<8x32xf32>
    %293 = arith.divf %291, %292 : vector<8x32xf32>
    %294 = vector.extract_strided_slice %273 {offsets = [2, 0, 0], sizes = [1, 8, 32], strides = [1, 1, 1]} : vector<3x8x32xf32> to vector<1x8x32xf32>
    %295 = vector.shape_cast %294 : vector<1x8x32xf32> to vector<8x32xf32>
    %296 = vector.broadcast %9 : vector<1x32xf32> to vector<8x32xf32>
    %297 = arith.addf %277, %296 : vector<8x32xf32>
    %298 = arith.mulf %285, %297 : vector<8x32xf32>
    %299 = arith.addf %295, %298 : vector<8x32xf32>
    %300 = math.tanh %299 : vector<8x32xf32>
    %cst_91 = arith.constant 1.000000e+00 : f32
    %301 = vector.broadcast %cst_91 : f32 to vector<8x32xf32>
    %302 = arith.subf %301, %293 : vector<8x32xf32>
    %303 = arith.mulf %302, %300 : vector<8x32xf32>
    %304 = arith.mulf %293, %230 : vector<8x32xf32>
    %305 = arith.addf %303, %304 : vector<8x32xf32>
    %c3_92 = arith.constant 3 : index
    %c0_93 = arith.constant 0 : index
    %c0_94 = arith.constant 0 : index
    %306 = vector.load %arg6[%c3_92, %c0_93, %c0_94] : memref<8x16x32xf32, #tpu.memory_space<vmem>>, vector<1x8x32xf32>
    %307 = vector.shape_cast %306 : vector<1x8x32xf32> to vector<8x32xf32>
    %308 = vector.shape_cast %272 : vector<8x32xf32> to vector<1x8x32xf32>
    tpu.vector_store %arg6[%c3_92, %c0_93, %c0_94], %308 {strides = array<i32>} : memref<8x16x32xf32, #tpu.memory_space<vmem>>, vector<1x8x32xf32>,
    %c3_95 = arith.constant 3 : index
    %c8_96 = arith.constant 8 : index
    %c0_97 = arith.constant 0 : index
    %309 = vector.load %arg6[%c3_95, %c8_96, %c0_97] : memref<8x16x32xf32, #tpu.memory_space<vmem>>, vector<1x8x32xf32>
    %310 = vector.shape_cast %309 : vector<1x8x32xf32> to vector<8x32xf32>
    %311 = vector.shape_cast %305 : vector<8x32xf32> to vector<1x8x32xf32>
    tpu.vector_store %arg6[%c3_95, %c8_96, %c0_97], %311 {strides = array<i32>} : memref<8x16x32xf32, #tpu.memory_space<vmem>>, vector<1x8x32xf32>,
    %c4 = arith.constant 4 : index
    %c0_98 = arith.constant 0 : index
    %c0_99 = arith.constant 0 : index
    %c0_100 = arith.constant 0 : index
    %312 = vector.load %arg2[%c4, %c0_98, %c0_99, %c0_100] : memref<8x3x16x32xbf16, #tpu.memory_space<vmem>>, vector<1x3x16x32xbf16>
    %313 = vector.shape_cast %312 : vector<1x3x16x32xbf16> to vector<3x16x32xbf16>
    %314 = arith.extf %313 : vector<3x16x32xbf16> to vector<3x16x32xf32>
    %315 = vector.extract_strided_slice %314 {offsets = [0, 0, 0], sizes = [3, 8, 32], strides = [1, 1, 1]} : vector<3x16x32xf32> to vector<3x8x32xf32>
    %316 = arith.truncf %272 : vector<8x32xf32> to vector<8x32xbf16>
    %cst_101 = arith.constant dense<0.000000e+00> : vector<8x32xf32>
    %317 = tpu.matmul %316, %4, %cst_101 {dimension_numbers = #tpu.dot_dimension_numbers<[1], [0], [0], [1], [0, 0, 1, 1], [], []>} : vector<8x32xbf16>, vector<32x32xbf16>, vector<8x32xf32> -> vector<8x32xf32>
    %cst_102 = arith.constant dense<0.000000e+00> : vector<8x32xf32>
    %318 = tpu.matmul %316, %6, %cst_102 {dimension_numbers = #tpu.dot_dimension_numbers<[1], [0], [0], [1], [0, 0, 1, 1], [], []>} : vector<8x32xbf16>, vector<32x32xbf16>, vector<8x32xf32> -> vector<8x32xf32>
    %cst_103 = arith.constant dense<0.000000e+00> : vector<8x32xf32>
    %319 = tpu.matmul %316, %8, %cst_103 {dimension_numbers = #tpu.dot_dimension_numbers<[1], [0], [0], [1], [0, 0, 1, 1], [], []>} : vector<8x32xbf16>, vector<32x32xbf16>, vector<8x32xf32> -> vector<8x32xf32>
    %320 = vector.extract_strided_slice %315 {offsets = [0, 0, 0], sizes = [1, 8, 32], strides = [1, 1, 1]} : vector<3x8x32xf32> to vector<1x8x32xf32>
    %321 = vector.shape_cast %320 : vector<1x8x32xf32> to vector<8x32xf32>
    %322 = arith.addf %321, %317 : vector<8x32xf32>
    %323 = arith.negf %322 : vector<8x32xf32>
    %324 = math.exp %323 : vector<8x32xf32>
    %cst_104 = arith.constant 1.000000e+00 : f32
    %325 = vector.broadcast %cst_104 : f32 to vector<8x32xf32>
    %326 = arith.addf %325, %324 : vector<8x32xf32>
    %327 = arith.divf %325, %326 : vector<8x32xf32>
    %328 = vector.extract_strided_slice %315 {offsets = [1, 0, 0], sizes = [1, 8, 32], strides = [1, 1, 1]} : vector<3x8x32xf32> to vector<1x8x32xf32>
    %329 = vector.shape_cast %328 : vector<1x8x32xf32> to vector<8x32xf32>
    %330 = arith.addf %329, %318 : vector<8x32xf32>
    %331 = arith.negf %330 : vector<8x32xf32>
    %332 = math.exp %331 : vector<8x32xf32>
    %cst_105 = arith.constant 1.000000e+00 : f32
    %333 = vector.broadcast %cst_105 : f32 to vector<8x32xf32>
    %334 = arith.addf %333, %332 : vector<8x32xf32>
    %335 = arith.divf %333, %334 : vector<8x32xf32>
    %336 = vector.extract_strided_slice %315 {offsets = [2, 0, 0], sizes = [1, 8, 32], strides = [1, 1, 1]} : vector<3x8x32xf32> to vector<1x8x32xf32>
    %337 = vector.shape_cast %336 : vector<1x8x32xf32> to vector<8x32xf32>
    %338 = vector.broadcast %9 : vector<1x32xf32> to vector<8x32xf32>
    %339 = arith.addf %319, %338 : vector<8x32xf32>
    %340 = arith.mulf %327, %339 : vector<8x32xf32>
    %341 = arith.addf %337, %340 : vector<8x32xf32>
    %342 = math.tanh %341 : vector<8x32xf32>
    %cst_106 = arith.constant 1.000000e+00 : f32
    %343 = vector.broadcast %cst_106 : f32 to vector<8x32xf32>
    %344 = arith.subf %343, %335 : vector<8x32xf32>
    %345 = arith.mulf %344, %342 : vector<8x32xf32>
    %346 = arith.mulf %335, %272 : vector<8x32xf32>
    %347 = arith.addf %345, %346 : vector<8x32xf32>
    %348 = vector.extract_strided_slice %314 {offsets = [0, 8, 0], sizes = [3, 8, 32], strides = [1, 1, 1]} : vector<3x16x32xf32> to vector<3x8x32xf32>
    %349 = arith.truncf %305 : vector<8x32xf32> to vector<8x32xbf16>
    %cst_107 = arith.constant dense<0.000000e+00> : vector<8x32xf32>
    %350 = tpu.matmul %349, %4, %cst_107 {dimension_numbers = #tpu.dot_dimension_numbers<[1], [0], [0], [1], [0, 0, 1, 1], [], []>} : vector<8x32xbf16>, vector<32x32xbf16>, vector<8x32xf32> -> vector<8x32xf32>
    %cst_108 = arith.constant dense<0.000000e+00> : vector<8x32xf32>
    %351 = tpu.matmul %349, %6, %cst_108 {dimension_numbers = #tpu.dot_dimension_numbers<[1], [0], [0], [1], [0, 0, 1, 1], [], []>} : vector<8x32xbf16>, vector<32x32xbf16>, vector<8x32xf32> -> vector<8x32xf32>
    %cst_109 = arith.constant dense<0.000000e+00> : vector<8x32xf32>
    %352 = tpu.matmul %349, %8, %cst_109 {dimension_numbers = #tpu.dot_dimension_numbers<[1], [0], [0], [1], [0, 0, 1, 1], [], []>} : vector<8x32xbf16>, vector<32x32xbf16>, vector<8x32xf32> -> vector<8x32xf32>
    %353 = vector.extract_strided_slice %348 {offsets = [0, 0, 0], sizes = [1, 8, 32], strides = [1, 1, 1]} : vector<3x8x32xf32> to vector<1x8x32xf32>
    %354 = vector.shape_cast %353 : vector<1x8x32xf32> to vector<8x32xf32>
    %355 = arith.addf %354, %350 : vector<8x32xf32>
    %356 = arith.negf %355 : vector<8x32xf32>
    %357 = math.exp %356 : vector<8x32xf32>
    %cst_110 = arith.constant 1.000000e+00 : f32
    %358 = vector.broadcast %cst_110 : f32 to vector<8x32xf32>
    %359 = arith.addf %358, %357 : vector<8x32xf32>
    %360 = arith.divf %358, %359 : vector<8x32xf32>
    %361 = vector.extract_strided_slice %348 {offsets = [1, 0, 0], sizes = [1, 8, 32], strides = [1, 1, 1]} : vector<3x8x32xf32> to vector<1x8x32xf32>
    %362 = vector.shape_cast %361 : vector<1x8x32xf32> to vector<8x32xf32>
    %363 = arith.addf %362, %351 : vector<8x32xf32>
    %364 = arith.negf %363 : vector<8x32xf32>
    %365 = math.exp %364 : vector<8x32xf32>
    %cst_111 = arith.constant 1.000000e+00 : f32
    %366 = vector.broadcast %cst_111 : f32 to vector<8x32xf32>
    %367 = arith.addf %366, %365 : vector<8x32xf32>
    %368 = arith.divf %366, %367 : vector<8x32xf32>
    %369 = vector.extract_strided_slice %348 {offsets = [2, 0, 0], sizes = [1, 8, 32], strides = [1, 1, 1]} : vector<3x8x32xf32> to vector<1x8x32xf32>
    %370 = vector.shape_cast %369 : vector<1x8x32xf32> to vector<8x32xf32>
    %371 = vector.broadcast %9 : vector<1x32xf32> to vector<8x32xf32>
    %372 = arith.addf %352, %371 : vector<8x32xf32>
    %373 = arith.mulf %360, %372 : vector<8x32xf32>
    %374 = arith.addf %370, %373 : vector<8x32xf32>
    %375 = math.tanh %374 : vector<8x32xf32>
    %cst_112 = arith.constant 1.000000e+00 : f32
    %376 = vector.broadcast %cst_112 : f32 to vector<8x32xf32>
    %377 = arith.subf %376, %368 : vector<8x32xf32>
    %378 = arith.mulf %377, %375 : vector<8x32xf32>
    %379 = arith.mulf %368, %305 : vector<8x32xf32>
    %380 = arith.addf %378, %379 : vector<8x32xf32>
    %c4_113 = arith.constant 4 : index
    %c0_114 = arith.constant 0 : index
    %c0_115 = arith.constant 0 : index
    %381 = vector.load %arg6[%c4_113, %c0_114, %c0_115] : memref<8x16x32xf32, #tpu.memory_space<vmem>>, vector<1x8x32xf32>
    %382 = vector.shape_cast %381 : vector<1x8x32xf32> to vector<8x32xf32>
    %383 = vector.shape_cast %347 : vector<8x32xf32> to vector<1x8x32xf32>
    tpu.vector_store %arg6[%c4_113, %c0_114, %c0_115], %383 {strides = array<i32>} : memref<8x16x32xf32, #tpu.memory_space<vmem>>, vector<1x8x32xf32>,
    %c4_116 = arith.constant 4 : index
    %c8_117 = arith.constant 8 : index
    %c0_118 = arith.constant 0 : index
    %384 = vector.load %arg6[%c4_116, %c8_117, %c0_118] : memref<8x16x32xf32, #tpu.memory_space<vmem>>, vector<1x8x32xf32>
    %385 = vector.shape_cast %384 : vector<1x8x32xf32> to vector<8x32xf32>
    %386 = vector.shape_cast %380 : vector<8x32xf32> to vector<1x8x32xf32>
    tpu.vector_store %arg6[%c4_116, %c8_117, %c0_118], %386 {strides = array<i32>} : memref<8x16x32xf32, #tpu.memory_space<vmem>>, vector<1x8x32xf32>,
    %c5 = arith.constant 5 : index
    %c0_119 = arith.constant 0 : index
    %c0_120 = arith.constant 0 : index
    %c0_121 = arith.constant 0 : index
    %387 = vector.load %arg2[%c5, %c0_119, %c0_120, %c0_121] : memref<8x3x16x32xbf16, #tpu.memory_space<vmem>>, vector<1x3x16x32xbf16>
    %388 = vector.shape_cast %387 : vector<1x3x16x32xbf16> to vector<3x16x32xbf16>
    %389 = arith.extf %388 : vector<3x16x32xbf16> to vector<3x16x32xf32>
    %390 = vector.extract_strided_slice %389 {offsets = [0, 0, 0], sizes = [3, 8, 32], strides = [1, 1, 1]} : vector<3x16x32xf32> to vector<3x8x32xf32>
    %391 = arith.truncf %347 : vector<8x32xf32> to vector<8x32xbf16>
    %cst_122 = arith.constant dense<0.000000e+00> : vector<8x32xf32>
    %392 = tpu.matmul %391, %4, %cst_122 {dimension_numbers = #tpu.dot_dimension_numbers<[1], [0], [0], [1], [0, 0, 1, 1], [], []>} : vector<8x32xbf16>, vector<32x32xbf16>, vector<8x32xf32> -> vector<8x32xf32>
    %cst_123 = arith.constant dense<0.000000e+00> : vector<8x32xf32>
    %393 = tpu.matmul %391, %6, %cst_123 {dimension_numbers = #tpu.dot_dimension_numbers<[1], [0], [0], [1], [0, 0, 1, 1], [], []>} : vector<8x32xbf16>, vector<32x32xbf16>, vector<8x32xf32> -> vector<8x32xf32>
    %cst_124 = arith.constant dense<0.000000e+00> : vector<8x32xf32>
    %394 = tpu.matmul %391, %8, %cst_124 {dimension_numbers = #tpu.dot_dimension_numbers<[1], [0], [0], [1], [0, 0, 1, 1], [], []>} : vector<8x32xbf16>, vector<32x32xbf16>, vector<8x32xf32> -> vector<8x32xf32>
    %395 = vector.extract_strided_slice %390 {offsets = [0, 0, 0], sizes = [1, 8, 32], strides = [1, 1, 1]} : vector<3x8x32xf32> to vector<1x8x32xf32>
    %396 = vector.shape_cast %395 : vector<1x8x32xf32> to vector<8x32xf32>
    %397 = arith.addf %396, %392 : vector<8x32xf32>
    %398 = arith.negf %397 : vector<8x32xf32>
    %399 = math.exp %398 : vector<8x32xf32>
    %cst_125 = arith.constant 1.000000e+00 : f32
    %400 = vector.broadcast %cst_125 : f32 to vector<8x32xf32>
    %401 = arith.addf %400, %399 : vector<8x32xf32>
    %402 = arith.divf %400, %401 : vector<8x32xf32>
    %403 = vector.extract_strided_slice %390 {offsets = [1, 0, 0], sizes = [1, 8, 32], strides = [1, 1, 1]} : vector<3x8x32xf32> to vector<1x8x32xf32>
    %404 = vector.shape_cast %403 : vector<1x8x32xf32> to vector<8x32xf32>
    %405 = arith.addf %404, %393 : vector<8x32xf32>
    %406 = arith.negf %405 : vector<8x32xf32>
    %407 = math.exp %406 : vector<8x32xf32>
    %cst_126 = arith.constant 1.000000e+00 : f32
    %408 = vector.broadcast %cst_126 : f32 to vector<8x32xf32>
    %409 = arith.addf %408, %407 : vector<8x32xf32>
    %410 = arith.divf %408, %409 : vector<8x32xf32>
    %411 = vector.extract_strided_slice %390 {offsets = [2, 0, 0], sizes = [1, 8, 32], strides = [1, 1, 1]} : vector<3x8x32xf32> to vector<1x8x32xf32>
    %412 = vector.shape_cast %411 : vector<1x8x32xf32> to vector<8x32xf32>
    %413 = vector.broadcast %9 : vector<1x32xf32> to vector<8x32xf32>
    %414 = arith.addf %394, %413 : vector<8x32xf32>
    %415 = arith.mulf %402, %414 : vector<8x32xf32>
    %416 = arith.addf %412, %415 : vector<8x32xf32>
    %417 = math.tanh %416 : vector<8x32xf32>
    %cst_127 = arith.constant 1.000000e+00 : f32
    %418 = vector.broadcast %cst_127 : f32 to vector<8x32xf32>
    %419 = arith.subf %418, %410 : vector<8x32xf32>
    %420 = arith.mulf %419, %417 : vector<8x32xf32>
    %421 = arith.mulf %410, %347 : vector<8x32xf32>
    %422 = arith.addf %420, %421 : vector<8x32xf32>
    %423 = vector.extract_strided_slice %389 {offsets = [0, 8, 0], sizes = [3, 8, 32], strides = [1, 1, 1]} : vector<3x16x32xf32> to vector<3x8x32xf32>
    %424 = arith.truncf %380 : vector<8x32xf32> to vector<8x32xbf16>
    %cst_128 = arith.constant dense<0.000000e+00> : vector<8x32xf32>
    %425 = tpu.matmul %424, %4, %cst_128 {dimension_numbers = #tpu.dot_dimension_numbers<[1], [0], [0], [1], [0, 0, 1, 1], [], []>} : vector<8x32xbf16>, vector<32x32xbf16>, vector<8x32xf32> -> vector<8x32xf32>
    %cst_129 = arith.constant dense<0.000000e+00> : vector<8x32xf32>
    %426 = tpu.matmul %424, %6, %cst_129 {dimension_numbers = #tpu.dot_dimension_numbers<[1], [0], [0], [1], [0, 0, 1, 1], [], []>} : vector<8x32xbf16>, vector<32x32xbf16>, vector<8x32xf32> -> vector<8x32xf32>
    %cst_130 = arith.constant dense<0.000000e+00> : vector<8x32xf32>
    %427 = tpu.matmul %424, %8, %cst_130 {dimension_numbers = #tpu.dot_dimension_numbers<[1], [0], [0], [1], [0, 0, 1, 1], [], []>} : vector<8x32xbf16>, vector<32x32xbf16>, vector<8x32xf32> -> vector<8x32xf32>
    %428 = vector.extract_strided_slice %423 {offsets = [0, 0, 0], sizes = [1, 8, 32], strides = [1, 1, 1]} : vector<3x8x32xf32> to vector<1x8x32xf32>
    %429 = vector.shape_cast %428 : vector<1x8x32xf32> to vector<8x32xf32>
    %430 = arith.addf %429, %425 : vector<8x32xf32>
    %431 = arith.negf %430 : vector<8x32xf32>
    %432 = math.exp %431 : vector<8x32xf32>
    %cst_131 = arith.constant 1.000000e+00 : f32
    %433 = vector.broadcast %cst_131 : f32 to vector<8x32xf32>
    %434 = arith.addf %433, %432 : vector<8x32xf32>
    %435 = arith.divf %433, %434 : vector<8x32xf32>
    %436 = vector.extract_strided_slice %423 {offsets = [1, 0, 0], sizes = [1, 8, 32], strides = [1, 1, 1]} : vector<3x8x32xf32> to vector<1x8x32xf32>
    %437 = vector.shape_cast %436 : vector<1x8x32xf32> to vector<8x32xf32>
    %438 = arith.addf %437, %426 : vector<8x32xf32>
    %439 = arith.negf %438 : vector<8x32xf32>
    %440 = math.exp %439 : vector<8x32xf32>
    %cst_132 = arith.constant 1.000000e+00 : f32
    %441 = vector.broadcast %cst_132 : f32 to vector<8x32xf32>
    %442 = arith.addf %441, %440 : vector<8x32xf32>
    %443 = arith.divf %441, %442 : vector<8x32xf32>
    %444 = vector.extract_strided_slice %423 {offsets = [2, 0, 0], sizes = [1, 8, 32], strides = [1, 1, 1]} : vector<3x8x32xf32> to vector<1x8x32xf32>
    %445 = vector.shape_cast %444 : vector<1x8x32xf32> to vector<8x32xf32>
    %446 = vector.broadcast %9 : vector<1x32xf32> to vector<8x32xf32>
    %447 = arith.addf %427, %446 : vector<8x32xf32>
    %448 = arith.mulf %435, %447 : vector<8x32xf32>
    %449 = arith.addf %445, %448 : vector<8x32xf32>
    %450 = math.tanh %449 : vector<8x32xf32>
    %cst_133 = arith.constant 1.000000e+00 : f32
    %451 = vector.broadcast %cst_133 : f32 to vector<8x32xf32>
    %452 = arith.subf %451, %443 : vector<8x32xf32>
    %453 = arith.mulf %452, %450 : vector<8x32xf32>
    %454 = arith.mulf %443, %380 : vector<8x32xf32>
    %455 = arith.addf %453, %454 : vector<8x32xf32>
    %c5_134 = arith.constant 5 : index
    %c0_135 = arith.constant 0 : index
    %c0_136 = arith.constant 0 : index
    %456 = vector.load %arg6[%c5_134, %c0_135, %c0_136] : memref<8x16x32xf32, #tpu.memory_space<vmem>>, vector<1x8x32xf32>
    %457 = vector.shape_cast %456 : vector<1x8x32xf32> to vector<8x32xf32>
    %458 = vector.shape_cast %422 : vector<8x32xf32> to vector<1x8x32xf32>
    tpu.vector_store %arg6[%c5_134, %c0_135, %c0_136], %458 {strides = array<i32>} : memref<8x16x32xf32, #tpu.memory_space<vmem>>, vector<1x8x32xf32>,
    %c5_137 = arith.constant 5 : index
    %c8_138 = arith.constant 8 : index
    %c0_139 = arith.constant 0 : index
    %459 = vector.load %arg6[%c5_137, %c8_138, %c0_139] : memref<8x16x32xf32, #tpu.memory_space<vmem>>, vector<1x8x32xf32>
    %460 = vector.shape_cast %459 : vector<1x8x32xf32> to vector<8x32xf32>
    %461 = vector.shape_cast %455 : vector<8x32xf32> to vector<1x8x32xf32>
    tpu.vector_store %arg6[%c5_137, %c8_138, %c0_139], %461 {strides = array<i32>} : memref<8x16x32xf32, #tpu.memory_space<vmem>>, vector<1x8x32xf32>,
    %c6 = arith.constant 6 : index
    %c0_140 = arith.constant 0 : index
    %c0_141 = arith.constant 0 : index
    %c0_142 = arith.constant 0 : index
    %462 = vector.load %arg2[%c6, %c0_140, %c0_141, %c0_142] : memref<8x3x16x32xbf16, #tpu.memory_space<vmem>>, vector<1x3x16x32xbf16>
    %463 = vector.shape_cast %462 : vector<1x3x16x32xbf16> to vector<3x16x32xbf16>
    %464 = arith.extf %463 : vector<3x16x32xbf16> to vector<3x16x32xf32>
    %465 = vector.extract_strided_slice %464 {offsets = [0, 0, 0], sizes = [3, 8, 32], strides = [1, 1, 1]} : vector<3x16x32xf32> to vector<3x8x32xf32>
    %466 = arith.truncf %422 : vector<8x32xf32> to vector<8x32xbf16>
    %cst_143 = arith.constant dense<0.000000e+00> : vector<8x32xf32>
    %467 = tpu.matmul %466, %4, %cst_143 {dimension_numbers = #tpu.dot_dimension_numbers<[1], [0], [0], [1], [0, 0, 1, 1], [], []>} : vector<8x32xbf16>, vector<32x32xbf16>, vector<8x32xf32> -> vector<8x32xf32>
    %cst_144 = arith.constant dense<0.000000e+00> : vector<8x32xf32>
    %468 = tpu.matmul %466, %6, %cst_144 {dimension_numbers = #tpu.dot_dimension_numbers<[1], [0], [0], [1], [0, 0, 1, 1], [], []>} : vector<8x32xbf16>, vector<32x32xbf16>, vector<8x32xf32> -> vector<8x32xf32>
    %cst_145 = arith.constant dense<0.000000e+00> : vector<8x32xf32>
    %469 = tpu.matmul %466, %8, %cst_145 {dimension_numbers = #tpu.dot_dimension_numbers<[1], [0], [0], [1], [0, 0, 1, 1], [], []>} : vector<8x32xbf16>, vector<32x32xbf16>, vector<8x32xf32> -> vector<8x32xf32>
    %470 = vector.extract_strided_slice %465 {offsets = [0, 0, 0], sizes = [1, 8, 32], strides = [1, 1, 1]} : vector<3x8x32xf32> to vector<1x8x32xf32>
    %471 = vector.shape_cast %470 : vector<1x8x32xf32> to vector<8x32xf32>
    %472 = arith.addf %471, %467 : vector<8x32xf32>
    %473 = arith.negf %472 : vector<8x32xf32>
    %474 = math.exp %473 : vector<8x32xf32>
    %cst_146 = arith.constant 1.000000e+00 : f32
    %475 = vector.broadcast %cst_146 : f32 to vector<8x32xf32>
    %476 = arith.addf %475, %474 : vector<8x32xf32>
    %477 = arith.divf %475, %476 : vector<8x32xf32>
    %478 = vector.extract_strided_slice %465 {offsets = [1, 0, 0], sizes = [1, 8, 32], strides = [1, 1, 1]} : vector<3x8x32xf32> to vector<1x8x32xf32>
    %479 = vector.shape_cast %478 : vector<1x8x32xf32> to vector<8x32xf32>
    %480 = arith.addf %479, %468 : vector<8x32xf32>
    %481 = arith.negf %480 : vector<8x32xf32>
    %482 = math.exp %481 : vector<8x32xf32>
    %cst_147 = arith.constant 1.000000e+00 : f32
    %483 = vector.broadcast %cst_147 : f32 to vector<8x32xf32>
    %484 = arith.addf %483, %482 : vector<8x32xf32>
    %485 = arith.divf %483, %484 : vector<8x32xf32>
    %486 = vector.extract_strided_slice %465 {offsets = [2, 0, 0], sizes = [1, 8, 32], strides = [1, 1, 1]} : vector<3x8x32xf32> to vector<1x8x32xf32>
    %487 = vector.shape_cast %486 : vector<1x8x32xf32> to vector<8x32xf32>
    %488 = vector.broadcast %9 : vector<1x32xf32> to vector<8x32xf32>
    %489 = arith.addf %469, %488 : vector<8x32xf32>
    %490 = arith.mulf %477, %489 : vector<8x32xf32>
    %491 = arith.addf %487, %490 : vector<8x32xf32>
    %492 = math.tanh %491 : vector<8x32xf32>
    %cst_148 = arith.constant 1.000000e+00 : f32
    %493 = vector.broadcast %cst_148 : f32 to vector<8x32xf32>
    %494 = arith.subf %493, %485 : vector<8x32xf32>
    %495 = arith.mulf %494, %492 : vector<8x32xf32>
    %496 = arith.mulf %485, %422 : vector<8x32xf32>
    %497 = arith.addf %495, %496 : vector<8x32xf32>
    %498 = vector.extract_strided_slice %464 {offsets = [0, 8, 0], sizes = [3, 8, 32], strides = [1, 1, 1]} : vector<3x16x32xf32> to vector<3x8x32xf32>
    %499 = arith.truncf %455 : vector<8x32xf32> to vector<8x32xbf16>
    %cst_149 = arith.constant dense<0.000000e+00> : vector<8x32xf32>
    %500 = tpu.matmul %499, %4, %cst_149 {dimension_numbers = #tpu.dot_dimension_numbers<[1], [0], [0], [1], [0, 0, 1, 1], [], []>} : vector<8x32xbf16>, vector<32x32xbf16>, vector<8x32xf32> -> vector<8x32xf32>
    %cst_150 = arith.constant dense<0.000000e+00> : vector<8x32xf32>
    %501 = tpu.matmul %499, %6, %cst_150 {dimension_numbers = #tpu.dot_dimension_numbers<[1], [0], [0], [1], [0, 0, 1, 1], [], []>} : vector<8x32xbf16>, vector<32x32xbf16>, vector<8x32xf32> -> vector<8x32xf32>
    %cst_151 = arith.constant dense<0.000000e+00> : vector<8x32xf32>
    %502 = tpu.matmul %499, %8, %cst_151 {dimension_numbers = #tpu.dot_dimension_numbers<[1], [0], [0], [1], [0, 0, 1, 1], [], []>} : vector<8x32xbf16>, vector<32x32xbf16>, vector<8x32xf32> -> vector<8x32xf32>
    %503 = vector.extract_strided_slice %498 {offsets = [0, 0, 0], sizes = [1, 8, 32], strides = [1, 1, 1]} : vector<3x8x32xf32> to vector<1x8x32xf32>
    %504 = vector.shape_cast %503 : vector<1x8x32xf32> to vector<8x32xf32>
    %505 = arith.addf %504, %500 : vector<8x32xf32>
    %506 = arith.negf %505 : vector<8x32xf32>
    %507 = math.exp %506 : vector<8x32xf32>
    %cst_152 = arith.constant 1.000000e+00 : f32
    %508 = vector.broadcast %cst_152 : f32 to vector<8x32xf32>
    %509 = arith.addf %508, %507 : vector<8x32xf32>
    %510 = arith.divf %508, %509 : vector<8x32xf32>
    %511 = vector.extract_strided_slice %498 {offsets = [1, 0, 0], sizes = [1, 8, 32], strides = [1, 1, 1]} : vector<3x8x32xf32> to vector<1x8x32xf32>
    %512 = vector.shape_cast %511 : vector<1x8x32xf32> to vector<8x32xf32>
    %513 = arith.addf %512, %501 : vector<8x32xf32>
    %514 = arith.negf %513 : vector<8x32xf32>
    %515 = math.exp %514 : vector<8x32xf32>
    %cst_153 = arith.constant 1.000000e+00 : f32
    %516 = vector.broadcast %cst_153 : f32 to vector<8x32xf32>
    %517 = arith.addf %516, %515 : vector<8x32xf32>
    %518 = arith.divf %516, %517 : vector<8x32xf32>
    %519 = vector.extract_strided_slice %498 {offsets = [2, 0, 0], sizes = [1, 8, 32], strides = [1, 1, 1]} : vector<3x8x32xf32> to vector<1x8x32xf32>
    %520 = vector.shape_cast %519 : vector<1x8x32xf32> to vector<8x32xf32>
    %521 = vector.broadcast %9 : vector<1x32xf32> to vector<8x32xf32>
    %522 = arith.addf %502, %521 : vector<8x32xf32>
    %523 = arith.mulf %510, %522 : vector<8x32xf32>
    %524 = arith.addf %520, %523 : vector<8x32xf32>
    %525 = math.tanh %524 : vector<8x32xf32>
    %cst_154 = arith.constant 1.000000e+00 : f32
    %526 = vector.broadcast %cst_154 : f32 to vector<8x32xf32>
    %527 = arith.subf %526, %518 : vector<8x32xf32>
    %528 = arith.mulf %527, %525 : vector<8x32xf32>
    %529 = arith.mulf %518, %455 : vector<8x32xf32>
    %530 = arith.addf %528, %529 : vector<8x32xf32>
    %c6_155 = arith.constant 6 : index
    %c0_156 = arith.constant 0 : index
    %c0_157 = arith.constant 0 : index
    %531 = vector.load %arg6[%c6_155, %c0_156, %c0_157] : memref<8x16x32xf32, #tpu.memory_space<vmem>>, vector<1x8x32xf32>
    %532 = vector.shape_cast %531 : vector<1x8x32xf32> to vector<8x32xf32>
    %533 = vector.shape_cast %497 : vector<8x32xf32> to vector<1x8x32xf32>
    tpu.vector_store %arg6[%c6_155, %c0_156, %c0_157], %533 {strides = array<i32>} : memref<8x16x32xf32, #tpu.memory_space<vmem>>, vector<1x8x32xf32>,
    %c6_158 = arith.constant 6 : index
    %c8_159 = arith.constant 8 : index
    %c0_160 = arith.constant 0 : index
    %534 = vector.load %arg6[%c6_158, %c8_159, %c0_160] : memref<8x16x32xf32, #tpu.memory_space<vmem>>, vector<1x8x32xf32>
    %535 = vector.shape_cast %534 : vector<1x8x32xf32> to vector<8x32xf32>
    %536 = vector.shape_cast %530 : vector<8x32xf32> to vector<1x8x32xf32>
    tpu.vector_store %arg6[%c6_158, %c8_159, %c0_160], %536 {strides = array<i32>} : memref<8x16x32xf32, #tpu.memory_space<vmem>>, vector<1x8x32xf32>,
    %c7 = arith.constant 7 : index
    %c0_161 = arith.constant 0 : index
    %c0_162 = arith.constant 0 : index
    %c0_163 = arith.constant 0 : index
    %537 = vector.load %arg2[%c7, %c0_161, %c0_162, %c0_163] : memref<8x3x16x32xbf16, #tpu.memory_space<vmem>>, vector<1x3x16x32xbf16>
    %538 = vector.shape_cast %537 : vector<1x3x16x32xbf16> to vector<3x16x32xbf16>
    %539 = arith.extf %538 : vector<3x16x32xbf16> to vector<3x16x32xf32>
    %540 = vector.extract_strided_slice %539 {offsets = [0, 0, 0], sizes = [3, 8, 32], strides = [1, 1, 1]} : vector<3x16x32xf32> to vector<3x8x32xf32>
    %541 = arith.truncf %497 : vector<8x32xf32> to vector<8x32xbf16>
    %cst_164 = arith.constant dense<0.000000e+00> : vector<8x32xf32>
    %542 = tpu.matmul %541, %4, %cst_164 {dimension_numbers = #tpu.dot_dimension_numbers<[1], [0], [0], [1], [0, 0, 1, 1], [], []>} : vector<8x32xbf16>, vector<32x32xbf16>, vector<8x32xf32> -> vector<8x32xf32>
    %cst_165 = arith.constant dense<0.000000e+00> : vector<8x32xf32>
    %543 = tpu.matmul %541, %6, %cst_165 {dimension_numbers = #tpu.dot_dimension_numbers<[1], [0], [0], [1], [0, 0, 1, 1], [], []>} : vector<8x32xbf16>, vector<32x32xbf16>, vector<8x32xf32> -> vector<8x32xf32>
    %cst_166 = arith.constant dense<0.000000e+00> : vector<8x32xf32>
    %544 = tpu.matmul %541, %8, %cst_166 {dimension_numbers = #tpu.dot_dimension_numbers<[1], [0], [0], [1], [0, 0, 1, 1], [], []>} : vector<8x32xbf16>, vector<32x32xbf16>, vector<8x32xf32> -> vector<8x32xf32>
    %545 = vector.extract_strided_slice %540 {offsets = [0, 0, 0], sizes = [1, 8, 32], strides = [1, 1, 1]} : vector<3x8x32xf32> to vector<1x8x32xf32>
    %546 = vector.shape_cast %545 : vector<1x8x32xf32> to vector<8x32xf32>
    %547 = arith.addf %546, %542 : vector<8x32xf32>
    %548 = arith.negf %547 : vector<8x32xf32>
    %549 = math.exp %548 : vector<8x32xf32>
    %cst_167 = arith.constant 1.000000e+00 : f32
    %550 = vector.broadcast %cst_167 : f32 to vector<8x32xf32>
    %551 = arith.addf %550, %549 : vector<8x32xf32>
    %552 = arith.divf %550, %551 : vector<8x32xf32>
    %553 = vector.extract_strided_slice %540 {offsets = [1, 0, 0], sizes = [1, 8, 32], strides = [1, 1, 1]} : vector<3x8x32xf32> to vector<1x8x32xf32>
    %554 = vector.shape_cast %553 : vector<1x8x32xf32> to vector<8x32xf32>
    %555 = arith.addf %554, %543 : vector<8x32xf32>
    %556 = arith.negf %555 : vector<8x32xf32>
    %557 = math.exp %556 : vector<8x32xf32>
    %cst_168 = arith.constant 1.000000e+00 : f32
    %558 = vector.broadcast %cst_168 : f32 to vector<8x32xf32>
    %559 = arith.addf %558, %557 : vector<8x32xf32>
    %560 = arith.divf %558, %559 : vector<8x32xf32>
    %561 = vector.extract_strided_slice %540 {offsets = [2, 0, 0], sizes = [1, 8, 32], strides = [1, 1, 1]} : vector<3x8x32xf32> to vector<1x8x32xf32>
    %562 = vector.shape_cast %561 : vector<1x8x32xf32> to vector<8x32xf32>
    %563 = vector.broadcast %9 : vector<1x32xf32> to vector<8x32xf32>
    %564 = arith.addf %544, %563 : vector<8x32xf32>
    %565 = arith.mulf %552, %564 : vector<8x32xf32>
    %566 = arith.addf %562, %565 : vector<8x32xf32>
    %567 = math.tanh %566 : vector<8x32xf32>
    %cst_169 = arith.constant 1.000000e+00 : f32
    %568 = vector.broadcast %cst_169 : f32 to vector<8x32xf32>
    %569 = arith.subf %568, %560 : vector<8x32xf32>
    %570 = arith.mulf %569, %567 : vector<8x32xf32>
    %571 = arith.mulf %560, %497 : vector<8x32xf32>
    %572 = arith.addf %570, %571 : vector<8x32xf32>
    %573 = vector.extract_strided_slice %539 {offsets = [0, 8, 0], sizes = [3, 8, 32], strides = [1, 1, 1]} : vector<3x16x32xf32> to vector<3x8x32xf32>
    %574 = arith.truncf %530 : vector<8x32xf32> to vector<8x32xbf16>
    %cst_170 = arith.constant dense<0.000000e+00> : vector<8x32xf32>
    %575 = tpu.matmul %574, %4, %cst_170 {dimension_numbers = #tpu.dot_dimension_numbers<[1], [0], [0], [1], [0, 0, 1, 1], [], []>} : vector<8x32xbf16>, vector<32x32xbf16>, vector<8x32xf32> -> vector<8x32xf32>
    %cst_171 = arith.constant dense<0.000000e+00> : vector<8x32xf32>
    %576 = tpu.matmul %574, %6, %cst_171 {dimension_numbers = #tpu.dot_dimension_numbers<[1], [0], [0], [1], [0, 0, 1, 1], [], []>} : vector<8x32xbf16>, vector<32x32xbf16>, vector<8x32xf32> -> vector<8x32xf32>
    %cst_172 = arith.constant dense<0.000000e+00> : vector<8x32xf32>
    %577 = tpu.matmul %574, %8, %cst_172 {dimension_numbers = #tpu.dot_dimension_numbers<[1], [0], [0], [1], [0, 0, 1, 1], [], []>} : vector<8x32xbf16>, vector<32x32xbf16>, vector<8x32xf32> -> vector<8x32xf32>
    %578 = vector.extract_strided_slice %573 {offsets = [0, 0, 0], sizes = [1, 8, 32], strides = [1, 1, 1]} : vector<3x8x32xf32> to vector<1x8x32xf32>
    %579 = vector.shape_cast %578 : vector<1x8x32xf32> to vector<8x32xf32>
    %580 = arith.addf %579, %575 : vector<8x32xf32>
    %581 = arith.negf %580 : vector<8x32xf32>
    %582 = math.exp %581 : vector<8x32xf32>
    %cst_173 = arith.constant 1.000000e+00 : f32
    %583 = vector.broadcast %cst_173 : f32 to vector<8x32xf32>
    %584 = arith.addf %583, %582 : vector<8x32xf32>
    %585 = arith.divf %583, %584 : vector<8x32xf32>
    %586 = vector.extract_strided_slice %573 {offsets = [1, 0, 0], sizes = [1, 8, 32], strides = [1, 1, 1]} : vector<3x8x32xf32> to vector<1x8x32xf32>
    %587 = vector.shape_cast %586 : vector<1x8x32xf32> to vector<8x32xf32>
    %588 = arith.addf %587, %576 : vector<8x32xf32>
    %589 = arith.negf %588 : vector<8x32xf32>
    %590 = math.exp %589 : vector<8x32xf32>
    %cst_174 = arith.constant 1.000000e+00 : f32
    %591 = vector.broadcast %cst_174 : f32 to vector<8x32xf32>
    %592 = arith.addf %591, %590 : vector<8x32xf32>
    %593 = arith.divf %591, %592 : vector<8x32xf32>
    %594 = vector.extract_strided_slice %573 {offsets = [2, 0, 0], sizes = [1, 8, 32], strides = [1, 1, 1]} : vector<3x8x32xf32> to vector<1x8x32xf32>
    %595 = vector.shape_cast %594 : vector<1x8x32xf32> to vector<8x32xf32>
    %596 = vector.broadcast %9 : vector<1x32xf32> to vector<8x32xf32>
    %597 = arith.addf %577, %596 : vector<8x32xf32>
    %598 = arith.mulf %585, %597 : vector<8x32xf32>
    %599 = arith.addf %595, %598 : vector<8x32xf32>
    %600 = math.tanh %599 : vector<8x32xf32>
    %cst_175 = arith.constant 1.000000e+00 : f32
    %601 = vector.broadcast %cst_175 : f32 to vector<8x32xf32>
    %602 = arith.subf %601, %593 : vector<8x32xf32>
    %603 = arith.mulf %602, %600 : vector<8x32xf32>
    %604 = arith.mulf %593, %530 : vector<8x32xf32>
    %605 = arith.addf %603, %604 : vector<8x32xf32>
    %c7_176 = arith.constant 7 : index
    %c0_177 = arith.constant 0 : index
    %c0_178 = arith.constant 0 : index
    %606 = vector.load %arg6[%c7_176, %c0_177, %c0_178] : memref<8x16x32xf32, #tpu.memory_space<vmem>>, vector<1x8x32xf32>
    %607 = vector.shape_cast %606 : vector<1x8x32xf32> to vector<8x32xf32>
    %608 = vector.shape_cast %572 : vector<8x32xf32> to vector<1x8x32xf32>
    tpu.vector_store %arg6[%c7_176, %c0_177, %c0_178], %608 {strides = array<i32>} : memref<8x16x32xf32, #tpu.memory_space<vmem>>, vector<1x8x32xf32>,
    %c7_179 = arith.constant 7 : index
    %c8_180 = arith.constant 8 : index
    %c0_181 = arith.constant 0 : index
    %609 = vector.load %arg6[%c7_179, %c8_180, %c0_181] : memref<8x16x32xf32, #tpu.memory_space<vmem>>, vector<1x8x32xf32>
    %610 = vector.shape_cast %609 : vector<1x8x32xf32> to vector<8x32xf32>
    %611 = vector.shape_cast %605 : vector<8x32xf32> to vector<1x8x32xf32>
    tpu.vector_store %arg6[%c7_179, %c8_180, %c0_181], %611 {strides = array<i32>} : memref<8x16x32xf32, #tpu.memory_space<vmem>>, vector<1x8x32xf32>,
    %c0_182 = arith.constant 0 : index
    %c0_183 = arith.constant 0 : index
    %612 = vector.load %arg7[%c0_182, %c0_183] : memref<16x32xf32, #tpu.memory_space<vmem>>, vector<8x32xf32>
    tpu.vector_store %arg7[%c0_182, %c0_183], %572 {strides = array<i32>} : memref<16x32xf32, #tpu.memory_space<vmem>>, vector<8x32xf32>,
    %c8_184 = arith.constant 8 : index
    %c0_185 = arith.constant 0 : index
    %613 = vector.load %arg7[%c8_184, %c0_185] : memref<16x32xf32, #tpu.memory_space<vmem>>, vector<8x32xf32>
    tpu.vector_store %arg7[%c8_184, %c0_185], %605 {strides = array<i32>} : memref<16x32xf32, #tpu.memory_space<vmem>>, vector<8x32xf32>,
    return
  }
  func.func @transform_0(%arg0: i32, %arg1: i32) -> (i32, i32, i32, i32) {
    %c0_i32 = arith.constant 0 : i32
    %c0_i32_0 = arith.constant 0 : i32
    %c0_i32_1 = arith.constant 0 : i32
    return %arg1, %c0_i32, %arg0, %c0_i32_0 : i32, i32, i32, i32
  }
  func.func @transform_1(%arg0: i32, %arg1: i32) -> (i32, i32, i32) {
    %c0_i32 = arith.constant 0 : i32
    %c0_i32_0 = arith.constant 0 : i32
    %c0_i32_1 = arith.constant 0 : i32
    %c0_i32_2 = arith.constant 0 : i32
    return %c0_i32, %c0_i32_0, %c0_i32_1 : i32, i32, i32
  }
  func.func @transform_2(%arg0: i32, %arg1: i32) -> (i32, i32) {
    %c0_i32 = arith.constant 0 : i32
    %c0_i32_0 = arith.constant 0 : i32
    %c0_i32_1 = arith.constant 0 : i32
    return %c0_i32, %c0_i32_0 : i32, i32
  }
  func.func @transform_3(%arg0: i32, %arg1: i32) -> (i32, i32) {
    %c0_i32 = arith.constant 0 : i32
    %c0_i32_0 = arith.constant 0 : i32
    %c0_i32_1 = arith.constant 0 : i32
    return %c0_i32, %c0_i32_0 : i32, i32
  }
  func.func @transform_4(%arg0: i32, %arg1: i32) -> (i32, i32, i32) {
    %c0_i32 = arith.constant 0 : i32
    %c0_i32_0 = arith.constant 0 : i32
    return %arg1, %arg0, %c0_i32 : i32, i32, i32
  }
}

</mosaic_0001>

<bundles_post_ra>
// kernel: tpu_custom_call.1
= control target key start
LH: loop header
LB: loop body
LE: loop exit
PB: predicated region body
PF: predicated region fallthrough
CT: control target
= control target key end

     0   :  { %s4887_s0 = inlined_call_operand.hbm [shape: bf16[8,3,32,32], index: 0, kind: input, shape index: {}]   ;;  %s4888_s1 = inlined_call_operand.hbm [shape: bf16[3,32,32], index: 1, kind: input, shape index: {}]   ;;  %s4889_s2 = inlined_call_operand.vmem [shape: f32[1,32], index: 2, kind: input, shape index: {}]   ;;  %s4890_s3 = inlined_call_operand.vmem [shape: f32[1,32], index: 3, kind: input, shape index: {}]   ;;  %s4891_s4 = inlined_call_operand.hbm [shape: f32[8,32,32], index: 4, kind: output, shape index: {}]  }
   0x1   :  { %4899 = sst [smem:[#allocation18_spill]] %s4888_s1 }
   0x2   :  { %9 = vsyncpa [#allocation4], 0 }
   0x3   :  { %11 = vsyncpa [#allocation4 + $0x1], 0 }
   0x4   :  { %12 = vsyncpa [#allocation7], 0 }
   0x5   :  { %13 = vsyncpa [#allocation5], 0 }
   0x6   :  { %15 = vsyncpa [#allocation5 + $0x1], 0  ;;  %s4159_s15 = smov 0   ;;  %s4161_s16 = smov 0  }
   0x7   :  { %s4163_s17 = smov 0   ;;  %s4165_s18 = smov 0  }
   0x8   :  { %s4167_s19 = smov 0   ;;  %s4169_s20 = smov 0  }
   0x9 LB: > { %s2945_s21 = sadd.s32 4294967295, %s4114_s20   ;;  %s2946_s22 = sadd.s32 4294967294, %s4114_s20   ;;  %s4114_s20 = sphi %s4169_s20, %s21_s20   ;;  %s4110_s19 = sphi %s4167_s19, %s4920_s19   ;;  %s4106_s18 = sphi %s4165_s18, %s4919_s18   ;;  %s4102_s17 = sphi %s4163_s17, %s4918_s17   ;;  %s4098_s16 = sphi %s4161_s16, %s4917_s16   ;;  %s4094_s15 = sphi %s4159_s15, %s4916_s15  }
   0xa   : > { %s33_s23 = sadd.s32 1, %s4110_s19  ;;  %s42_s24 = sadd.s32 1, %s4102_s17 }
   0xb   : > { %p35_p0 = scmp.ge.s32.totalorder %s33_s23, 2  ;;  %p49_p1 = scmp.ne.s32.totalorder %s4102_s17, %s4098_s16 }
   0xc   : > { %p50_p2 = scmp.eq.s32.totalorder %s4114_s20, 0  ;;  %p55_p3 = scmp.ne.s32.totalorder %s4098_s16, %s4094_s15 }
   0xd   : > { %s4922_s23 = smov (%p35_p0, %s33_s23), 0  ;;  %p4204_p5 = scmp.eq.s32.totalorder %s2945_s21, 0 }
   0xe   : > { %4900 = sst [smem:[#allocation17_spill]] %s4922_s23  ;;  %p4200_p4 = por %p50_p2, %p49_p1 }
   0xf   : > { %s4902_s26 = scalar_select %p4204_p5, 1, 0 }
  0x10   : > { %s4901_s25 = scalar_select %p4200_p4, 1, 0 }
  0x11   : > { %s38_s27 = ssub.s32 %s4110_s19, %s4922_s23  ;;  %p144_p6 = scmp.eq.s32.totalorder %s2945_s21, 1 }
  0x12   : > { %p40_p7 = scmp.eq.s32.totalorder %s38_s27, 0  ;;  %p4212_p8 = por %p4204_p5, %p55_p3 }
  0x13   : > { %p4216_p9 = por %p144_p6, %p49_p1  ;;  %p150_p10 = scmp.eq.s32.totalorder %s2946_s22, 1 }
  0x14   : > { %s4903_s28 = scalar_select %p4212_p8, 1, 0 }
  0x15   : > { %s4904_s29 = scalar_select %p4216_p9, 1, 0 }
  0x16   : > { %s4221_s30 = scalar_select %p40_p7, %s4102_s17, %s42_s24  }
  0x17   : > { %p4223_p11 = por %p150_p10, %p55_p3  ;;  %p2947_p12 = scmp.ge.s32.totalorder %s4114_s20, 1 }
  0x18   : > { %p157_p13 = scmp.lt.s32.totalorder %s4114_s20, 3  ;;  %s4116_s7 = smov [#allocation6]  }
  0x19   : > { %s4905_s5 = scalar_select %p4223_p11, 1, 0 }
  0x1a   : > { %p4229_p0 = pnand %p2947_p12, %p157_p13  ;;  %s169_s8 = sshll.u32 %s4116_s7, 4  ;;  %s170_s8 = int_to_ptr.vmem [resolvable:$true] %s169_s8 }
  0x1b   : > { %s4908_s1 = sld [smem:[#allocation18_spill]] }
  0x1c   : > { %s4906_s6 = scalar_select %p4229_p0, 1, 0 }
  0x1d   : > { %p3778_p1 = pneg %p4229_p0 }
  0x1f   : > { %p4237_p2 = pnand %p3778_p1, %p4204_p5 }
  0x21   : > { %s4028_s12 = scalar_lea.hbm %s4908_s1, 768  ;;  %p4030_p6 = pneg %p4237_p2 }
  0x22   : > { %p4029_p3 = scmp.ne.s32.totalorder %s4908_s1, %s4028_s12  ;;  %p4035_p12 = scmp.lt.u32.totalorder %s4028_s12, %s4908_s1 }
  0x24   : > { %p4031_p7 = pnand %p4030_p6, %p4029_p3 }
  0x26   : > { %p4032_p10 = pneg %p4031_p7 }
  0x28   : > { %p4037_p13 = pnand %p4035_p12, %p4032_p10 }
  0x2a   : > { %4040 = shalt.err (!%p4037_p13)
}
  0x2b   : > { %s4041_s24 = scalar_lea.vmem %s170_s8, 768  ;;  %p4049_p5 = scmp.lt.s32.totalorder %s170_s8, %s170_s8 }
  0x2c   : > { %p4042_p1 = scmp.ne.s32.totalorder %s170_s8, %s4041_s24  ;;  %p4050_p8 = scmp.lt.s32.totalorder %s4041_s24, %s4041_s24 }
  0x2e   : > { %p4044_p11 = pnand %p4042_p1, %p4030_p6  ;;  %p4051_p0 = por %p4050_p8, %p4049_p5 }
  0x30   : > { %p4045_p9 = pneg %p4044_p11 }
  0x32   : > { %p4052_p4 = pnand %p4051_p0, %p4045_p9 }
  0x34   : > { %4055 = shalt.err (!%p4052_p4)
}
  0x35   : > { %s4117_s27 = smov 64   ;;  %s4118_s7 = smov 4  }
  0x36   : > { %3781 = dma.hbm_to_vmem [thread:$0]  (!%p4237_p2), %s4908_s1, 768, %s170_s8, [#allocation7], %s4117_s27, %s4117_s27, %s4118_s7  }
  0x37   : > { %p2949_p3 = scmp.ge.s32.totalorder %s4114_s20, 2 }
  0x39   : > { %185 = sbr.rel (%p2949_p3) target bundleno = 80 (0x50), region = 28 }
  0x40   : > { %s189_s12 = sand.u32 1, %s4102_s17   ;;  %s3106_s9 = sshll.u32 %s4110_s19, 7 }
  0x41   : > { %s3755_s13 = smul.u32 192, %s189_s12  ;;  %s4119_s14 = smov 256  }
  0x42   : > { %p4909_p4 = scmp.ne.s32.totalorder %s4901_s25, 0  ;;  %s202_s24 = scalar_lea.hbm %s4887_s0, %s3106_s9 }
  0x43   : > { %s193_s7 = scalar_lea.vmem [#allocation3], %s3755_s13  ;;  %s4120_s11 = smov 128  }
  0x44   : > { %3760 = sst [smem:[#allocation10]] (%p4909_p4), %s4119_s14  ;;  %s215_s10 = sshll.u32 %s193_s7, 4  ;;  %s216_s10 = int_to_ptr.vmem [resolvable:$true] %s215_s10 }
  0x45   : > { %s3759_s8 = scalar_select %p4909_p4, [#allocation0], [#allocation13] }
  0x46   : > { %3761 = sst [smem:[#allocation10 + $0x1]] (%p4909_p4), %s4120_s11  ;;  %s4121_s1 = smov 2  }
  0x47   : > { %s207_s27 = sld [smem:[%s3759_s8]]   ;;  %s4122_s23 = smov 64  }
  0x48   : > { %3762 = sst [smem:[#allocation10 + $0x2]] (%p4909_p4), %s4121_s1  ;;  %s4123_s14 = smov 4  }
  0x49   : > { %3763 = sst [smem:[#allocation10 + $0x3]] (%p4909_p4), %s4122_s23  ;;  %s190_s13 = scalar_lea.sflag [#allocation4], %s189_s12 }
  0x4a   : > { %3764 = sst [smem:[#allocation10 + $0x4]] (%p4909_p4), %s4122_s23  ;;  %s4124_s21 = smov [#allocation9]  }
  0x4b   : > { %3765 = sst [smem:[#allocation10 + $0x5]] (%p4909_p4), %s4123_s14 }
  0x4d   : > { %s2952_s9 = sshll.u32 %s207_s27, 26 }
  0x4e   : > { %s2953_s8 = sadd.s32 134217728, %s2952_s9 }
  0x4f   : > { %3766 = dma.general (%p4909_p4), %s202_s24, 3072, %s216_s10, %s190_s13, %s4124_s21, [#allocation10], %s2953_s8, 0  }
  0x50 PF: > { %p4910_p5 = scmp.ne.s32.totalorder %s4906_s6, 0 }
  0x51   : > { %s4284_s1 = sand.u32 (!%p4910_p5), 1, %s4098_s16   ;;  %p4911_p8 = scmp.ne.s32.totalorder (!%p4910_p5), %s4903_s28, 0 }
  0x52   : > { %240 = sbr.rel (%p4910_p5) target bundleno = 2211 (0x8a3), region = 36  ;;  %s243_s22 = scalar_lea.sflag (!%p4910_p5), [#allocation4], %s4284_s1 }
  0x53   : > { %s3756_s23 = smul.u32 (!%p4910_p5), 192, %s4284_s1 }
  0x55   : > { %s4288_s7 = scalar_lea.vmem (!%p4910_p5), [#allocation3], %s3756_s23 }
  0x59   : > { %4081 = dma.done.wait (%p4911_p8), %s243_s22, 3072  }
  0x5a   : > { %4083 = vsyncadd (%p4911_p8), %s243_s22, 4294964224  ;;  %p4912_p9 = scmp.ne.s32.totalorder %s4902_s26, 0 }
  0x5c   : > { %4085 = dma.done.wait (%p4912_p9), [#allocation7], 768  }
  0x5d   : > { %4087 = vsyncadd (%p4912_p9), [#allocation7], 4294966528  ;;  %v4125_v0 = vmov 0.0   ;;  %vm4126_vm0 = vmmov 0   ;;  %v4304_v1 = vld [vmem:[#allocation6 + $0x10] sm:$0xff]   ;;  %v4306_v2 = vld [vmem:[#allocation6] sm:$0xff]  }
  0x5e   : > { %3379 = vmatprep.subr.bf16.mxu1 %v4125_v0  ;;  %3371 = vmatprep.subr.bf16.mxu0 %v4125_v0  ;;  %v4309_v3 = vld [vmem:[#allocation6 + $0x18] sm:$0xff]   ;;  %vm291_vm1 = vcmask 261120   ;;  %v4313_v4 = vld [vmem:[#allocation6 + $0x8] sm:$0xff]   ;;  %v2957_v5 = vld [vmem:[%s4890_s3] ss:$0 sm:$0xff]  ;;  %s2956_s12 = sshll.u32 %s4284_s1, 7 }
  0x5f   : > { %3375 = vmatprep.mubr.msk.bf16.mxu0 %vm4126_vm0, %v4125_v0  ;;  %3383 = vmatprep.mubr.msk.bf16.mxu1 %vm4126_vm0, %v4125_v0  ;;  %292 = vst.msk [vmem:[#allocation2] sm:$0xff] %vm291_vm1, %v2957_v5  ;;  %293 = vst.msk [vmem:[#allocation2 + $0x8] sm:$0xff] %vm291_vm1, %v2957_v5  ;;  %v4327_v7 = vld [vmem:[#allocation6 + $0x20] sm:$0xff]   ;;  %v4335_v9 = vld [vmem:[#allocation6 + $0x28] sm:$0xff]   ;;  %s4393_s24 = scalar_lea.vmem [#allocation8], %s2956_s12  ;;  %s2803_s11 = scalar_lea.sflag [#allocation5], %s4284_s1 }
  0x60   : > { %3380 = vmatpush3.bf16.msra.mxu1 %v4304_v1  ;;  %3372 = vmatpush3.bf16.msra.mxu0 %v4306_v2  ;;  %v3109_v12 = vld [vmem:[%s4288_s7] sm:$0xff]   ;;  %v3204_v14 = vld [vmem:[%s4288_s7 + $0x8] sm:$0xff]   ;;  %v4384_v55 = vld [vmem:[%s4889_s2] ss:$0 sm:$0xff] }
  0x61   : > { %3381 = vmatprep.subr.bf16.mxu1 %v4125_v0  ;;  %3373 = vmatprep.subr.bf16.mxu0 %v4125_v0  ;;  %v3110_v13 = vunpack.c.l.bf16 %v3109_v12  ;;  %v3114_v16 = vunpack.c.l.bf16 %v3204_v14  ;;  %v3111_v27 = vunpack.c.h.bf16 %v3109_v12  ;;  %v3115_v39 = vunpack.c.h.bf16 %v3204_v14  ;;  %v3205_v56 = vld [vmem:[%s4288_s7 + $0x10] sm:$0xff]  }
  0x62   : > { %v3118_v58 = vunpack.c.l.bf16 %v3205_v56 }
  0x64   : > { %3382 = vmatpush3.bf16.msra.mxu1 %v4309_v3  ;;  %3374 = vmatpush3.bf16.msra.mxu0 %v4313_v4 }
  0x65   : > { %3395 = vmatprep.subr.bf16.mxu1 %v4125_v0  ;;  %3387 = vmatprep.subr.bf16.mxu0 %v4125_v0 }
  0x66   : > { %v4325_v6 = vld [vmem:[#allocation2] sm:$0xff]  ;;  %v4337_v10 = vld [vmem:[#allocation2 + $0x8] sm:$0xff] }
  0x67   : > { %v323_v8 = vpack.c.bf16 %v4325_v6, %v4325_v6  ;;  %v511_v11 = vpack.c.bf16 %v4337_v10, %v4337_v10 }
  0x69   : > { %3376 = vmatmul.mubr.msk.bf16.vlgmr.msra.gmra.mrb[0].mxu0 %vm291_vm1, %v323_v8  ;;  %3384 = vmatmul.mubr.msk.bf16.vlgmr.msra.gmra.mrb[0].mxu1 %vm291_vm1, %v323_v8 }
  0x6a   : > { %3396 = vmatpush3.bf16.msra.mxu1 %v4306_v2  ;;  %3388 = vmatpush3.bf16.msra.mxu0 %v4327_v7 }
  0x6b   : > { %3397 = vmatprep.subr.bf16.mxu1 %v4125_v0  ;;  %3389 = vmatprep.subr.bf16.mxu0 %v4125_v0 }
  0x6c   : > { %3399 = vmatprep.mubr.msk.bf16.mxu1 %vm4126_vm0, %v4125_v0  ;;  %3391 = vmatprep.mubr.msk.bf16.mxu0 %vm4126_vm0, %v4125_v0 }
  0x6e   : > { %3398 = vmatpush3.bf16.msra.mxu1 %v4313_v4  ;;  %3390 = vmatpush3.bf16.msra.mxu0 %v4335_v9 }
  0x6f   : > { %3403 = vmatprep.subr.bf16.mxu0 %v4125_v0  ;;  %3411 = vmatprep.subr.bf16.mxu1 %v4125_v0 }
  0x71   : > { %3400 = vmatmul.mubr.msk.bf16.vlgmr.msra.gmra.mrb[4].mxu1 %vm291_vm1, %v511_v11  ;;  %3392 = vmatmul.mubr.msk.bf16.vlgmr.msra.gmra.mrb[4].mxu0 %vm291_vm1, %v323_v8 }
  0x72   : > { %3404 = vmatpush3.bf16.msra.mxu0 %v4304_v1  ;;  %3407 = vmatprep.mubr.msk.bf16.mxu0 %vm4126_vm0, %v4125_v0 }
  0x73   : > { %3405 = vmatprep.subr.bf16.mxu0 %v4125_v0  ;;  %3412 = vmatpush3.bf16.msra.mxu1 %v4327_v7 }
  0x74   : > { %3413 = vmatprep.subr.bf16.mxu1 %v4125_v0  ;;  %3415 = vmatprep.mubr.msk.bf16.mxu1 %vm4126_vm0, %v4125_v0 }
  0x76   : > { %3406 = vmatpush3.bf16.msra.mxu0 %v4309_v3 }
  0x77   : > { %3414 = vmatpush3.bf16.msra.mxu1 %v4335_v9  ;;  %3419 = vmatprep.subr.bf16.mxu0 %v4125_v0 }
  0x78   : > { %3427 = vmatprep.subr.bf16.mxu1 %v4125_v0 }
  0x79   : > { %3408 = vmatmul.mubr.msk.bf16.vlgmr.msra.gmra.mrb[8].mxu0 %vm291_vm1, %v511_v11 }
  0x7a   : > { %3416 = vmatmul.mubr.msk.bf16.vlgmr.msra.gmra.mrb[8].mxu1 %vm291_vm1, %v511_v11  ;;  %3420 = vmatpush3.bf16.msra.mxu0 %v4306_v2  ;;  %v3119_v11 = vunpack.c.h.bf16 %v3205_v56 }
  0x7b   : > { %3428 = vmatpush3.bf16.msra.mxu1 %v4304_v1  ;;  %3421 = vmatprep.subr.bf16.mxu0 %v4125_v0 }
  0x7c   : > { %3429 = vmatprep.subr.bf16.mxu1 %v4125_v0  ;;  %3423 = vmatprep.mubr.msk.bf16.mxu0 %vm4126_vm0, %v4125_v0 }
  0x7d   : > { %3431 = vmatprep.mubr.msk.bf16.mxu1 %vm4126_vm0, %v4125_v0 }
  0x7e   : > { %3422 = vmatpush3.bf16.msra.mxu0 %v4313_v4 }
  0x7f   : > { %3430 = vmatpush3.bf16.msra.mxu1 %v4309_v3  ;;  %3435 = vmatprep.subr.bf16.mxu0 %v4125_v0 }
  0x80   : > { %3443 = vmatprep.subr.bf16.mxu1 %v4125_v0 }
 0x13c   : > { %v374_v15 = vpop.f32.mrb[0].mxu0  ;;  %v426_v17 = vpop.f32.mrb[0].mxu1 }
 0x13d   : > { %v432_v18 = vadd.f32 %v3110_v13, %v374_v15  ;;  %v3377_v19 = vpop.f32.mrb[1].mxu0  ;;  %v3385_v20 = vpop.f32.mrb[1].mxu1  ;;  %v439_v26 = vadd.f32 %v3114_v16, %v426_v17 }
 0x13e   : > { %v377_v21 = vpop.f32.mrb[2].mxu0  ;;  %v429_v22 = vpop.f32.mrb[2].mxu1 }
 0x13f   : > { %v2964_v23 = vmul.f32 -1.442695, %v432_v18  ;;  %v3378_v24 = vpop.f32.mrb[3].mxu0  ;;  %v3386_v25 = vpop.f32.mrb[3].mxu1  ;;  %v2965_v28 = vmul.f32 -1.442695, %v439_v26 }
 0x141   : > { %3861 = vpow2.f32 %v2964_v23 }
 0x142   : > { %3863 = vpow2.f32 %v2965_v28 }
 0x144   : > { %v549_v29 = vpop.f32.mrb[4].mxu1  ;;  %v498_v30 = vpop.f32.mrb[4].mxu0 }
 0x145   : > { %v595_v31 = vadd.f32 %v3111_v27, %v549_v29  ;;  %v3401_v32 = vpop.f32.mrb[5].mxu1  ;;  %v3393_v33 = vpop.f32.mrb[5].mxu0  ;;  %v499_v59 = vadd.f32 %v4384_v55, %v498_v30  ;;  %v3206_v27 = vld [vmem:[%s4288_s7 + $0x18] sm:$0xff]   ;;  %v3207_v29 = vld [vmem:[%s4288_s7 + $0x20] sm:$0xff]  }
 0x146   : > { %v552_v34 = vpop.f32.mrb[6].mxu1  ;;  %v501_v35 = vpop.f32.mrb[6].mxu0  ;;  %v3122_v28 = vunpack.c.l.bf16 %v3206_v27 }
 0x147   : > { %v2972_v36 = vmul.f32 -1.442695, %v595_v31  ;;  %v3402_v37 = vpop.f32.mrb[7].mxu1  ;;  %v3394_v38 = vpop.f32.mrb[7].mxu0  ;;  %v3126_v31 = vunpack.c.l.bf16 %v3207_v29 }
 0x149   : > { %3865 = vpow2.f32 %v2972_v36 }
 0x14b   : > { %v3862_v40 = vpop.eup %3861 }
 0x14c   : > { %v436_v41 = vadd.f32 1.0, %v3862_v40  ;;  %v589_v42 = vpop.f32.mrb[8].mxu0  ;;  %v3864_v52 = vpop.eup %3863 }
 0x14d   : > { %v602_v43 = vadd.f32 %v3115_v39, %v589_v42  ;;  %v3409_v44 = vpop.f32.mrb[9].mxu0  ;;  %v643_v45 = vpop.f32.mrb[8].mxu1  ;;  %v443_v57 = vadd.f32 1.0, %v3864_v52  ;;  %v3123_v42 = vunpack.c.h.bf16 %v3206_v27 }
 0x14e   : > { %3867 = vrcp.f32 %v436_v41  ;;  %v592_v46 = vpop.f32.mrb[10].mxu0  ;;  %v3417_v47 = vpop.f32.mrb[9].mxu1  ;;  %v644_v8 = vadd.f32 %v4384_v55, %v643_v45 }
 0x14f   : > { %v2973_v48 = vmul.f32 -1.442695, %v602_v43  ;;  %v3410_v49 = vpop.f32.mrb[11].mxu0  ;;  %v646_v50 = vpop.f32.mrb[10].mxu1 }
 0x150   : > { %v3418_v51 = vpop.f32.mrb[11].mxu1 }
 0x151   : > { %3869 = vpow2.f32 %v2973_v48 }
 0x153   : > { %v3866_v53 = vpop.eup %3865 }
 0x154   : > { %v599_v54 = vadd.f32 1.0, %v3866_v53 }
 0x156   : > { %3871 = vrcp.f32 %v599_v54  ;;  %v3127_v54 = vunpack.c.h.bf16 %v3207_v29 }
 0x157   : > { %3873 = vrcp.f32 %v443_v57 }
 0x158   : > { %v3868_v60 = vpop.eup %3867 }
 0x159   : > { %v504_v61 = vmul.f32 %v3868_v60, %v499_v59 }
 0x15b   : > { %v3870_v62 = vpop.eup %3869  ;;  %v505_v63 = vadd.f32 %v3118_v58, %v504_v61 }
 0x15c   : > { %v606_v5 = vadd.f32 1.0, %v3870_v62 }
 0x15d   : > { %3875 = vtanh.f32 %v505_v63 }
 0x15e   : > { %3877 = vrcp.f32 %v606_v5 }
 0x160   : > { %v3872_v12 = vpop.eup %3871 }
 0x161   : > { %v649_v13 = vmul.f32 %v3872_v12, %v644_v8  ;;  %v3874_v14 = vpop.eup %3873 }
 0x162   : > { %v507_v16 = vsub.f32 1.0, %v3874_v14  ;;  %v509_v18 = vmul.f32 %v3874_v14, %v4325_v6 }
 0x163   : > { %v650_v15 = vadd.f32 %v3119_v11, %v649_v13 }
 0x165   : > { %3879 = vtanh.f32 %v650_v15  ;;  %v3208_v15 = vld [vmem:[%s4288_s7 + $0x28] sm:$0xff]  }
 0x167   : > { %v3876_v17 = vpop.eup %3875 }
 0x168   : > { %v508_v19 = vmul.f32 %v3876_v17, %v507_v16  ;;  %v3878_v20 = vpop.eup %3877 }
 0x169   : > { %v652_v22 = vsub.f32 1.0, %v3878_v20  ;;  %v654_v24 = vmul.f32 %v3878_v20, %v4337_v10 }
 0x16a   : > { %v4391_v21 = vadd.f32 %v509_v18, %v508_v19  ;;  %v3130_v18 = vunpack.c.l.bf16 %v3208_v15 }
 0x16c   : > { %656 = vst.msk [vmem:[%s4393_s24] sm:$0xff] %vm291_vm1, %v4391_v21  ;;  %v671_v23 = vpack.c.bf16 %v4391_v21, %v4391_v21 }
 0x16e   : > { %3424 = vmatmul.mubr.msk.bf16.vlgmr.msra.gmra.mrb[12].mxu0 %vm291_vm1, %v671_v23  ;;  %3432 = vmatmul.mubr.msk.bf16.vlgmr.msra.gmra.mrb[12].mxu1 %vm291_vm1, %v671_v23 }
 0x16f   : > { %v3880_v6 = vpop.eup %3879  ;;  %3444 = vmatpush3.bf16.msra.mxu1 %v4306_v2  ;;  %3436 = vmatpush3.bf16.msra.mxu0 %v4327_v7 }
 0x170   : > { %v653_v25 = vmul.f32 %v3880_v6, %v652_v22  ;;  %3445 = vmatprep.subr.bf16.mxu1 %v4125_v0  ;;  %3437 = vmatprep.subr.bf16.mxu0 %v4125_v0 }
 0x171   : > { %3439 = vmatprep.mubr.msk.bf16.mxu0 %vm4126_vm0, %v4125_v0  ;;  %3447 = vmatprep.mubr.msk.bf16.mxu1 %vm4126_vm0, %v4125_v0 }
 0x172   : > { %v4411_v26 = vadd.f32 %v654_v24, %v653_v25  ;;  %v3131_v25 = vunpack.c.h.bf16 %v3208_v15 }
 0x173   : > { %3446 = vmatpush3.bf16.msra.mxu1 %v4313_v4  ;;  %3438 = vmatpush3.bf16.msra.mxu0 %v4335_v9 }
 0x174   : > { %657 = vst.msk [vmem:[%s4393_s24 + $0x8] sm:$0xff] %vm291_vm1, %v4411_v26  ;;  %v816_v10 = vpack.c.bf16 %v4411_v26, %v4411_v26  ;;  %3451 = vmatprep.subr.bf16.mxu0 %v4125_v0  ;;  %3459 = vmatprep.subr.bf16.mxu1 %v4125_v0 }
 0x176   : > { %3440 = vmatmul.mubr.msk.bf16.vlgmr.msra.gmra.mrb[16].mxu0 %vm291_vm1, %v671_v23  ;;  %3448 = vmatmul.mubr.msk.bf16.vlgmr.msra.gmra.mrb[16].mxu1 %vm291_vm1, %v816_v10 }
 0x177   : > { %3452 = vmatpush3.bf16.msra.mxu0 %v4304_v1  ;;  %3460 = vmatpush3.bf16.msra.mxu1 %v4327_v7 }
 0x178   : > { %3453 = vmatprep.subr.bf16.mxu0 %v4125_v0  ;;  %3461 = vmatprep.subr.bf16.mxu1 %v4125_v0 }
 0x179   : > { %3455 = vmatprep.mubr.msk.bf16.mxu0 %vm4126_vm0, %v4125_v0  ;;  %3463 = vmatprep.mubr.msk.bf16.mxu1 %vm4126_vm0, %v4125_v0 }
 0x17b   : > { %3454 = vmatpush3.bf16.msra.mxu0 %v4309_v3  ;;  %3462 = vmatpush3.bf16.msra.mxu1 %v4335_v9 }
 0x17c   : > { %3467 = vmatprep.subr.bf16.mxu0 %v4125_v0  ;;  %3475 = vmatprep.subr.bf16.mxu1 %v4125_v0 }
 0x17e   : > { %3456 = vmatmul.mubr.msk.bf16.vlgmr.msra.gmra.mrb[20].mxu0 %vm291_vm1, %v816_v10  ;;  %3464 = vmatmul.mubr.msk.bf16.vlgmr.msra.gmra.mrb[20].mxu1 %vm291_vm1, %v816_v10 }
 0x17f   : > { %3468 = vmatpush3.bf16.msra.mxu0 %v4306_v2  ;;  %3476 = vmatpush3.bf16.msra.mxu1 %v4304_v1 }
 0x180   : > { %3469 = vmatprep.subr.bf16.mxu0 %v4125_v0  ;;  %3477 = vmatprep.subr.bf16.mxu1 %v4125_v0 }
 0x181   : > { %3471 = vmatprep.mubr.msk.bf16.mxu0 %vm4126_vm0, %v4125_v0  ;;  %3479 = vmatprep.mubr.msk.bf16.mxu1 %vm4126_vm0, %v4125_v0 }
 0x183   : > { %3470 = vmatpush3.bf16.msra.mxu0 %v4313_v4  ;;  %3478 = vmatpush3.bf16.msra.mxu1 %v4309_v3 }
 0x184   : > { %3491 = vmatprep.subr.bf16.mxu1 %v4125_v0  ;;  %3483 = vmatprep.subr.bf16.mxu0 %v4125_v0 }
 0x241   : > { %v709_v30 = vpop.f32.mrb[12].mxu0  ;;  %v749_v32 = vpop.f32.mrb[12].mxu1 }
 0x242   : > { %v755_v33 = vadd.f32 %v3122_v28, %v709_v30  ;;  %v3425_v34 = vpop.f32.mrb[13].mxu0  ;;  %v3433_v35 = vpop.f32.mrb[13].mxu1  ;;  %v762_v41 = vadd.f32 %v3126_v31, %v749_v32 }
 0x243   : > { %v712_v36 = vpop.f32.mrb[14].mxu0  ;;  %v752_v37 = vpop.f32.mrb[14].mxu1 }
 0x244   : > { %v2983_v38 = vmul.f32 -1.442695, %v755_v33  ;;  %v3426_v39 = vpop.f32.mrb[15].mxu0  ;;  %v3434_v40 = vpop.f32.mrb[15].mxu1  ;;  %v2984_v43 = vmul.f32 -1.442695, %v762_v41 }
 0x246   : > { %3881 = vpow2.f32 %v2983_v38 }
 0x247   : > { %3883 = vpow2.f32 %v2984_v43 }
 0x249   : > { %v803_v44 = vpop.f32.mrb[16].mxu0  ;;  %v854_v45 = vpop.f32.mrb[16].mxu1 }
 0x24a   : > { %v900_v46 = vadd.f32 %v3123_v42, %v854_v45  ;;  %v3441_v47 = vpop.f32.mrb[17].mxu0  ;;  %v3449_v48 = vpop.f32.mrb[17].mxu1  ;;  %v804_v19 = vadd.f32 %v4384_v55, %v803_v44  ;;  %v3209_v42 = vld [vmem:[%s4288_s7 + $0x30] sm:$0xff]   ;;  %v3210_v44 = vld [vmem:[%s4288_s7 + $0x38] sm:$0xff]  }
 0x24b   : > { %v806_v49 = vpop.f32.mrb[18].mxu0  ;;  %v857_v50 = vpop.f32.mrb[18].mxu1  ;;  %v3134_v43 = vunpack.c.l.bf16 %v3209_v42  ;;  %v3139_v15 = vunpack.c.h.bf16 %v3210_v44 }
 0x24c   : > { %v2988_v51 = vmul.f32 -1.442695, %v900_v46  ;;  %v3442_v52 = vpop.f32.mrb[19].mxu0  ;;  %v3450_v53 = vpop.f32.mrb[19].mxu1  ;;  %v3138_v46 = vunpack.c.l.bf16 %v3210_v44 }
 0x24e   : > { %3885 = vpow2.f32 %v2988_v51 }
 0x250   : > { %v3882_v56 = vpop.eup %3881 }
 0x251   : > { %v759_v57 = vadd.f32 1.0, %v3882_v56  ;;  %v894_v58 = vpop.f32.mrb[20].mxu0  ;;  %v948_v59 = vpop.f32.mrb[20].mxu1 }
 0x252   : > { %v907_v60 = vadd.f32 %v3127_v54, %v894_v58  ;;  %v3457_v61 = vpop.f32.mrb[21].mxu0  ;;  %v3465_v62 = vpop.f32.mrb[21].mxu1  ;;  %v949_v10 = vadd.f32 %v4384_v55, %v948_v59  ;;  %v3135_v58 = vunpack.c.h.bf16 %v3209_v42 }
 0x253   : > { %3887 = vrcp.f32 %v759_v57  ;;  %v897_v63 = vpop.f32.mrb[22].mxu0  ;;  %v951_v5 = vpop.f32.mrb[22].mxu1 }
 0x254   : > { %v2989_v8 = vmul.f32 -1.442695, %v907_v60  ;;  %v3458_v11 = vpop.f32.mrb[23].mxu0  ;;  %v3466_v12 = vpop.f32.mrb[23].mxu1 }
 0x255   : > { %v3884_v13 = vpop.eup %3883 }
 0x256   : > { %3889 = vpow2.f32 %v2989_v8  ;;  %v766_v17 = vadd.f32 1.0, %v3884_v13 }
 0x258   : > { %v3886_v14 = vpop.eup %3885 }
 0x259   : > { %v904_v16 = vadd.f32 1.0, %v3886_v14 }
 0x25b   : > { %3891 = vrcp.f32 %v904_v16 }
 0x25c   : > { %3893 = vrcp.f32 %v766_v17 }
 0x25d   : > { %v3888_v20 = vpop.eup %3887 }
 0x25e   : > { %v809_v22 = vmul.f32 %v3888_v20, %v804_v19 }
 0x260   : > { %v3890_v23 = vpop.eup %3889  ;;  %v810_v6 = vadd.f32 %v3130_v18, %v809_v22 }
 0x261   : > { %v911_v24 = vadd.f32 1.0, %v3890_v23 }
 0x262   : > { %3895 = vtanh.f32 %v810_v6 }
 0x263   : > { %3897 = vrcp.f32 %v911_v24 }
 0x265   : > { %v3892_v27 = vpop.eup %3891 }
 0x266   : > { %v954_v28 = vmul.f32 %v3892_v27, %v949_v10  ;;  %v3894_v29 = vpop.eup %3893 }
 0x267   : > { %v812_v31 = vsub.f32 1.0, %v3894_v29  ;;  %v814_v33 = vmul.f32 %v3894_v29, %v4391_v21 }
 0x268   : > { %v955_v30 = vadd.f32 %v3131_v25, %v954_v28 }
 0x26a   : > { %3899 = vtanh.f32 %v955_v30  ;;  %v3211_v30 = vld [vmem:[%s4288_s7 + $0x40] sm:$0xff]  }
 0x26c   : > { %v3896_v32 = vpop.eup %3895 }
 0x26d   : > { %v813_v34 = vmul.f32 %v3896_v32, %v812_v31  ;;  %v3898_v36 = vpop.eup %3897 }
 0x26e   : > { %v957_v38 = vsub.f32 1.0, %v3898_v36  ;;  %v959_v21 = vmul.f32 %v3898_v36, %v4411_v26 }
 0x26f   : > { %v4456_v35 = vadd.f32 %v814_v33, %v813_v34  ;;  %v3142_v33 = vunpack.c.l.bf16 %v3211_v30 }
 0x271   : > { %2991 = vst.msk [vmem:[%s4393_s24 + $0x10] sm:$0xff] %vm291_vm1, %v4456_v35  ;;  %v977_v37 = vpack.c.bf16 %v4456_v35, %v4456_v35 }
 0x273   : > { %3472 = vmatmul.mubr.msk.bf16.vlgmr.msra.gmra.mrb[24].mxu0 %vm291_vm1, %v977_v37  ;;  %3480 = vmatmul.mubr.msk.bf16.vlgmr.msra.gmra.mrb[24].mxu1 %vm291_vm1, %v977_v37 }
 0x274   : > { %v3900_v39 = vpop.eup %3899  ;;  %3492 = vmatpush3.bf16.msra.mxu1 %v4306_v2  ;;  %3484 = vmatpush3.bf16.msra.mxu0 %v4327_v7 }
 0x275   : > { %v958_v40 = vmul.f32 %v3900_v39, %v957_v38  ;;  %3493 = vmatprep.subr.bf16.mxu1 %v4125_v0  ;;  %3485 = vmatprep.subr.bf16.mxu0 %v4125_v0 }
 0x276   : > { %3487 = vmatprep.mubr.msk.bf16.mxu0 %vm4126_vm0, %v4125_v0  ;;  %3495 = vmatprep.mubr.msk.bf16.mxu1 %vm4126_vm0, %v4125_v0 }
 0x277   : > { %v4474_v41 = vadd.f32 %v959_v21, %v958_v40  ;;  %v3143_v40 = vunpack.c.h.bf16 %v3211_v30 }
 0x278   : > { %3494 = vmatpush3.bf16.msra.mxu1 %v4313_v4  ;;  %3486 = vmatpush3.bf16.msra.mxu0 %v4335_v9 }
 0x279   : > { %2992 = vst.msk [vmem:[%s4393_s24 + $0x18] sm:$0xff] %vm291_vm1, %v4474_v41  ;;  %v1122_v26 = vpack.c.bf16 %v4474_v41, %v4474_v41  ;;  %3499 = vmatprep.subr.bf16.mxu0 %v4125_v0  ;;  %3507 = vmatprep.subr.bf16.mxu1 %v4125_v0 }
 0x27b   : > { %3488 = vmatmul.mubr.msk.bf16.vlgmr.msra.gmra.mrb[28].mxu0 %vm291_vm1, %v977_v37  ;;  %3496 = vmatmul.mubr.msk.bf16.vlgmr.msra.gmra.mrb[28].mxu1 %vm291_vm1, %v1122_v26 }
 0x27c   : > { %3500 = vmatpush3.bf16.msra.mxu0 %v4304_v1  ;;  %3508 = vmatpush3.bf16.msra.mxu1 %v4327_v7 }
 0x27d   : > { %3501 = vmatprep.subr.bf16.mxu0 %v4125_v0  ;;  %3509 = vmatprep.subr.bf16.mxu1 %v4125_v0 }
 0x27e   : > { %3503 = vmatprep.mubr.msk.bf16.mxu0 %vm4126_vm0, %v4125_v0  ;;  %3511 = vmatprep.mubr.msk.bf16.mxu1 %vm4126_vm0, %v4125_v0 }
 0x280   : > { %3502 = vmatpush3.bf16.msra.mxu0 %v4309_v3  ;;  %3510 = vmatpush3.bf16.msra.mxu1 %v4335_v9 }
 0x281   : > { %3515 = vmatprep.subr.bf16.mxu0 %v4125_v0  ;;  %3523 = vmatprep.subr.bf16.mxu1 %v4125_v0 }
 0x283   : > { %3504 = vmatmul.mubr.msk.bf16.vlgmr.msra.gmra.mrb[32].mxu0 %vm291_vm1, %v1122_v26  ;;  %3512 = vmatmul.mubr.msk.bf16.vlgmr.msra.gmra.mrb[32].mxu1 %vm291_vm1, %v1122_v26 }
 0x284   : > { %3516 = vmatpush3.bf16.msra.mxu0 %v4306_v2  ;;  %3524 = vmatpush3.bf16.msra.mxu1 %v4304_v1 }
 0x285   : > { %3517 = vmatprep.subr.bf16.mxu0 %v4125_v0  ;;  %3525 = vmatprep.subr.bf16.mxu1 %v4125_v0 }
 0x286   : > { %3519 = vmatprep.mubr.msk.bf16.mxu0 %vm4126_vm0, %v4125_v0  ;;  %3527 = vmatprep.mubr.msk.bf16.mxu1 %vm4126_vm0, %v4125_v0 }
 0x288   : > { %3518 = vmatpush3.bf16.msra.mxu0 %v4313_v4  ;;  %3526 = vmatpush3.bf16.msra.mxu1 %v4309_v3 }
 0x289   : > { %3539 = vmatprep.subr.bf16.mxu1 %v4125_v0  ;;  %3531 = vmatprep.subr.bf16.mxu0 %v4125_v0 }
 0x346   : > { %v1015_v45 = vpop.f32.mrb[24].mxu0  ;;  %v1055_v47 = vpop.f32.mrb[24].mxu1 }
 0x347   : > { %v1061_v48 = vadd.f32 %v3134_v43, %v1015_v45  ;;  %v3473_v49 = vpop.f32.mrb[25].mxu0  ;;  %v3481_v50 = vpop.f32.mrb[25].mxu1  ;;  %v1068_v57 = vadd.f32 %v3138_v46, %v1055_v47 }
 0x348   : > { %v1018_v51 = vpop.f32.mrb[26].mxu0  ;;  %v1058_v52 = vpop.f32.mrb[26].mxu1 }
 0x349   : > { %v3001_v53 = vmul.f32 -1.442695, %v1061_v48  ;;  %v3474_v54 = vpop.f32.mrb[27].mxu0  ;;  %v3482_v56 = vpop.f32.mrb[27].mxu1  ;;  %v3002_v59 = vmul.f32 -1.442695, %v1068_v57 }
 0x34b   : > { %3901 = vpow2.f32 %v3001_v53 }
 0x34c   : > { %3903 = vpow2.f32 %v3002_v59  ;;  %v3213_v59 = vld [vmem:[%s4288_s7 + $0x50] sm:$0xff]  }
 0x34e   : > { %v1109_v60 = vpop.f32.mrb[28].mxu0  ;;  %v1160_v61 = vpop.f32.mrb[28].mxu1 }
 0x34f   : > { %v1206_v62 = vadd.f32 %v3135_v58, %v1160_v61  ;;  %v3489_v63 = vpop.f32.mrb[29].mxu0  ;;  %v3497_v5 = vpop.f32.mrb[29].mxu1  ;;  %v1110_v34 = vadd.f32 %v4384_v55, %v1109_v60  ;;  %v3212_v58 = vld [vmem:[%s4288_s7 + $0x48] sm:$0xff]   ;;  %v3150_v61 = vunpack.c.l.bf16 %v3213_v59 }
 0x350   : > { %v1112_v8 = vpop.f32.mrb[30].mxu0  ;;  %v1163_v11 = vpop.f32.mrb[30].mxu1 }
 0x351   : > { %v3006_v12 = vmul.f32 -1.442695, %v1206_v62  ;;  %v3490_v13 = vpop.f32.mrb[31].mxu0  ;;  %v3498_v14 = vpop.f32.mrb[31].mxu1 }
 0x353   : > { %3905 = vpow2.f32 %v3006_v12 }
 0x355   : > { %v3902_v16 = vpop.eup %3901 }
 0x356   : > { %v1065_v17 = vadd.f32 1.0, %v3902_v16  ;;  %v1200_v18 = vpop.f32.mrb[32].mxu0  ;;  %v1254_v19 = vpop.f32.mrb[32].mxu1 }
 0x357   : > { %v1213_v20 = vadd.f32 %v3139_v15, %v1200_v18  ;;  %v3505_v22 = vpop.f32.mrb[33].mxu0  ;;  %v3513_v23 = vpop.f32.mrb[33].mxu1  ;;  %v1255_v26 = vadd.f32 %v4384_v55, %v1254_v19 }
 0x358   : > { %3907 = vrcp.f32 %v1065_v17  ;;  %v1203_v6 = vpop.f32.mrb[34].mxu0  ;;  %v1257_v24 = vpop.f32.mrb[34].mxu1 }
 0x359   : > { %v3007_v25 = vmul.f32 -1.442695, %v1213_v20  ;;  %v3506_v10 = vpop.f32.mrb[35].mxu0  ;;  %v3514_v27 = vpop.f32.mrb[35].mxu1 }
 0x35a   : > { %v3904_v28 = vpop.eup %3903 }
 0x35b   : > { %3909 = vpow2.f32 %v3007_v25  ;;  %v1072_v32 = vadd.f32 1.0, %v3904_v28  ;;  %v3151_v28 = vunpack.c.h.bf16 %v3213_v59 }
 0x35d   : > { %v3906_v29 = vpop.eup %3905 }
 0x35e   : > { %v1210_v31 = vadd.f32 1.0, %v3906_v29 }
 0x360   : > { %3911 = vrcp.f32 %v1210_v31 }
 0x361   : > { %3913 = vrcp.f32 %v1072_v32 }
 0x362   : > { %v3908_v36 = vpop.eup %3907 }
 0x363   : > { %v1115_v37 = vmul.f32 %v3908_v36, %v1110_v34 }
 0x365   : > { %v3910_v38 = vpop.eup %3909  ;;  %v1116_v39 = vadd.f32 %v3142_v33, %v1115_v37 }
 0x366   : > { %v1217_v21 = vadd.f32 1.0, %v3910_v38 }
 0x367   : > { %3915 = vtanh.f32 %v1116_v39 }
 0x368   : > { %3917 = vrcp.f32 %v1217_v21 }
 0x36a   : > { %v3912_v42 = vpop.eup %3911 }
 0x36b   : > { %v1260_v43 = vmul.f32 %v3912_v42, %v1255_v26  ;;  %v3914_v44 = vpop.eup %3913 }
 0x36c   : > { %v1118_v46 = vsub.f32 1.0, %v3914_v44  ;;  %v1120_v48 = vmul.f32 %v3914_v44, %v4456_v35 }
 0x36d   : > { %v1261_v45 = vadd.f32 %v3143_v40, %v1260_v43  ;;  %v3214_v43 = vld [vmem:[%s4288_s7 + $0x58] sm:$0xff]  }
 0x36f   : > { %3919 = vtanh.f32 %v1261_v45 }
 0x371   : > { %v3916_v47 = vpop.eup %3915 }
 0x372   : > { %v1119_v49 = vmul.f32 %v3916_v47, %v1118_v46  ;;  %v3918_v51 = vpop.eup %3917  ;;  %v3154_v46 = vunpack.c.l.bf16 %v3214_v43 }
 0x373   : > { %v1263_v53 = vsub.f32 1.0, %v3918_v51  ;;  %v1265_v35 = vmul.f32 %v3918_v51, %v4474_v41 }
 0x374   : > { %v4519_v50 = vadd.f32 %v1120_v48, %v1119_v49 }
 0x376   : > { %3009 = vst.msk [vmem:[%s4393_s24 + $0x20] sm:$0xff] %vm291_vm1, %v4519_v50  ;;  %v1283_v52 = vpack.c.bf16 %v4519_v50, %v4519_v50 }
 0x378   : > { %3520 = vmatmul.mubr.msk.bf16.vlgmr.msra.gmra.mrb[36].mxu0 %vm291_vm1, %v1283_v52  ;;  %3528 = vmatmul.mubr.msk.bf16.vlgmr.msra.gmra.mrb[36].mxu1 %vm291_vm1, %v1283_v52 }
 0x379   : > { %v3920_v54 = vpop.eup %3919  ;;  %3540 = vmatpush3.bf16.msra.mxu1 %v4306_v2  ;;  %3532 = vmatpush3.bf16.msra.mxu0 %v4327_v7 }
 0x37a   : > { %v1264_v56 = vmul.f32 %v3920_v54, %v1263_v53  ;;  %3541 = vmatprep.subr.bf16.mxu1 %v4125_v0  ;;  %3533 = vmatprep.subr.bf16.mxu0 %v4125_v0  ;;  %v3155_v54 = vunpack.c.h.bf16 %v3214_v43 }
 0x37b   : > { %3535 = vmatprep.mubr.msk.bf16.mxu0 %vm4126_vm0, %v4125_v0  ;;  %3543 = vmatprep.mubr.msk.bf16.mxu1 %vm4126_vm0, %v4125_v0 }
 0x37c   : > { %v4537_v57 = vadd.f32 %v1265_v35, %v1264_v56 }
 0x37d   : > { %3542 = vmatpush3.bf16.msra.mxu1 %v4313_v4  ;;  %3534 = vmatpush3.bf16.msra.mxu0 %v4335_v9 }
 0x37e   : > { %3010 = vst.msk [vmem:[%s4393_s24 + $0x28] sm:$0xff] %vm291_vm1, %v4537_v57  ;;  %v1428_v41 = vpack.c.bf16 %v4537_v57, %v4537_v57  ;;  %3547 = vmatprep.subr.bf16.mxu0 %v4125_v0  ;;  %3555 = vmatprep.subr.bf16.mxu1 %v4125_v0 }
 0x380   : > { %3536 = vmatmul.mubr.msk.bf16.vlgmr.msra.gmra.mrb[40].mxu0 %vm291_vm1, %v1283_v52  ;;  %3544 = vmatmul.mubr.msk.bf16.vlgmr.msra.gmra.mrb[40].mxu1 %vm291_vm1, %v1428_v41 }
 0x381   : > { %3548 = vmatpush3.bf16.msra.mxu0 %v4304_v1  ;;  %3556 = vmatpush3.bf16.msra.mxu1 %v4327_v7 }
 0x382   : > { %3549 = vmatprep.subr.bf16.mxu0 %v4125_v0  ;;  %3557 = vmatprep.subr.bf16.mxu1 %v4125_v0 }
 0x383   : > { %3551 = vmatprep.mubr.msk.bf16.mxu0 %vm4126_vm0, %v4125_v0  ;;  %3559 = vmatprep.mubr.msk.bf16.mxu1 %vm4126_vm0, %v4125_v0 }
 0x385   : > { %3550 = vmatpush3.bf16.msra.mxu0 %v4309_v3  ;;  %3558 = vmatpush3.bf16.msra.mxu1 %v4335_v9 }
 0x386   : > { %3563 = vmatprep.subr.bf16.mxu0 %v4125_v0  ;;  %3571 = vmatprep.subr.bf16.mxu1 %v4125_v0 }
 0x388   : > { %3552 = vmatmul.mubr.msk.bf16.vlgmr.msra.gmra.mrb[44].mxu0 %vm291_vm1, %v1428_v41  ;;  %3560 = vmatmul.mubr.msk.bf16.vlgmr.msra.gmra.mrb[44].mxu1 %vm291_vm1, %v1428_v41 }
 0x389   : > { %3564 = vmatpush3.bf16.msra.mxu0 %v4306_v2  ;;  %3572 = vmatpush3.bf16.msra.mxu1 %v4304_v1  ;;  %v3146_v1 = vunpack.c.l.bf16 %v3212_v58 }
 0x38a   : > { %3565 = vmatprep.subr.bf16.mxu0 %v4125_v0  ;;  %3573 = vmatprep.subr.bf16.mxu1 %v4125_v0 }
 0x38b   : > { %3567 = vmatprep.mubr.msk.bf16.mxu0 %vm4126_vm0, %v4125_v0  ;;  %3575 = vmatprep.mubr.msk.bf16.mxu1 %vm4126_vm0, %v4125_v0 }
 0x38d   : > { %3566 = vmatpush3.bf16.msra.mxu0 %v4313_v4  ;;  %3574 = vmatpush3.bf16.msra.mxu1 %v4309_v3  ;;  %v3147_v3 = vunpack.c.h.bf16 %v3212_v58 }
 0x38e   : > { %3587 = vmatprep.subr.bf16.mxu1 %v4125_v0  ;;  %3579 = vmatprep.subr.bf16.mxu0 %v4125_v0 }
 0x44b   : > { %v1321_v60 = vpop.f32.mrb[36].mxu0  ;;  %v1361_v62 = vpop.f32.mrb[36].mxu1 }
 0x44c   : > { %v1367_v63 = vadd.f32 %v3146_v1, %v1321_v60  ;;  %v3521_v5 = vpop.f32.mrb[37].mxu0  ;;  %v3529_v8 = vpop.f32.mrb[37].mxu1  ;;  %v1374_v16 = vadd.f32 %v3150_v61, %v1361_v62 }
 0x44d   : > { %v1324_v11 = vpop.f32.mrb[38].mxu0  ;;  %v1364_v12 = vpop.f32.mrb[38].mxu1 }
 0x44e   : > { %v3019_v13 = vmul.f32 -1.442695, %v1367_v63  ;;  %v3522_v14 = vpop.f32.mrb[39].mxu0  ;;  %v3530_v15 = vpop.f32.mrb[39].mxu1  ;;  %v3020_v17 = vmul.f32 -1.442695, %v1374_v16 }
 0x44f   : > { %v3215_v15 = vld [vmem:[%s4288_s7 + $0x60] sm:$0xff]  }
 0x450   : > { %3921 = vpow2.f32 %v3019_v13  ;;  %v3158_v16 = vunpack.c.l.bf16 %v3215_v15 }
 0x451   : > { %3923 = vpow2.f32 %v3020_v17 }
 0x453   : > { %v1415_v18 = vpop.f32.mrb[40].mxu0  ;;  %v1466_v19 = vpop.f32.mrb[40].mxu1 }
 0x454   : > { %v1512_v20 = vadd.f32 %v3147_v3, %v1466_v19  ;;  %v3537_v22 = vpop.f32.mrb[41].mxu0  ;;  %v3545_v23 = vpop.f32.mrb[41].mxu1  ;;  %v1416_v47 = vadd.f32 %v4384_v55, %v1415_v18  ;;  %v3216_v3 = vld [vmem:[%s4288_s7 + $0x68] sm:$0xff]  }
 0x455   : > { %v1418_v6 = vpop.f32.mrb[42].mxu0  ;;  %v1469_v24 = vpop.f32.mrb[42].mxu1  ;;  %v3162_v18 = vunpack.c.l.bf16 %v3216_v3 }
 0x456   : > { %v3024_v25 = vmul.f32 -1.442695, %v1512_v20  ;;  %v3538_v10 = vpop.f32.mrb[43].mxu0  ;;  %v3546_v27 = vpop.f32.mrb[43].mxu1 }
 0x458   : > { %3925 = vpow2.f32 %v3024_v25 }
 0x45a   : > { %v3922_v29 = vpop.eup %3921 }
 0x45b   : > { %v1371_v30 = vadd.f32 1.0, %v3922_v29  ;;  %v1506_v31 = vpop.f32.mrb[44].mxu0  ;;  %v1560_v32 = vpop.f32.mrb[44].mxu1  ;;  %v3159_v29 = vunpack.c.h.bf16 %v3215_v15 }
 0x45c   : > { %v1519_v33 = vadd.f32 %v3151_v28, %v1506_v31  ;;  %v3553_v34 = vpop.f32.mrb[45].mxu0  ;;  %v3561_v36 = vpop.f32.mrb[45].mxu1  ;;  %v1561_v35 = vadd.f32 %v4384_v55, %v1560_v32 }
 0x45d   : > { %3927 = vrcp.f32 %v1371_v30  ;;  %v1509_v37 = vpop.f32.mrb[46].mxu0  ;;  %v1563_v38 = vpop.f32.mrb[46].mxu1 }
 0x45e   : > { %v3025_v39 = vmul.f32 -1.442695, %v1519_v33  ;;  %v3554_v21 = vpop.f32.mrb[47].mxu0  ;;  %v3562_v40 = vpop.f32.mrb[47].mxu1 }
 0x45f   : > { %v3924_v26 = vpop.eup %3923 }
 0x460   : > { %3929 = vpow2.f32 %v3025_v39  ;;  %v1378_v45 = vadd.f32 1.0, %v3924_v26  ;;  %v3163_v26 = vunpack.c.h.bf16 %v3216_v3 }
 0x462   : > { %v3926_v42 = vpop.eup %3925 }
 0x463   : > { %v1516_v44 = vadd.f32 1.0, %v3926_v42 }
 0x465   : > { %3931 = vrcp.f32 %v1516_v44 }
 0x466   : > { %3933 = vrcp.f32 %v1378_v45 }
 0x467   : > { %v3928_v48 = vpop.eup %3927 }
 0x468   : > { %v1421_v49 = vmul.f32 %v3928_v48, %v1416_v47 }
 0x46a   : > { %v3930_v51 = vpop.eup %3929  ;;  %v1422_v52 = vadd.f32 %v3154_v46, %v1421_v49 }
 0x46b   : > { %v1523_v53 = vadd.f32 1.0, %v3930_v51 }
 0x46c   : > { %3935 = vtanh.f32 %v1422_v52 }
 0x46d   : > { %3937 = vrcp.f32 %v1523_v53 }
 0x46f   : > { %v3932_v56 = vpop.eup %3931 }
 0x470   : > { %v1566_v41 = vmul.f32 %v3932_v56, %v1561_v35  ;;  %v3934_v58 = vpop.eup %3933 }
 0x471   : > { %v1424_v59 = vsub.f32 1.0, %v3934_v58  ;;  %v1426_v61 = vmul.f32 %v3934_v58, %v4519_v50 }
 0x472   : > { %v1567_v1 = vadd.f32 %v3155_v54, %v1566_v41  ;;  %v3217_v41 = vld [vmem:[%s4288_s7 + $0x70] sm:$0xff]  }
 0x474   : > { %3939 = vtanh.f32 %v1567_v1 }
 0x476   : > { %v3936_v60 = vpop.eup %3935 }
 0x477   : > { %v1425_v62 = vmul.f32 %v3936_v60, %v1424_v59  ;;  %v3938_v5 = vpop.eup %3937  ;;  %v3166_v59 = vunpack.c.l.bf16 %v3217_v41 }
 0x478   : > { %v1569_v11 = vsub.f32 1.0, %v3938_v5  ;;  %v1571_v50 = vmul.f32 %v3938_v5, %v4537_v57  ;;  %v4613_v57 = vld [vmem:[#allocation6 + $0x10] sm:$0xff]  }
 0x479   : > { %v4582_v63 = vadd.f32 %v1426_v61, %v1425_v62 }
 0x47b   : > { %3027 = vst.msk [vmem:[%s4393_s24 + $0x30] sm:$0xff] %vm291_vm1, %v4582_v63  ;;  %v1589_v8 = vpack.c.bf16 %v4582_v63, %v4582_v63 }
 0x47d   : > { %3568 = vmatmul.mubr.msk.bf16.vlgmr.msra.gmra.mrb[48].mxu0 %vm291_vm1, %v1589_v8  ;;  %3576 = vmatmul.mubr.msk.bf16.vlgmr.msra.gmra.mrb[48].mxu1 %vm291_vm1, %v1589_v8 }
 0x47e   : > { %v3940_v12 = vpop.eup %3939  ;;  %3588 = vmatpush3.bf16.msra.mxu1 %v4306_v2  ;;  %3580 = vmatpush3.bf16.msra.mxu0 %v4327_v7 }
 0x47f   : > { %v1570_v13 = vmul.f32 %v3940_v12, %v1569_v11  ;;  %3589 = vmatprep.subr.bf16.mxu1 %v4125_v0  ;;  %3581 = vmatprep.subr.bf16.mxu0 %v4125_v0  ;;  %v3167_v12 = vunpack.c.h.bf16 %v3217_v41 }
 0x480   : > { %3583 = vmatprep.mubr.msk.bf16.mxu0 %vm4126_vm0, %v4125_v0  ;;  %3591 = vmatprep.mubr.msk.bf16.mxu1 %vm4126_vm0, %v4125_v0 }
 0x481   : > { %v4600_v14 = vadd.f32 %v1571_v50, %v1570_v13 }
 0x482   : > { %3590 = vmatpush3.bf16.msra.mxu1 %v4313_v4  ;;  %3582 = vmatpush3.bf16.msra.mxu0 %v4335_v9  ;;  %v4623_v4 = vld [vmem:[#allocation6 + $0x18] sm:$0xff]  }
 0x483   : > { %3028 = vst.msk [vmem:[%s4393_s24 + $0x38] sm:$0xff] %vm291_vm1, %v4600_v14  ;;  %v1734_v2 = vpack.c.bf16 %v4600_v14, %v4600_v14  ;;  %3595 = vmatprep.subr.bf16.mxu0 %v4125_v0  ;;  %3603 = vmatprep.subr.bf16.mxu1 %v4125_v0 }
 0x485   : > { %3584 = vmatmul.mubr.msk.bf16.vlgmr.msra.gmra.mrb[52].mxu0 %vm291_vm1, %v1589_v8  ;;  %3592 = vmatmul.mubr.msk.bf16.vlgmr.msra.gmra.mrb[52].mxu1 %vm291_vm1, %v1734_v2 }
 0x486   : > { %3596 = vmatpush3.bf16.msra.mxu0 %v4613_v57  ;;  %3604 = vmatpush3.bf16.msra.mxu1 %v4327_v7  ;;  %v4631_v7 = vld [vmem:[#allocation6] sm:$0xff]  }
 0x487   : > { %3597 = vmatprep.subr.bf16.mxu0 %v4125_v0  ;;  %3605 = vmatprep.subr.bf16.mxu1 %v4125_v0 }
 0x488   : > { %3599 = vmatprep.mubr.msk.bf16.mxu0 %vm4126_vm0, %v4125_v0  ;;  %3607 = vmatprep.mubr.msk.bf16.mxu1 %vm4126_vm0, %v4125_v0 }
 0x48a   : > { %3598 = vmatpush3.bf16.msra.mxu0 %v4623_v4  ;;  %3606 = vmatpush3.bf16.msra.mxu1 %v4335_v9  ;;  %v4641_v9 = vld [vmem:[#allocation6 + $0x8] sm:$0xff]  }
 0x48b   : > { %3611 = vmatprep.subr.bf16.mxu0 %v4125_v0  ;;  %3619 = vmatprep.subr.bf16.mxu1 %v4125_v0 }
 0x48d   : > { %3600 = vmatmul.mubr.msk.bf16.vlgmr.msra.gmra.mrb[56].mxu0 %vm291_vm1, %v1734_v2  ;;  %3608 = vmatmul.mubr.msk.bf16.vlgmr.msra.gmra.mrb[56].mxu1 %vm291_vm1, %v1734_v2 }
 0x48e   : > { %3612 = vmatpush3.bf16.msra.mxu0 %v4631_v7  ;;  %3620 = vmatpush3.bf16.msra.mxu1 %v4613_v57 }
 0x48f   : > { %3613 = vmatprep.subr.bf16.mxu0 %v4125_v0  ;;  %3621 = vmatprep.subr.bf16.mxu1 %v4125_v0 }
 0x490   : > { %3615 = vmatprep.mubr.msk.bf16.mxu0 %vm4126_vm0, %v4125_v0  ;;  %3623 = vmatprep.mubr.msk.bf16.mxu1 %vm4126_vm0, %v4125_v0 }
 0x492   : > { %3614 = vmatpush3.bf16.msra.mxu0 %v4641_v9  ;;  %3622 = vmatpush3.bf16.msra.mxu1 %v4623_v4 }
 0x493   : > { %3635 = vmatprep.subr.bf16.mxu1 %v4125_v0  ;;  %3627 = vmatprep.subr.bf16.mxu0 %v4125_v0 }
 0x550   : > { %v1627_v17 = vpop.f32.mrb[48].mxu0  ;;  %v1667_v19 = vpop.f32.mrb[48].mxu1 }
 0x551   : > { %v1673_v20 = vadd.f32 %v3158_v16, %v1627_v17  ;;  %v3569_v22 = vpop.f32.mrb[49].mxu0  ;;  %v3577_v23 = vpop.f32.mrb[49].mxu1  ;;  %v1680_v28 = vadd.f32 %v3162_v18, %v1667_v19 }
 0x552   : > { %v1630_v6 = vpop.f32.mrb[50].mxu0  ;;  %v1670_v24 = vpop.f32.mrb[50].mxu1 }
 0x553   : > { %v3037_v25 = vmul.f32 -1.442695, %v1673_v20  ;;  %v3570_v10 = vpop.f32.mrb[51].mxu0  ;;  %v3578_v27 = vpop.f32.mrb[51].mxu1  ;;  %v3038_v30 = vmul.f32 -1.442695, %v1680_v28 }
 0x554   : > { %v4676_v27 = vld [vmem:[#allocation6 + $0x28] sm:$0xff]   ;;  %v3218_v28 = vld [vmem:[%s4288_s7 + $0x78] sm:$0xff]  }
 0x555   : > { %3941 = vpow2.f32 %v3037_v25 }
 0x556   : > { %3943 = vpow2.f32 %v3038_v30  ;;  %v3219_v30 = vld [vmem:[%s4288_s7 + $0x80] sm:$0xff]  }
 0x558   : > { %v1721_v31 = vpop.f32.mrb[52].mxu0  ;;  %v1772_v32 = vpop.f32.mrb[52].mxu1 }
 0x559   : > { %v1818_v33 = vadd.f32 %v3159_v29, %v1772_v32  ;;  %v3585_v34 = vpop.f32.mrb[53].mxu0  ;;  %v3593_v36 = vpop.f32.mrb[53].mxu1  ;;  %v1722_v60 = vadd.f32 %v4384_v55, %v1721_v31  ;;  %v3170_v29 = vunpack.c.l.bf16 %v3218_v28  ;;  %v3174_v32 = vunpack.c.l.bf16 %v3219_v30 }
 0x55a   : > { %v1724_v37 = vpop.f32.mrb[54].mxu0  ;;  %v1775_v38 = vpop.f32.mrb[54].mxu1 }
 0x55b   : > { %v3042_v39 = vmul.f32 -1.442695, %v1818_v33  ;;  %v3586_v21 = vpop.f32.mrb[55].mxu0  ;;  %v3594_v40 = vpop.f32.mrb[55].mxu1 }
 0x55d   : > { %3945 = vpow2.f32 %v3042_v39 }
 0x55f   : > { %v3942_v42 = vpop.eup %3941 }
 0x560   : > { %v1677_v43 = vadd.f32 1.0, %v3942_v42  ;;  %v1812_v44 = vpop.f32.mrb[56].mxu0  ;;  %v1866_v45 = vpop.f32.mrb[56].mxu1 }
 0x561   : > { %v1825_v46 = vadd.f32 %v3163_v26, %v1812_v44  ;;  %v3601_v47 = vpop.f32.mrb[57].mxu0  ;;  %v3609_v48 = vpop.f32.mrb[57].mxu1  ;;  %v1867_v50 = vadd.f32 %v4384_v55, %v1866_v45 }
 0x562   : > { %3947 = vrcp.f32 %v1677_v43  ;;  %v1815_v49 = vpop.f32.mrb[58].mxu0  ;;  %v1869_v51 = vpop.f32.mrb[58].mxu1  ;;  %v3171_v43 = vunpack.c.h.bf16 %v3218_v28 }
 0x563   : > { %v3043_v52 = vmul.f32 -1.442695, %v1825_v46  ;;  %v3602_v53 = vpop.f32.mrb[59].mxu0  ;;  %v3610_v54 = vpop.f32.mrb[59].mxu1 }
 0x564   : > { %v3944_v35 = vpop.eup %3943 }
 0x565   : > { %3949 = vpow2.f32 %v3043_v52  ;;  %v1684_v1 = vadd.f32 1.0, %v3944_v35 }
 0x567   : > { %v3946_v56 = vpop.eup %3945 }
 0x568   : > { %v1822_v58 = vadd.f32 1.0, %v3946_v56  ;;  %v3175_v56 = vunpack.c.h.bf16 %v3219_v30 }
 0x56a   : > { %3951 = vrcp.f32 %v1822_v58 }
 0x56b   : > { %3953 = vrcp.f32 %v1684_v1 }
 0x56c   : > { %v3948_v61 = vpop.eup %3947 }
 0x56d   : > { %v1727_v62 = vmul.f32 %v3948_v61, %v1722_v60 }
 0x56f   : > { %v3950_v5 = vpop.eup %3949  ;;  %v1728_v8 = vadd.f32 %v3166_v59, %v1727_v62 }
 0x570   : > { %v1829_v11 = vadd.f32 1.0, %v3950_v5 }
 0x571   : > { %3955 = vtanh.f32 %v1728_v8 }
 0x572   : > { %3957 = vrcp.f32 %v1829_v11 }
 0x574   : > { %v3952_v13 = vpop.eup %3951 }
 0x575   : > { %v1872_v2 = vmul.f32 %v3952_v13, %v1867_v50  ;;  %v3954_v15 = vpop.eup %3953 }
 0x576   : > { %v1730_v3 = vsub.f32 1.0, %v3954_v15  ;;  %v1732_v18 = vmul.f32 %v3954_v15, %v4582_v63  ;;  %v4663_v63 = vld [vmem:[#allocation6 + $0x20] sm:$0xff]   ;;  %v3220_v15 = vld [vmem:[%s4288_s7 + $0x88] sm:$0xff]  }
 0x577   : > { %v1873_v16 = vadd.f32 %v3167_v12, %v1872_v2 }
 0x579   : > { %3959 = vtanh.f32 %v1873_v16 }
 0x57b   : > { %v3956_v17 = vpop.eup %3955 }
 0x57c   : > { %v1731_v19 = vmul.f32 %v3956_v17, %v1730_v3  ;;  %v3958_v22 = vpop.eup %3957  ;;  %v3178_v17 = vunpack.c.l.bf16 %v3220_v15 }
 0x57d   : > { %v1875_v23 = vsub.f32 1.0, %v3958_v22  ;;  %v1877_v24 = vmul.f32 %v3958_v22, %v4600_v14 }
 0x57e   : > { %v4653_v20 = vadd.f32 %v1732_v18, %v1731_v19  ;;  %v4720_v18 = vld [vmem:[%s4889_s2] ss:$0 sm:$0xff] }
 0x580   : > { %3045 = vst.msk [vmem:[%s4393_s24 + $0x40] sm:$0xff] %vm291_vm1, %v4653_v20  ;;  %v1895_v55 = vpack.c.bf16 %v4653_v20, %v4653_v20 }
 0x582   : > { %3616 = vmatmul.mubr.msk.bf16.vlgmr.msra.gmra.mrb[60].mxu0 %vm291_vm1, %v1895_v55  ;;  %3624 = vmatmul.mubr.msk.bf16.vlgmr.msra.gmra.mrb[60].mxu1 %vm291_vm1, %v1895_v55 }
 0x583   : > { %v3960_v6 = vpop.eup %3959  ;;  %3636 = vmatpush3.bf16.msra.mxu1 %v4631_v7  ;;  %3628 = vmatpush3.bf16.msra.mxu0 %v4663_v63 }
 0x584   : > { %v1876_v25 = vmul.f32 %v3960_v6, %v1875_v23  ;;  %3637 = vmatprep.subr.bf16.mxu1 %v4125_v0  ;;  %3629 = vmatprep.subr.bf16.mxu0 %v4125_v0 }
 0x585   : > { %3631 = vmatprep.mubr.msk.bf16.mxu0 %vm4126_vm0, %v4125_v0  ;;  %3639 = vmatprep.mubr.msk.bf16.mxu1 %vm4126_vm0, %v4125_v0 }
 0x586   : > { %v4673_v10 = vadd.f32 %v1877_v24, %v1876_v25  ;;  %v3179_v25 = vunpack.c.h.bf16 %v3220_v15 }
 0x587   : > { %3638 = vmatpush3.bf16.msra.mxu1 %v4641_v9  ;;  %3630 = vmatpush3.bf16.msra.mxu0 %v4676_v27 }
 0x588   : > { %3046 = vst.msk [vmem:[%s4393_s24 + $0x48] sm:$0xff] %vm291_vm1, %v4673_v10  ;;  %v2040_v14 = vpack.c.bf16 %v4673_v10, %v4673_v10  ;;  %3643 = vmatprep.subr.bf16.mxu0 %v4125_v0  ;;  %3651 = vmatprep.subr.bf16.mxu1 %v4125_v0 }
 0x58a   : > { %3632 = vmatmul.mubr.msk.bf16.vlgmr.msra.gmra.mrb[64].mxu0 %vm291_vm1, %v1895_v55  ;;  %3640 = vmatmul.mubr.msk.bf16.vlgmr.msra.gmra.mrb[64].mxu1 %vm291_vm1, %v2040_v14 }
 0x58b   : > { %3644 = vmatpush3.bf16.msra.mxu0 %v4613_v57  ;;  %3652 = vmatpush3.bf16.msra.mxu1 %v4663_v63 }
 0x58c   : > { %3645 = vmatprep.subr.bf16.mxu0 %v4125_v0  ;;  %3653 = vmatprep.subr.bf16.mxu1 %v4125_v0 }
 0x58d   : > { %3647 = vmatprep.mubr.msk.bf16.mxu0 %vm4126_vm0, %v4125_v0  ;;  %3655 = vmatprep.mubr.msk.bf16.mxu1 %vm4126_vm0, %v4125_v0 }
 0x58f   : > { %3646 = vmatpush3.bf16.msra.mxu0 %v4623_v4  ;;  %3654 = vmatpush3.bf16.msra.mxu1 %v4676_v27 }
 0x590   : > { %3659 = vmatprep.subr.bf16.mxu0 %v4125_v0  ;;  %3667 = vmatprep.subr.bf16.mxu1 %v4125_v0 }
 0x592   : > { %3648 = vmatmul.mubr.msk.bf16.vlgmr.msra.gmra.mrb[68].mxu0 %vm291_vm1, %v2040_v14  ;;  %3656 = vmatmul.mubr.msk.bf16.vlgmr.msra.gmra.mrb[68].mxu1 %vm291_vm1, %v2040_v14 }
 0x593   : > { %3660 = vmatpush3.bf16.msra.mxu0 %v4631_v7  ;;  %3668 = vmatpush3.bf16.msra.mxu1 %v4613_v57 }
 0x594   : > { %3661 = vmatprep.subr.bf16.mxu0 %v4125_v0  ;;  %3669 = vmatprep.subr.bf16.mxu1 %v4125_v0 }
 0x595   : > { %3663 = vmatprep.mubr.msk.bf16.mxu0 %vm4126_vm0, %v4125_v0  ;;  %3671 = vmatprep.mubr.msk.bf16.mxu1 %vm4126_vm0, %v4125_v0 }
 0x597   : > { %3662 = vmatpush3.bf16.msra.mxu0 %v4641_v9  ;;  %3670 = vmatpush3.bf16.msra.mxu1 %v4623_v4 }
 0x598   : > { %3683 = vmatprep.subr.bf16.mxu1 %v4125_v0  ;;  %3675 = vmatprep.subr.bf16.mxu0 %v4125_v0 }
 0x655   : > { %v1933_v31 = vpop.f32.mrb[60].mxu0  ;;  %v1973_v33 = vpop.f32.mrb[60].mxu1 }
 0x656   : > { %v1979_v34 = vadd.f32 %v3170_v29, %v1933_v31  ;;  %v3617_v36 = vpop.f32.mrb[61].mxu0  ;;  %v3625_v37 = vpop.f32.mrb[61].mxu1  ;;  %v1986_v42 = vadd.f32 %v3174_v32, %v1973_v33 }
 0x657   : > { %v1936_v38 = vpop.f32.mrb[62].mxu0  ;;  %v1976_v39 = vpop.f32.mrb[62].mxu1 }
 0x658   : > { %v3055_v21 = vmul.f32 -1.442695, %v1979_v34  ;;  %v3618_v40 = vpop.f32.mrb[63].mxu0  ;;  %v3626_v26 = vpop.f32.mrb[63].mxu1  ;;  %v3056_v44 = vmul.f32 -1.442695, %v1986_v42 }
 0x65a   : > { %3961 = vpow2.f32 %v3055_v21 }
 0x65b   : > { %3963 = vpow2.f32 %v3056_v44 }
 0x65d   : > { %v2027_v45 = vpop.f32.mrb[64].mxu0  ;;  %v2078_v46 = vpop.f32.mrb[64].mxu1 }
 0x65e   : > { %v2124_v47 = vadd.f32 %v3171_v43, %v2078_v46  ;;  %v3633_v48 = vpop.f32.mrb[65].mxu0  ;;  %v3641_v49 = vpop.f32.mrb[65].mxu1  ;;  %v2028_v19 = vadd.f32 %v4720_v18, %v2027_v45  ;;  %v3221_v43 = vld [vmem:[%s4288_s7 + $0x90] sm:$0xff]   ;;  %v3222_v45 = vld [vmem:[%s4288_s7 + $0x98] sm:$0xff]  }
 0x65f   : > { %v2030_v51 = vpop.f32.mrb[66].mxu0  ;;  %v2081_v52 = vpop.f32.mrb[66].mxu1  ;;  %v3182_v44 = vunpack.c.l.bf16 %v3221_v43  ;;  %v3187_v15 = vunpack.c.h.bf16 %v3222_v45 }
 0x660   : > { %v3060_v53 = vmul.f32 -1.442695, %v2124_v47  ;;  %v3634_v54 = vpop.f32.mrb[67].mxu0  ;;  %v3642_v35 = vpop.f32.mrb[67].mxu1  ;;  %v3186_v47 = vunpack.c.l.bf16 %v3222_v45 }
 0x662   : > { %3965 = vpow2.f32 %v3060_v53 }
 0x664   : > { %v3962_v41 = vpop.eup %3961 }
 0x665   : > { %v1983_v58 = vadd.f32 1.0, %v3962_v41  ;;  %v2118_v1 = vpop.f32.mrb[68].mxu0  ;;  %v2172_v59 = vpop.f32.mrb[68].mxu1 }
 0x666   : > { %v2131_v60 = vadd.f32 %v3175_v56, %v2118_v1  ;;  %v3649_v61 = vpop.f32.mrb[69].mxu0  ;;  %v3657_v62 = vpop.f32.mrb[69].mxu1  ;;  %v2173_v14 = vadd.f32 %v4720_v18, %v2172_v59  ;;  %v3183_v1 = vunpack.c.h.bf16 %v3221_v43 }
 0x667   : > { %3967 = vrcp.f32 %v1983_v58  ;;  %v2121_v5 = vpop.f32.mrb[70].mxu0  ;;  %v2175_v8 = vpop.f32.mrb[70].mxu1 }
 0x668   : > { %v3061_v11 = vmul.f32 -1.442695, %v2131_v60  ;;  %v3650_v12 = vpop.f32.mrb[71].mxu0  ;;  %v3658_v50 = vpop.f32.mrb[71].mxu1 }
 0x669   : > { %v3964_v13 = vpop.eup %3963 }
 0x66a   : > { %3969 = vpow2.f32 %v3061_v11  ;;  %v1990_v3 = vadd.f32 1.0, %v3964_v13 }
 0x66c   : > { %v3966_v2 = vpop.eup %3965 }
 0x66d   : > { %v2128_v16 = vadd.f32 1.0, %v3966_v2 }
 0x66f   : > { %3971 = vrcp.f32 %v2128_v16 }
 0x670   : > { %3973 = vrcp.f32 %v1990_v3 }
 0x671   : > { %v3968_v22 = vpop.eup %3967 }
 0x672   : > { %v2033_v55 = vmul.f32 %v3968_v22, %v2028_v19 }
 0x674   : > { %v3970_v23 = vpop.eup %3969  ;;  %v2034_v6 = vadd.f32 %v3178_v17, %v2033_v55 }
 0x675   : > { %v2135_v24 = vadd.f32 1.0, %v3970_v23 }
 0x676   : > { %3975 = vtanh.f32 %v2034_v6 }
 0x677   : > { %3977 = vrcp.f32 %v2135_v24 }
 0x679   : > { %v3972_v28 = vpop.eup %3971 }
 0x67a   : > { %v2178_v29 = vmul.f32 %v3972_v28, %v2173_v14  ;;  %v3974_v30 = vpop.eup %3973 }
 0x67b   : > { %v2036_v32 = vsub.f32 1.0, %v3974_v30  ;;  %v2038_v34 = vmul.f32 %v3974_v30, %v4653_v20 }
 0x67c   : > { %v2179_v31 = vadd.f32 %v3179_v25, %v2178_v29 }
 0x67e   : > { %3979 = vtanh.f32 %v2179_v31  ;;  %v3223_v31 = vld [vmem:[%s4288_s7 + $0xa0] sm:$0xff]  }
 0x680   : > { %v3976_v33 = vpop.eup %3975 }
 0x681   : > { %v2037_v36 = vmul.f32 %v3976_v33, %v2036_v32  ;;  %v3978_v38 = vpop.eup %3977 }
 0x682   : > { %v2181_v21 = vsub.f32 1.0, %v3978_v38  ;;  %v2183_v20 = vmul.f32 %v3978_v38, %v4673_v10 }
 0x683   : > { %v4725_v37 = vadd.f32 %v2038_v34, %v2037_v36  ;;  %v3190_v34 = vunpack.c.l.bf16 %v3223_v31 }
 0x685   : > { %3063 = vst.msk [vmem:[%s4393_s24 + $0x50] sm:$0xff] %vm291_vm1, %v4725_v37  ;;  %v2201_v39 = vpack.c.bf16 %v4725_v37, %v4725_v37 }
 0x687   : > { %3664 = vmatmul.mubr.msk.bf16.vlgmr.msra.gmra.mrb[72].mxu0 %vm291_vm1, %v2201_v39  ;;  %3672 = vmatmul.mubr.msk.bf16.vlgmr.msra.gmra.mrb[72].mxu1 %vm291_vm1, %v2201_v39 }
 0x688   : > { %v3980_v40 = vpop.eup %3979  ;;  %3684 = vmatpush3.bf16.msra.mxu1 %v4631_v7  ;;  %3676 = vmatpush3.bf16.msra.mxu0 %v4663_v63 }
 0x689   : > { %v2182_v26 = vmul.f32 %v3980_v40, %v2181_v21  ;;  %3685 = vmatprep.subr.bf16.mxu1 %v4125_v0  ;;  %3677 = vmatprep.subr.bf16.mxu0 %v4125_v0 }
 0x68a   : > { %3679 = vmatprep.mubr.msk.bf16.mxu0 %vm4126_vm0, %v4125_v0  ;;  %3687 = vmatprep.mubr.msk.bf16.mxu1 %vm4126_vm0, %v4125_v0 }
 0x68b   : > { %v4743_v42 = vadd.f32 %v2183_v20, %v2182_v26  ;;  %v3191_v26 = vunpack.c.h.bf16 %v3223_v31 }
 0x68c   : > { %3686 = vmatpush3.bf16.msra.mxu1 %v4641_v9  ;;  %3678 = vmatpush3.bf16.msra.mxu0 %v4676_v27 }
 0x68d   : > { %3064 = vst.msk [vmem:[%s4393_s24 + $0x58] sm:$0xff] %vm291_vm1, %v4743_v42  ;;  %v2346_v10 = vpack.c.bf16 %v4743_v42, %v4743_v42  ;;  %3691 = vmatprep.subr.bf16.mxu0 %v4125_v0  ;;  %3699 = vmatprep.subr.bf16.mxu1 %v4125_v0 }
 0x68f   : > { %3680 = vmatmul.mubr.msk.bf16.vlgmr.msra.gmra.mrb[76].mxu0 %vm291_vm1, %v2201_v39  ;;  %3688 = vmatmul.mubr.msk.bf16.vlgmr.msra.gmra.mrb[76].mxu1 %vm291_vm1, %v2346_v10 }
 0x690   : > { %3692 = vmatpush3.bf16.msra.mxu0 %v4613_v57  ;;  %3700 = vmatpush3.bf16.msra.mxu1 %v4663_v63 }
 0x691   : > { %3693 = vmatprep.subr.bf16.mxu0 %v4125_v0  ;;  %3701 = vmatprep.subr.bf16.mxu1 %v4125_v0 }
 0x692   : > { %3695 = vmatprep.mubr.msk.bf16.mxu0 %vm4126_vm0, %v4125_v0  ;;  %3703 = vmatprep.mubr.msk.bf16.mxu1 %vm4126_vm0, %v4125_v0 }
 0x694   : > { %3694 = vmatpush3.bf16.msra.mxu0 %v4623_v4  ;;  %3702 = vmatpush3.bf16.msra.mxu1 %v4676_v27 }
 0x695   : > { %3715 = vmatprep.subr.bf16.mxu1 %v4125_v0  ;;  %3707 = vmatprep.subr.bf16.mxu0 %v4125_v0 }
 0x697   : > { %3696 = vmatmul.mubr.msk.bf16.vlgmr.msra.gmra.mrb[80].mxu0 %vm291_vm1, %v2346_v10  ;;  %3704 = vmatmul.mubr.msk.bf16.vlgmr.msra.gmra.mrb[80].mxu1 %vm291_vm1, %v2346_v10 }
 0x698   : > { %3716 = vmatpush3.bf16.msra.mxu1 %v4613_v57  ;;  %3708 = vmatpush3.bf16.msra.mxu0 %v4631_v7 }
 0x699   : > { %3717 = vmatprep.subr.bf16.mxu1 %v4125_v0  ;;  %3709 = vmatprep.subr.bf16.mxu0 %v4125_v0 }
 0x69a   : > { %3711 = vmatprep.mubr.msk.bf16.mxu0 %vm4126_vm0, %v4125_v0  ;;  %3719 = vmatprep.mubr.msk.bf16.mxu1 %vm4126_vm0, %v4125_v0 }
 0x69c   : > { %3718 = vmatpush3.bf16.msra.mxu1 %v4623_v4  ;;  %3710 = vmatpush3.bf16.msra.mxu0 %v4641_v9 }
 0x69d   : > { %3731 = vmatprep.subr.bf16.mxu1 %v4125_v0  ;;  %3723 = vmatprep.subr.bf16.mxu0 %v4125_v0 }
 0x75a   : > { %v2239_v46 = vpop.f32.mrb[72].mxu0  ;;  %v2279_v48 = vpop.f32.mrb[72].mxu1 }
 0x75b   : > { %v2285_v49 = vadd.f32 %v3182_v44, %v2239_v46  ;;  %v3665_v51 = vpop.f32.mrb[73].mxu0  ;;  %v3673_v52 = vpop.f32.mrb[73].mxu1  ;;  %v2292_v58 = vadd.f32 %v3186_v47, %v2279_v48 }
 0x75c   : > { %v2242_v53 = vpop.f32.mrb[74].mxu0  ;;  %v2282_v54 = vpop.f32.mrb[74].mxu1 }
 0x75d   : > { %v3073_v35 = vmul.f32 -1.442695, %v2285_v49  ;;  %v3666_v56 = vpop.f32.mrb[75].mxu0  ;;  %v3674_v41 = vpop.f32.mrb[75].mxu1  ;;  %v3074_v59 = vmul.f32 -1.442695, %v2292_v58 }
 0x75f   : > { %3981 = vpow2.f32 %v3073_v35 }
 0x760   : > { %3983 = vpow2.f32 %v3074_v59 }
 0x762   : > { %v2333_v60 = vpop.f32.mrb[76].mxu0  ;;  %v2384_v61 = vpop.f32.mrb[76].mxu1 }
 0x763   : > { %v2430_v62 = vadd.f32 %v3183_v1, %v2384_v61  ;;  %v3681_v5 = vpop.f32.mrb[77].mxu0  ;;  %v3689_v8 = vpop.f32.mrb[77].mxu1  ;;  %v2334_v36 = vadd.f32 %v4720_v18, %v2333_v60 }
 0x764   : > { %v2336_v11 = vpop.f32.mrb[78].mxu0  ;;  %v2387_v12 = vpop.f32.mrb[78].mxu1 }
 0x765   : > { %v3078_v50 = vmul.f32 -1.442695, %v2430_v62  ;;  %v3682_v13 = vpop.f32.mrb[79].mxu0  ;;  %v3690_v2 = vpop.f32.mrb[79].mxu1 }
 0x767   : > { %3985 = vpow2.f32 %v3078_v50 }
 0x769   : > { %v3982_v16 = vpop.eup %3981 }
 0x76a   : > { %v2289_v3 = vadd.f32 1.0, %v3982_v16  ;;  %v2424_v17 = vpop.f32.mrb[80].mxu0  ;;  %v2478_v19 = vpop.f32.mrb[80].mxu1 }
 0x76b   : > { %v2437_v22 = vadd.f32 %v3187_v15, %v2424_v17  ;;  %v3697_v55 = vpop.f32.mrb[81].mxu0  ;;  %v3705_v23 = vpop.f32.mrb[81].mxu1  ;;  %v2479_v10 = vadd.f32 %v4720_v18, %v2478_v19 }
 0x76c   : > { %3987 = vrcp.f32 %v2289_v3  ;;  %v2427_v6 = vpop.f32.mrb[82].mxu0  ;;  %v2481_v24 = vpop.f32.mrb[82].mxu1 }
 0x76d   : > { %v3079_v25 = vmul.f32 -1.442695, %v2437_v22  ;;  %v3698_v14 = vpop.f32.mrb[83].mxu0  ;;  %v3706_v28 = vpop.f32.mrb[83].mxu1 }
 0x76e   : > { %v3984_v29 = vpop.eup %3983 }
 0x76f   : > { %3989 = vpow2.f32 %v3079_v25  ;;  %v2296_v33 = vadd.f32 1.0, %v3984_v29 }
 0x771   : > { %v3986_v30 = vpop.eup %3985 }
 0x772   : > { %v2434_v32 = vadd.f32 1.0, %v3986_v30 }
 0x774   : > { %3991 = vrcp.f32 %v2434_v32 }
 0x775   : > { %3993 = vrcp.f32 %v2296_v33 }
 0x776   : > { %v3988_v38 = vpop.eup %3987 }
 0x777   : > { %v2339_v39 = vmul.f32 %v3988_v38, %v2334_v36 }
 0x779   : > { %v3990_v21 = vpop.eup %3989  ;;  %v2340_v40 = vadd.f32 %v3190_v34, %v2339_v39 }
 0x77a   : > { %v2441_v20 = vadd.f32 1.0, %v3990_v21 }
 0x77b   : > { %3995 = vtanh.f32 %v2340_v40  ;;  %v3226_v40 = vld [vmem:[%s4288_s7 + $0xb8] sm:$0xff]  }
 0x77c   : > { %3997 = vrcp.f32 %v2441_v20 }
 0x77e   : > { %v3992_v43 = vpop.eup %3991 }
 0x77f   : > { %v2484_v44 = vmul.f32 %v3992_v43, %v2479_v10  ;;  %v3994_v45 = vpop.eup %3993  ;;  %v3202_v10 = vunpack.c.l.bf16 %v3226_v40 }
 0x780   : > { %v2342_v47 = vsub.f32 1.0, %v3994_v45  ;;  %v2344_v49 = vmul.f32 %v3994_v45, %v4725_v37 }
 0x781   : > { %v2485_v46 = vadd.f32 %v3191_v26, %v2484_v44 }
 0x783   : > { %3999 = vtanh.f32 %v2485_v46 }
 0x785   : > { %v3996_v48 = vpop.eup %3995 }
 0x786   : > { %v2343_v51 = vmul.f32 %v3996_v48, %v2342_v47  ;;  %v3998_v53 = vpop.eup %3997 }
 0x787   : > { %v2487_v35 = vsub.f32 1.0, %v3998_v53  ;;  %v2489_v37 = vmul.f32 %v3998_v53, %v4743_v42 }
 0x788   : > { %v4788_v52 = vadd.f32 %v2344_v49, %v2343_v51  ;;  %v3203_v49 = vunpack.c.h.bf16 %v3226_v40 }
 0x78a   : > { %3081 = vst.msk [vmem:[%s4393_s24 + $0x60] sm:$0xff] %vm291_vm1, %v4788_v52  ;;  %v2507_v54 = vpack.c.bf16 %v4788_v52, %v4788_v52 }
 0x78c   : > { %3712 = vmatmul.mubr.msk.bf16.vlgmr.msra.gmra.mrb[84].mxu0 %vm291_vm1, %v2507_v54  ;;  %3720 = vmatmul.mubr.msk.bf16.vlgmr.msra.gmra.mrb[84].mxu1 %vm291_vm1, %v2507_v54 }
 0x78d   : > { %v4000_v56 = vpop.eup %3999  ;;  %3732 = vmatpush3.bf16.msra.mxu1 %v4631_v7  ;;  %3724 = vmatpush3.bf16.msra.mxu0 %v4663_v63 }
 0x78e   : > { %v2488_v41 = vmul.f32 %v4000_v56, %v2487_v35  ;;  %3733 = vmatprep.subr.bf16.mxu1 %v4125_v0  ;;  %3725 = vmatprep.subr.bf16.mxu0 %v4125_v0 }
 0x78f   : > { %3727 = vmatprep.mubr.msk.bf16.mxu0 %vm4126_vm0, %v4125_v0  ;;  %3735 = vmatprep.mubr.msk.bf16.mxu1 %vm4126_vm0, %v4125_v0 }
 0x790   : > { %v4806_v58 = vadd.f32 %v2489_v37, %v2488_v41 }
 0x791   : > { %3734 = vmatpush3.bf16.msra.mxu1 %v4641_v9  ;;  %3726 = vmatpush3.bf16.msra.mxu0 %v4676_v27 }
 0x792   : > { %3082 = vst.msk [vmem:[%s4393_s24 + $0x68] sm:$0xff] %vm291_vm1, %v4806_v58  ;;  %v2652_v7 = vpack.c.bf16 %v4806_v58, %v4806_v58  ;;  %3739 = vmatprep.subr.bf16.mxu0 %v4125_v0  ;;  %3747 = vmatprep.subr.bf16.mxu1 %v4125_v0 }
 0x794   : > { %3728 = vmatmul.mubr.msk.bf16.vlgmr.msra.gmra.mrb[88].mxu0 %vm291_vm1, %v2507_v54  ;;  %3736 = vmatmul.mubr.msk.bf16.vlgmr.msra.gmra.mrb[88].mxu1 %vm291_vm1, %v2652_v7 }
 0x795   : > { %3740 = vmatpush3.bf16.msra.mxu0 %v4613_v57  ;;  %3748 = vmatpush3.bf16.msra.mxu1 %v4663_v63  ;;  %v3224_v57 = vld [vmem:[%s4288_s7 + $0xa8] sm:$0xff]   ;;  %v3225_v63 = vld [vmem:[%s4288_s7 + $0xb0] sm:$0xff]  }
 0x796   : > { %3741 = vmatprep.subr.bf16.mxu0 %v4125_v0  ;;  %3749 = vmatprep.subr.bf16.mxu1 %v4125_v0  ;;  %v3194_v9 = vunpack.c.l.bf16 %v3224_v57  ;;  %v3198_v1 = vunpack.c.l.bf16 %v3225_v63  ;;  %v3199_v6 = vunpack.c.h.bf16 %v3225_v63 }
 0x797   : > { %3743 = vmatprep.mubr.msk.bf16.mxu0 %vm4126_vm0, %v4125_v0  ;;  %3751 = vmatprep.mubr.msk.bf16.mxu1 %vm4126_vm0, %v4125_v0 }
 0x799   : > { %3742 = vmatpush3.bf16.msra.mxu0 %v4623_v4  ;;  %3750 = vmatpush3.bf16.msra.mxu1 %v4676_v27  ;;  %v3195_v27 = vunpack.c.h.bf16 %v3224_v57 }
 0x79c   : > { %3744 = vmatmul.mubr.msk.bf16.vlgmr.msra.gmra.mrb[92].mxu0 %vm291_vm1, %v2652_v7  ;;  %3752 = vmatmul.mubr.msk.bf16.vlgmr.msra.gmra.mrb[92].mxu1 %vm291_vm1, %v2652_v7 }
 0x85f   : > { %v2545_v42 = vpop.f32.mrb[84].mxu0  ;;  %v2585_v59 = vpop.f32.mrb[84].mxu1 }
 0x860   : > { %v2591_v60 = vadd.f32 %v3194_v9, %v2545_v42  ;;  %v3713_v61 = vpop.f32.mrb[85].mxu0  ;;  %v3721_v62 = vpop.f32.mrb[85].mxu1  ;;  %v2598_v12 = vadd.f32 %v3198_v1, %v2585_v59 }
 0x861   : > { %v2548_v5 = vpop.f32.mrb[86].mxu0  ;;  %v2588_v8 = vpop.f32.mrb[86].mxu1 }
 0x862   : > { %v3091_v0 = vmul.f32 -1.442695, %v2591_v60  ;;  %v3714_v11 = vpop.f32.mrb[87].mxu0  ;;  %v3722_v4 = vpop.f32.mrb[87].mxu1  ;;  %v3092_v50 = vmul.f32 -1.442695, %v2598_v12 }
 0x864   : > { %4001 = vpow2.f32 %v3091_v0 }
 0x865   : > { %4003 = vpow2.f32 %v3092_v50 }
 0x867   : > { %v2639_v13 = vpop.f32.mrb[88].mxu0  ;;  %v2690_v2 = vpop.f32.mrb[88].mxu1 }
 0x868   : > { %v2736_v15 = vadd.f32 %v3195_v27, %v2690_v2  ;;  %v3729_v16 = vpop.f32.mrb[89].mxu0  ;;  %v3737_v3 = vpop.f32.mrb[89].mxu1  ;;  %v2640_v43 = vadd.f32 %v4720_v18, %v2639_v13 }
 0x869   : > { %v2642_v17 = vpop.f32.mrb[90].mxu0  ;;  %v2693_v19 = vpop.f32.mrb[90].mxu1 }
 0x86a   : > { %v3096_v22 = vmul.f32 -1.442695, %v2736_v15  ;;  %v3730_v55 = vpop.f32.mrb[91].mxu0  ;;  %v3738_v23 = vpop.f32.mrb[91].mxu1 }
 0x86c   : > { %4005 = vpow2.f32 %v3096_v22 }
 0x86e   : > { %v4002_v24 = vpop.eup %4001 }
 0x86f   : > { %v2595_v25 = vadd.f32 1.0, %v4002_v24  ;;  %v2730_v14 = vpop.f32.mrb[92].mxu0  ;;  %v2784_v28 = vpop.f32.mrb[92].mxu1 }
 0x870   : > { %v2743_v29 = vadd.f32 %v3199_v6, %v2730_v14  ;;  %v3745_v30 = vpop.f32.mrb[93].mxu0  ;;  %v3753_v31 = vpop.f32.mrb[93].mxu1  ;;  %v2785_v51 = vadd.f32 %v4720_v18, %v2784_v28 }
 0x871   : > { %4007 = vrcp.f32 %v2595_v25  ;;  %v2733_v32 = vpop.f32.mrb[94].mxu0  ;;  %v2787_v33 = vpop.f32.mrb[94].mxu1 }
 0x872   : > { %v3097_v34 = vmul.f32 -1.442695, %v2743_v29  ;;  %v3746_v36 = vpop.f32.mrb[95].mxu0  ;;  %v3754_v38 = vpop.f32.mrb[95].mxu1 }
 0x873   : > { %v4004_v39 = vpop.eup %4003 }
 0x874   : > { %4009 = vpow2.f32 %v3097_v34  ;;  %v2602_v26 = vadd.f32 1.0, %v4004_v39 }
 0x876   : > { %v4006_v21 = vpop.eup %4005 }
 0x877   : > { %v2740_v20 = vadd.f32 1.0, %v4006_v21 }
 0x879   : > { %4011 = vrcp.f32 %v2740_v20 }
 0x87a   : > { %4013 = vrcp.f32 %v2602_v26 }
 0x87b   : > { %v4008_v44 = vpop.eup %4007 }
 0x87c   : > { %v2645_v45 = vmul.f32 %v4008_v44, %v2640_v43 }
 0x87e   : > { %v4010_v46 = vpop.eup %4009  ;;  %v2646_v47 = vadd.f32 %v3202_v10, %v2645_v45 }
 0x87f   : > { %v2747_v48 = vadd.f32 1.0, %v4010_v46 }
 0x880   : > { %4015 = vtanh.f32 %v2646_v47 }
 0x881   : > { %4017 = vrcp.f32 %v2747_v48 }
 0x883   : > { %v4012_v53 = vpop.eup %4011 }
 0x884   : > { %v2790_v54 = vmul.f32 %v4012_v53, %v2785_v51  ;;  %v4014_v35 = vpop.eup %4013 }
 0x885   : > { %v2648_v37 = vsub.f32 1.0, %v4014_v35  ;;  %v2650_v7 = vmul.f32 %v4014_v35, %v4788_v52 }
 0x886   : > { %v2791_v56 = vadd.f32 %v3203_v49, %v2790_v54 }
 0x888   : > { %4019 = vtanh.f32 %v2791_v56 }
 0x88a   : > { %v4016_v41 = vpop.eup %4015 }
 0x88b   : > { %v2649_v57 = vmul.f32 %v4016_v41, %v2648_v37  ;;  %v4018_v63 = vpop.eup %4017 }
 0x88c   : > { %v2793_v18 = vsub.f32 1.0, %v4018_v63  ;;  %v2795_v1 = vmul.f32 %v4018_v63, %v4806_v58 }
 0x88d   : > { %v2651_v9 = vadd.f32 %v2650_v7, %v2649_v57 }
 0x88f   : > { %3099 = vst.msk [vmem:[%s4393_s24 + $0x70] sm:$0xff] %vm291_vm1, %v2651_v9  ;;  %2800 = vst.msk [vmem:[#allocation2] sm:$0xff] %vm291_vm1, %v2651_v9 }
 0x892   : > { %v4020_v42 = vpop.eup %4019 }
 0x893   : > { %v2794_v59 = vmul.f32 %v4020_v42, %v2793_v18 }
 0x895   : > { %v2796_v60 = vadd.f32 %v2795_v1, %v2794_v59 }
 0x897   : > { %3100 = vst.msk [vmem:[%s4393_s24 + $0x78] sm:$0xff] %vm291_vm1, %v2796_v60  ;;  %2801 = vst.msk [vmem:[#allocation2 + $0x8] sm:$0xff] %vm291_vm1, %v2796_v60 }
 0x898   : > { %s3107_s14 = sshll.u32 %s4106_s18, 8  ;;  %s2835_s9 = sshll.u32 %s4393_s24, 4  ;;  %s2836_s9 = int_to_ptr.vmem [resolvable:$true] %s2835_s9 }
 0x899   : > { %s2818_s21 = scalar_lea.hbm %s4891_s4, %s3107_s14  ;;  %s4127_s23 = smov 256  }
 0x89a   : > { %p4913_p11 = scmp.ne.s32.totalorder %s4904_s29, 0  ;;  %s4128_s1 = smov 512  }
 0x89b   : > { %s4129_s22 = smov 2   ;;  %s4130_s7 = smov 128  }
 0x89c   : > { %3770 = sst [smem:[#allocation12]] (%p4913_p11), %s4127_s23  ;;  %s4131_s18 = smov 8  }
 0x89d   : > { %3771 = sst [smem:[#allocation12 + $0x1]] (%p4913_p11), %s4128_s1  ;;  %s4132_s25 = smov [#allocation11]  }
 0x89e   : > { %3772 = sst [smem:[#allocation12 + $0x2]] (%p4913_p11), %s4129_s22  ;;  %s4133_s26 = smov 0  }
 0x89f   : > { %3773 = sst [smem:[#allocation12 + $0x3]] (%p4913_p11), %s4130_s7 }
 0x8a0   : > { %3774 = sst [smem:[#allocation12 + $0x4]] (%p4913_p11), %s4130_s7 }
 0x8a1   : > { %3775 = sst [smem:[#allocation12 + $0x5]] (%p4913_p11), %s4131_s18 }
 0x8a2   : > { %3776 = dma.general (%p4913_p11), %s2836_s9, 2048, %s2818_s21, %s2803_s11, %s4132_s25, [#allocation12], %s4133_s26, 0  }
 0x8a3 PF: > { %s2863_s28 = sand.u32 1, %s4094_s15   ;;  %p4914_p0 = scmp.ne.s32.totalorder %s4905_s5, 0 }
 0x8a4   : > { %s2864_s6 = scalar_lea.sflag [#allocation5], %s2863_s28 }
 0x8a5   : > { %p3783_p2 = pnand %p2949_p3, %p4914_p0 }
 0x8a7   : > { %4089 = dma.done.wait (!%p3783_p2), %s2864_s6, 2048  }
 0x8a8   : > { %4091 = vsyncadd (!%p3783_p2), %s2864_s6, 4294965248  ;;  %s21_s20 = sadd.s32 1, %s4114_s20   ;;  %s4915_s29 = sld [smem:[#allocation17_spill]] }
 0x8a9   : > { %p18_p6 = scmp.ge.s32.totalorder %s21_s20, 4   ;;  %s4916_s15 = smov %s4098_s16 }
 0x8aa   : > { %s4917_s16 = smov %s4102_s17  ;;  %s4918_s17 = smov %s4221_s30 }
 0x8ab   : > { %s4919_s18 = smov %s4110_s19  ;;  %20 = sbr.rel (!%p18_p6) target bundleno = 9 (0x9), region = 115 }
 0x8ae   : > { %s4920_s19 = smov %s4915_s29 }
 0x8b2   :  { %2869 = vsyncpa [#allocation4], 1 }
 0x8b3   :  { %2871 = vsyncpa [#allocation4 + $0x1], 1 }
 0x8b4   :  { %2872 = vsyncpa [#allocation7], 1 }
 0x8b5   :  { %2873 = vsyncpa [#allocation5], 1 }
 0x8b6   :  { %2875 = vsyncpa [#allocation5 + $0x1], 1 }

</bundles_post_ra>
